<compile_context>
chip_gen: v5e
topology: v5e:2x2
jax: 0.10.0
libtpu: 0.0.40
codegen_flags: <defaults>
</compile_context>

<pallas_src>
import functools
import numpy as np
import jax
import jax.numpy as jnp
from jax import lax
from jax.experimental import pallas as pl
from jax.experimental.pallas import tpu as pltpu

# ----------------------- model configuration (small) -----------------------
BATCH = 2
IN_CHANNELS = 3
SPATIAL = 16
NUM_CLASSES = 3
DEPTH = 3            # 2 maxpools -> 16x16 -> 4x4 at the bottleneck
START_FILTS = 8      # final encoder channels = 8 * 2**(DEPTH-1) = 32
LATENT = 16          # latent_dim
BN_EPS = 1e-5

F32 = jnp.float32
BF16 = jnp.bfloat16


# ----------------------------- pallas plumbing ------------------------------
def _full_spec(shape):
    nd = len(shape)
    return pl.BlockSpec(shape, lambda i, _nd=nd: (0,) * _nd)


def fused_call(kernel, out_shapes, args):
    """Single-block pallas_call: every operand is one full VMEM-resident block."""
    multi = isinstance(out_shapes, (tuple, list))
    outs = tuple(out_shapes) if multi else (out_shapes,)
    return pl.pallas_call(
        kernel,
        grid=(1,),
        in_specs=[_full_spec(a.shape) for a in args],
        out_specs=(tuple(_full_spec(o.shape) for o in outs) if multi
                   else _full_spec(outs[0].shape)),
        out_shape=(tuple(outs) if multi else outs[0]),
        compiler_params=pltpu.CompilerParams(dimension_semantics=("arbitrary",)),
    )(*args)


# ----------------------- structural matrices (host/numpy) -------------------
def _row_shift_mats(n, h):
    """0/1 matrices: (Up@x)[r]=x[r-1] (zero at top of each image), (Dn@x)[r]=x[r+1]."""
    m = n * h
    up = np.zeros((m, m), np.float32)
    dn = np.zeros((m, m), np.float32)
    for r in range(m):
        if r % h != 0:
            up[r, r - 1] = 1.0
        if r % h != h - 1:
            dn[r, r + 1] = 1.0
    return up, dn


def _band_pattern(w):
    """T[wi, wo, kx] = 1 iff wi == wo + kx - 1 (3-wide band, zero padding at edges)."""
    t = np.zeros((w, w, 3), np.float32)
    for wo in range(w):
        for kx in range(3):
            wi = wo + kx - 1
            if 0 <= wi < w:
                t[wi, wo, kx] = 1.0
    return t


def _pool_mats(n, h, w, c):
    """Selection matrices for 2x2/stride-2 max pooling in the (N*H, W*C) layout."""
    lanes = w * c
    sel_e = np.zeros((lanes, (w // 2) * c), np.float32)
    sel_o = np.zeros_like(sel_e)
    for wo in range(w // 2):
        for cc in range(c):
            sel_e[(2 * wo) * c + cc, wo * c + cc] = 1.0
            sel_o[(2 * wo + 1) * c + cc, wo * c + cc] = 1.0
    row_e = np.zeros((n * (h // 2), n * h), np.float32)
    row_o = np.zeros_like(row_e)
    for nn in range(n):
        for ho in range(h // 2):
            row_e[nn * (h // 2) + ho, nn * h + 2 * ho] = 1.0
            row_o[nn * (h // 2) + ho, nn * h + 2 * ho + 1] = 1.0
    return sel_e, sel_o, row_e, row_o


def _bn_group_mats(w, c):
    """G (W*C, C): per-channel reduction over the w-blocks; GT broadcasts back to lanes."""
    g = np.tile(np.eye(c, dtype=np.float32), (w, 1))
    return g, np.ascontiguousarray(g.T)


def _bilinear_matrix(n):
    """nn.Upsample(scale_factor=2, mode='bilinear', align_corners=False), 1-D (2n, n)."""
    a = np.zeros((2 * n, n), np.float32)
    for o in range(2 * n):
        src = max((o + 0.5) / 2.0 - 0.5, 0.0)
        i0 = min(int(np.floor(src)), n - 1)
        i1 = min(i0 + 1, n - 1)
        lam = src - i0
        a[o, i0] += 1.0 - lam
        a[o, i1] += lam
    return a


# ---------------- weight -> GEMM-matrix conversion (traced, tiny) ------------
def conv_band_mats(w_hwio, w):
    """3x3 conv weight (3,3,Cin,Cout) -> 3 banded (W*Cin, W*Cout) bf16 matrices (per ky)."""
    t = jnp.asarray(_band_pattern(w))                       # (w, w, 3)
    cin, cout = w_hwio.shape[2], w_hwio.shape[3]
    mats = []
    for ky in range(3):
        b = jnp.einsum('iok,kcd->icod', t, w_hwio[ky])      # (w, cin, w, cout)
        mats.append(b.reshape(w * cin, w * cout).astype(BF16))
    return mats


def widen_bias(b, w):
    """Per-channel bias -> lane-wide (1, W*C) row (lane index = w*C + c)."""
    return jnp.tile(b, (w,)).reshape(1, -1).astype(F32)


# ----------------------------- kernel helpers --------------------------------
def _conv3x3_block(groups, bias_ref, up, dn):
    """3x3 conv + ReLU as 3 banded GEMMs per input-channel group (groups accumulate,
    which also implements the decoder's channel concat without materializing it)."""
    acc = None
    for v, bands in groups:
        vb = v.astype(BF16)
        vu = jnp.dot(up, vb, preferred_element_type=F32).astype(BF16)   # row y-1 (zero pad)
        vd = jnp.dot(dn, vb, preferred_element_type=F32).astype(BF16)   # row y+1 (zero pad)
        part = (jnp.dot(vu, bands[0][...], preferred_element_type=F32)
                + jnp.dot(vb, bands[1][...], preferred_element_type=F32)
                + jnp.dot(vd, bands[2][...], preferred_element_type=F32))
        acc = part if acc is None else acc + part
    return jnp.maximum(acc + bias_ref[...], 0.0)


def _batchnorm(h, gamma_ref, beta_ref, g_ref, gt_ref, count):
    """Training-mode BatchNorm2d (batch stats, biased variance), fully in-kernel."""
    inv = 1.0 / count
    s1 = jnp.dot(jnp.sum(h, axis=0, keepdims=True), g_ref[...],
                 preferred_element_type=F32)
    s2 = jnp.dot(jnp.sum(h * h, axis=0, keepdims=True), g_ref[...],
                 preferred_element_type=F32)
    mean = s1 * inv
    var = s2 * inv - mean * mean
    scale = gamma_ref[...] * lax.rsqrt(var + BN_EPS)
    shift = beta_ref[...] - mean * scale
    scale_w = jnp.dot(scale, gt_ref[...], preferred_element_type=F32)
    shift_w = jnp.dot(shift, gt_ref[...], preferred_element_type=F32)
    return h * scale_w + shift_w


# ------------------------------ fused kernels --------------------------------
def _encoder_stage_kernel(*refs, has_bn, has_pool, count):
    it = iter(refs)
    x_ref, up_ref, dn_ref = next(it), next(it), next(it)
    b1 = [next(it), next(it), next(it)]
    bias1 = next(it)
    b2 = [next(it), next(it), next(it)]
    bias2 = next(it)
    if has_bn:
        gamma, beta, g, gt = next(it), next(it), next(it), next(it)
    if has_pool:
        sel_e, sel_o, row_e, row_o = next(it), next(it), next(it), next(it)
    skip_ref = next(it)
    pool_ref = next(it) if has_pool else None

    up = up_ref[...]
    dn = dn_ref[...]

    h = _conv3x3_block([(x_ref[...], b1)], bias1, up, dn)       # conv1 + ReLU
    h = _conv3x3_block([(h, b2)], bias2, up, dn)                # conv2 + ReLU
    if has_bn:
        h = _batchnorm(h, gamma, beta, g, gt, count)            # BN (batch stats)
    skip_ref[...] = h                                           # before_pool / skip
    if has_pool:                                                # MaxPool2d(2,2) in-kernel
        hb = h.astype(BF16)
        h_lane = jnp.maximum(
            jnp.dot(hb, sel_e[...], preferred_element_type=F32),
            jnp.dot(hb, sel_o[...], preferred_element_type=F32))
        hlb = h_lane.astype(BF16)
        pool_ref[...] = jnp.maximum(
            jnp.dot(row_e[...], hlb, preferred_element_type=F32),
            jnp.dot(row_o[...], hlb, preferred_element_type=F32))


def _bottleneck_kernel(h_ref, eps_ref, w1_ref, b1_ref, w2_ref, b2_ref,
                       w3_ref, b3_ref, z_ref):
    hb = h_ref[...].astype(BF16)
    mu = jnp.dot(hb, w1_ref[...], preferred_element_type=F32) + b1_ref[...]
    logvar = jnp.dot(hb, w2_ref[...], preferred_element_type=F32) + b2_ref[...]
    std = jnp.exp(0.5 * logvar)
    # Faithful to the torch module: eps = torch.normal(mu, std), z = mu + std * eps.
    eps = mu + std * eps_ref[...]
    z = mu + std * eps
    z = jnp.dot(z.astype(BF16), w3_ref[...], preferred_element_type=F32) + b3_ref[...]
    z_ref[...] = jnp.maximum(z, 0.0)                            # ReLU(fc3(z))


def _decoder_stage_kernel(*refs, has_final, count):
    it = iter(refs)
    xup_ref, skip_ref = next(it), next(it)
    row_up, lane_up, b_up = next(it), next(it), next(it)
    gamma, beta, g, gt = next(it), next(it), next(it), next(it)
    up_ref, dn_ref = next(it), next(it)
    ba = [next(it), next(it), next(it)]
    bb = [next(it), next(it), next(it)]
    bias1 = next(it)
    b2 = [next(it), next(it), next(it)]
    bias2 = next(it)
    if has_final:
        w_fin, b_fin = next(it), next(it)
        xo_ref, xr_ref = next(it), next(it)
    else:
        out_ref = next(it)

    up = up_ref[...]
    dn = dn_ref[...]

    # bilinear 2x upsample + conv1x1 folded into two GEMMs (row interp, then kron(Aw^T, W1x1))
    xb = xup_ref[...].astype(BF16)
    u = jnp.dot(row_up[...], xb, preferred_element_type=F32)
    u = jnp.dot(u.astype(BF16), lane_up[...], preferred_element_type=F32) + b_up[...]
    u = _batchnorm(u, gamma, beta, g, gt, count)                # BN on from_up

    # conv1 over cat((from_up, from_down), C) as two accumulating channel groups (no concat)
    h = _conv3x3_block([(u, ba), (skip_ref[...], bb)], bias1, up, dn)
    h = _conv3x3_block([(h, b2)], bias2, up, dn)                # conv2 + ReLU

    if has_final:                                               # conv_final 1x1 + ReLU fused
        xo = jnp.dot(h.astype(BF16), w_fin[...], preferred_element_type=F32) + b_fin[...]
        xo_ref[...] = xo
        xr_ref[...] = jnp.maximum(xo, 0.0)
    else:
        out_ref[...] = h


# ------------------------------ parameters ---------------------------------
def _xavier(key, shape, fan_in, fan_out):
    std = np.sqrt(2.0 / (fan_in + fan_out))
    return jax.random.normal(key, shape, F32) * std


def init_params(key):
    keys = iter(jax.random.split(key, 64))
    params = {'down': [], 'up': []}
    ins = IN_CHANNELS
    for i in range(DEPTH):
        outs = START_FILTS * 2 ** i
        params['down'].append({
            'w1': _xavier(next(keys), (3, 3, ins, outs), 9 * ins, 9 * outs),
            'b1': jnp.zeros((outs,), F32),
            'w2': _xavier(next(keys), (3, 3, outs, outs), 9 * outs, 9 * outs),
            'b2': jnp.zeros((outs,), F32),
            'gamma': jnp.ones((outs,), F32),
            'beta': jnp.zeros((outs,), F32),
        })
        ins = outs
    flat = ins * 4 * 4                       # enc_out_dim * 4 * 4 = 512
    params['fc1_w'] = _xavier(next(keys), (flat, LATENT), flat, LATENT)
    params['fc1_b'] = jnp.zeros((LATENT,), F32)
    params['fc2_w'] = _xavier(next(keys), (flat, LATENT), flat, LATENT)
    params['fc2_b'] = jnp.zeros((LATENT,), F32)
    params['fc3_w'] = _xavier(next(keys), (LATENT, flat), LATENT, flat)
    params['fc3_b'] = jnp.zeros((flat,), F32)
    for i in range(DEPTH - 1):
        outs = ins // 2
        params['up'].append({
            'wu': _xavier(next(keys), (ins, outs), ins, outs),           # 1x1 of 'upsample'
            'bu': jnp.zeros((outs,), F32),
            'gamma': jnp.ones((outs,), F32),
            'beta': jnp.zeros((outs,), F32),
            'w1': _xavier(next(keys), (3, 3, 2 * outs, outs), 18 * outs, 9 * outs),
            'b1': jnp.zeros((outs,), F32),
            'w2': _xavier(next(keys), (3, 3, outs, outs), 9 * outs, 9 * outs),
            'b2': jnp.zeros((outs,), F32),
        })
        ins = outs
    params['final_w'] = _xavier(next(keys), (ins, NUM_CLASSES), ins, NUM_CLASSES)
    params['final_b'] = jnp.zeros((NUM_CLASSES,), F32)
    return params


# ------------------------------ forward pass --------------------------------
def forward(params, x_nchw, eps_noise):
    n = x_nchw.shape[0]
    # NCHW -> lane-dense layout: rows = N*H, lanes = W*C
    x = jnp.transpose(x_nchw, (0, 2, 3, 1)).reshape(n * SPATIAL, SPATIAL * IN_CHANNELS)

    # -------- encoder: one fused pallas_call per DownConv stage --------
    skips = []
    spat = SPATIAL
    h = x
    cin = IN_CHANNELS
    for i in range(DEPTH):
        p = params['down'][i]
        cout = START_FILTS * 2 ** i
        has_bn = i < DEPTH - 1
        has_pool = i < DEPTH - 1
        up_m, dn_m = _row_shift_mats(n, spat)
        args = [h, jnp.asarray(up_m, BF16), jnp.asarray(dn_m, BF16)]
        args += conv_band_mats(p['w1'], spat) + [widen_bias(p['b1'], spat)]
        args += conv_band_mats(p['w2'], spat) + [widen_bias(p['b2'], spat)]
        if has_bn:
            g, gt = _bn_group_mats(spat, cout)
            args += [p['gamma'].reshape(1, cout), p['beta'].reshape(1, cout),
                     jnp.asarray(g), jnp.asarray(gt)]
        if has_pool:
            sel_e, sel_o, row_e, row_o = _pool_mats(n, spat, spat, cout)
            args += [jnp.asarray(sel_e, BF16), jnp.asarray(sel_o, BF16),
                     jnp.asarray(row_e, BF16), jnp.asarray(row_o, BF16)]
        kern = functools.partial(_encoder_stage_kernel, has_bn=has_bn,
                                 has_pool=has_pool, count=float(n * spat * spat))
        skip_shape = jax.ShapeDtypeStruct((n * spat, spat * cout), F32)
        if has_pool:
            pool_shape = jax.ShapeDtypeStruct((n * (spat // 2), (spat // 2) * cout), F32)
            skip, pooled = fused_call(kern, (skip_shape, pool_shape), args)
            skips.append(skip)
            h = pooled
            spat //= 2
        else:
            skip = fused_call(kern, skip_shape, args)
            skips.append(skip)
            h = skip
        cin = cout

    # -------- VAE bottleneck (one kernel) --------
    cf, hf, wf = cin, spat, spat
    flat = cf * hf * wf
    # torch nn.Flatten() on NCHW -> (N, C*H*W); tiny layout glue (4 KB) done in the wrapper
    h_flat = jnp.transpose(h.reshape(n, hf, wf, cf), (0, 3, 1, 2)).reshape(n, flat)
    z = fused_call(
        _bottleneck_kernel,
        jax.ShapeDtypeStruct((n, flat), F32),
        [h_flat, eps_noise,
         params['fc1_w'].astype(BF16), params['fc1_b'].reshape(1, -1),
         params['fc2_w'].astype(BF16), params['fc2_b'].reshape(1, -1),
         params['fc3_w'].astype(BF16), params['fc3_b'].reshape(1, -1)])
    z = jnp.transpose(z.reshape(n, cf, hf, wf), (0, 2, 3, 1)).reshape(n * hf, wf * cf)

    # -------- decoder: one fused pallas_call per UpConv stage (+ final conv fused) --------
    xup = z
    c_up_in = cf
    spat_in = spat
    xo2d = xr2d = None
    for i in range(DEPTH - 1):
        p = params['up'][i]
        cout = c_up_in // 2
        spat_out = spat_in * 2
        skip = skips[DEPTH - 2 - i]
        a_h = _bilinear_matrix(spat_in)                              # (2*spat_in, spat_in)
        row_up = np.kron(np.eye(n, dtype=np.float32), a_h)           # per-image row interp
        lane_up = jnp.kron(jnp.asarray(a_h.T), p['wu'])              # width interp (x) 1x1 conv
        g, gt = _bn_group_mats(spat_out, cout)
        up_m, dn_m = _row_shift_mats(n, spat_out)
        w1a = p['w1'][:, :, :cout, :]                                # channels of from_up
        w1b = p['w1'][:, :, cout:, :]                                # channels of from_down
        has_final = (i == DEPTH - 2)
        args = [xup, skip,
                jnp.asarray(row_up, BF16), lane_up.astype(BF16),
                widen_bias(p['bu'], spat_out),
                p['gamma'].reshape(1, cout), p['beta'].reshape(1, cout),
                jnp.asarray(g), jnp.asarray(gt),
                jnp.asarray(up_m, BF16), jnp.asarray(dn_m, BF16)]
        args += conv_band_mats(w1a, spat_out)
        args += conv_band_mats(w1b, spat_out)
        args += [widen_bias(p['b1'], spat_out)]
        args += conv_band_mats(p['w2'], spat_out) + [widen_bias(p['b2'], spat_out)]
        count = float(n * spat_out * spat_out)
        if has_final:
            w_fin = jnp.kron(jnp.eye(spat_out, dtype=F32), params['final_w']).astype(BF16)
            args += [w_fin, widen_bias(params['final_b'], spat_out)]
            out_shapes = (jax.ShapeDtypeStruct((n * spat_out, spat_out * NUM_CLASSES), F32),
                          jax.ShapeDtypeStruct((n * spat_out, spat_out * NUM_CLASSES), F32))
            xo2d, xr2d = fused_call(
                functools.partial(_decoder_stage_kernel, has_final=True, count=count),
                out_shapes, args)
        else:
            out_shape = jax.ShapeDtypeStruct((n * spat_out, spat_out * cout), F32)
            xup = fused_call(
                functools.partial(_decoder_stage_kernel, has_final=False, count=count),
                out_shape, args)
        c_up_in = cout
        spat_in = spat_out

    # back to NCHW
    xo = jnp.transpose(xo2d.reshape(n, SPATIAL, SPATIAL, NUM_CLASSES), (0, 3, 1, 2))
    xr = jnp.transpose(xr2d.reshape(n, SPATIAL, SPATIAL, NUM_CLASSES), (0, 3, 1, 2))
    # TODO(synk): kl_loss is computed in the torch module but never returned; omitted here.
    # TODO(synk): BatchNorm running-stat buffer updates (training side effect) are not modeled.
    return xo, xr


# ---------------------------------- main ------------------------------------
if __name__ == "__main__":
    key = jax.random.PRNGKey(0)
    kp, kx, ke = jax.random.split(key, 3)
    params = init_params(kp)
    x = jax.random.normal(kx, (BATCH, IN_CHANNELS, SPATIAL, SPATIAL), F32)
    eps_noise = jax.random.normal(ke, (BATCH, LATENT), F32)

    fwd = jax.jit(forward)
    out, out_recon = fwd(params, x, eps_noise)
    jax.block_until_ready((out, out_recon))

    assert out.shape == (BATCH, NUM_CLASSES, SPATIAL, SPATIAL)
    assert out_recon.shape == (BATCH, NUM_CLASSES, SPATIAL, SPATIAL)
    assert bool(jnp.all(jnp.isfinite(out)))
    assert bool(jnp.all(out_recon >= 0.0))
    print("KERNEL_OK")
</pallas_src>

<mosaic_0001>
module attributes {stable_mosaic.version = 11 : i64} {
  func.func @_encoder_stage_kernel(%arg0: i32, %arg1: memref<32x48xf32, #tpu.memory_space<vmem>>, %arg2: memref<32x32xbf16, #tpu.memory_space<vmem>>, %arg3: memref<32x32xbf16, #tpu.memory_space<vmem>>, %arg4: memref<48x128xbf16, #tpu.memory_space<vmem>>, %arg5: memref<48x128xbf16, #tpu.memory_space<vmem>>, %arg6: memref<48x128xbf16, #tpu.memory_space<vmem>>, %arg7: memref<1x128xf32, #tpu.memory_space<vmem>>, %arg8: memref<128x128xbf16, #tpu.memory_space<vmem>>, %arg9: memref<128x128xbf16, #tpu.memory_space<vmem>>, %arg10: memref<128x128xbf16, #tpu.memory_space<vmem>>, %arg11: memref<1x128xf32, #tpu.memory_space<vmem>>, %arg12: memref<1x8xf32, #tpu.memory_space<vmem>>, %arg13: memref<1x8xf32, #tpu.memory_space<vmem>>, %arg14: memref<128x8xf32, #tpu.memory_space<vmem>>, %arg15: memref<8x128xf32, #tpu.memory_space<vmem>>, %arg16: memref<128x64xbf16, #tpu.memory_space<vmem>>, %arg17: memref<128x64xbf16, #tpu.memory_space<vmem>>, %arg18: memref<16x32xbf16, #tpu.memory_space<vmem>>, %arg19: memref<16x32xbf16, #tpu.memory_space<vmem>>, %arg20: memref<32x128xf32, #tpu.memory_space<vmem>>, %arg21: memref<16x64xf32, #tpu.memory_space<vmem>>) attributes {dimension_semantics = [#tpu.dimension_semantics<arbitrary>], iteration_bounds = array<i64: 1>, scalar_prefetch = 0 : i64, scratch_operands = 0 : i64, tpu.core_type = #tpu.core_type<tc>, window_params = [{pipeline_mode = #tpu.pipeline_mode<synchronous>, transform_indices = @transform_0, window_bounds = array<i64: 32, 48>}, {pipeline_mode = #tpu.pipeline_mode<synchronous>, transform_indices = @transform_1, window_bounds = array<i64: 32, 32>}, {pipeline_mode = #tpu.pipeline_mode<synchronous>, transform_indices = @transform_2, window_bounds = array<i64: 32, 32>}, {pipeline_mode = #tpu.pipeline_mode<synchronous>, transform_indices = @transform_3, window_bounds = array<i64: 48, 128>}, {pipeline_mode = #tpu.pipeline_mode<synchronous>, transform_indices = @transform_4, window_bounds = array<i64: 48, 128>}, {pipeline_mode = #tpu.pipeline_mode<synchronous>, transform_indices = @transform_5, window_bounds = array<i64: 48, 128>}, {pipeline_mode = #tpu.pipeline_mode<synchronous>, transform_indices = @transform_6, window_bounds = array<i64: 1, 128>}, {pipeline_mode = #tpu.pipeline_mode<synchronous>, transform_indices = @transform_7, window_bounds = array<i64: 128, 128>}, {pipeline_mode = #tpu.pipeline_mode<synchronous>, transform_indices = @transform_8, window_bounds = array<i64: 128, 128>}, {pipeline_mode = #tpu.pipeline_mode<synchronous>, transform_indices = @transform_9, window_bounds = array<i64: 128, 128>}, {pipeline_mode = #tpu.pipeline_mode<synchronous>, transform_indices = @transform_10, window_bounds = array<i64: 1, 128>}, {pipeline_mode = #tpu.pipeline_mode<synchronous>, transform_indices = @transform_11, window_bounds = array<i64: 1, 8>}, {pipeline_mode = #tpu.pipeline_mode<synchronous>, transform_indices = @transform_12, window_bounds = array<i64: 1, 8>}, {pipeline_mode = #tpu.pipeline_mode<synchronous>, transform_indices = @transform_13, window_bounds = array<i64: 128, 8>}, {pipeline_mode = #tpu.pipeline_mode<synchronous>, transform_indices = @transform_14, window_bounds = array<i64: 8, 128>}, {pipeline_mode = #tpu.pipeline_mode<synchronous>, transform_indices = @transform_15, window_bounds = array<i64: 128, 64>}, {pipeline_mode = #tpu.pipeline_mode<synchronous>, transform_indices = @transform_16, window_bounds = array<i64: 128, 64>}, {pipeline_mode = #tpu.pipeline_mode<synchronous>, transform_indices = @transform_17, window_bounds = array<i64: 16, 32>}, {pipeline_mode = #tpu.pipeline_mode<synchronous>, transform_indices = @transform_18, window_bounds = array<i64: 16, 32>}, {pipeline_mode = #tpu.pipeline_mode<synchronous>, transform_indices = @transform_19, window_bounds = array<i64: 32, 128>}, {pipeline_mode = #tpu.pipeline_mode<synchronous>, transform_indices = @transform_20, window_bounds = array<i64: 16, 64>}]} {
    %c0 = arith.constant 0 : index
    %c0_0 = arith.constant 0 : index
    %0 = vector.load %arg2[%c0, %c0_0] : memref<32x32xbf16, #tpu.memory_space<vmem>>, vector<32x32xbf16>
    %c0_1 = arith.constant 0 : index
    %c0_2 = arith.constant 0 : index
    %1 = vector.load %arg3[%c0_1, %c0_2] : memref<32x32xbf16, #tpu.memory_space<vmem>>, vector<32x32xbf16>
    %c0_3 = arith.constant 0 : index
    %c0_4 = arith.constant 0 : index
    %2 = vector.load %arg1[%c0_3, %c0_4] : memref<32x48xf32, #tpu.memory_space<vmem>>, vector<32x48xf32>
    %3 = arith.truncf %2 : vector<32x48xf32> to vector<32x48xbf16>
    %cst = arith.constant dense<0.000000e+00> : vector<32x48xf32>
    %4 = tpu.matmul %0, %3, %cst {dimension_numbers = #tpu.dot_dimension_numbers<[1], [0], [0], [1], [0, 0, 1, 1], [], []>} : vector<32x32xbf16>, vector<32x48xbf16>, vector<32x48xf32> -> vector<32x48xf32>
    %5 = arith.truncf %4 : vector<32x48xf32> to vector<32x48xbf16>
    %cst_5 = arith.constant dense<0.000000e+00> : vector<32x48xf32>
    %6 = tpu.matmul %1, %3, %cst_5 {dimension_numbers = #tpu.dot_dimension_numbers<[1], [0], [0], [1], [0, 0, 1, 1], [], []>} : vector<32x32xbf16>, vector<32x48xbf16>, vector<32x48xf32> -> vector<32x48xf32>
    %7 = arith.truncf %6 : vector<32x48xf32> to vector<32x48xbf16>
    %c0_6 = arith.constant 0 : index
    %c0_7 = arith.constant 0 : index
    %8 = vector.load %arg4[%c0_6, %c0_7] : memref<48x128xbf16, #tpu.memory_space<vmem>>, vector<48x128xbf16>
    %cst_8 = arith.constant dense<0.000000e+00> : vector<32x128xf32>
    %9 = tpu.matmul %5, %8, %cst_8 {dimension_numbers = #tpu.dot_dimension_numbers<[1], [0], [0], [1], [0, 0, 1, 1], [], []>} : vector<32x48xbf16>, vector<48x128xbf16>, vector<32x128xf32> -> vector<32x128xf32>
    %c0_9 = arith.constant 0 : index
    %c0_10 = arith.constant 0 : index
    %10 = vector.load %arg5[%c0_9, %c0_10] : memref<48x128xbf16, #tpu.memory_space<vmem>>, vector<48x128xbf16>
    %cst_11 = arith.constant dense<0.000000e+00> : vector<32x128xf32>
    %11 = tpu.matmul %3, %10, %cst_11 {dimension_numbers = #tpu.dot_dimension_numbers<[1], [0], [0], [1], [0, 0, 1, 1], [], []>} : vector<32x48xbf16>, vector<48x128xbf16>, vector<32x128xf32> -> vector<32x128xf32>
    %12 = arith.addf %9, %11 : vector<32x128xf32>
    %c0_12 = arith.constant 0 : index
    %c0_13 = arith.constant 0 : index
    %13 = vector.load %arg6[%c0_12, %c0_13] : memref<48x128xbf16, #tpu.memory_space<vmem>>, vector<48x128xbf16>
    %cst_14 = arith.constant dense<0.000000e+00> : vector<32x128xf32>
    %14 = tpu.matmul %7, %13, %cst_14 {dimension_numbers = #tpu.dot_dimension_numbers<[1], [0], [0], [1], [0, 0, 1, 1], [], []>} : vector<32x48xbf16>, vector<48x128xbf16>, vector<32x128xf32> -> vector<32x128xf32>
    %15 = arith.addf %12, %14 : vector<32x128xf32>
    %c0_15 = arith.constant 0 : index
    %c0_16 = arith.constant 0 : index
    %16 = vector.load %arg7[%c0_15, %c0_16] : memref<1x128xf32, #tpu.memory_space<vmem>>, vector<1x128xf32>
    %17 = vector.broadcast %16 : vector<1x128xf32> to vector<32x128xf32>
    %18 = arith.addf %15, %17 : vector<32x128xf32>
    %cst_17 = arith.constant 0.000000e+00 : f32
    %19 = vector.broadcast %cst_17 : f32 to vector<32x128xf32>
    %20 = arith.maximumf %18, %19 : vector<32x128xf32>
    %21 = arith.truncf %20 : vector<32x128xf32> to vector<32x128xbf16>
    %cst_18 = arith.constant dense<0.000000e+00> : vector<32x128xf32>
    %22 = tpu.matmul %0, %21, %cst_18 {dimension_numbers = #tpu.dot_dimension_numbers<[1], [0], [0], [1], [0, 0, 1, 1], [], []>} : vector<32x32xbf16>, vector<32x128xbf16>, vector<32x128xf32> -> vector<32x128xf32>
    %23 = arith.truncf %22 : vector<32x128xf32> to vector<32x128xbf16>
    %cst_19 = arith.constant dense<0.000000e+00> : vector<32x128xf32>
    %24 = tpu.matmul %1, %21, %cst_19 {dimension_numbers = #tpu.dot_dimension_numbers<[1], [0], [0], [1], [0, 0, 1, 1], [], []>} : vector<32x32xbf16>, vector<32x128xbf16>, vector<32x128xf32> -> vector<32x128xf32>
    %25 = arith.truncf %24 : vector<32x128xf32> to vector<32x128xbf16>
    %c0_20 = arith.constant 0 : index
    %c0_21 = arith.constant 0 : index
    %26 = vector.load %arg8[%c0_20, %c0_21] : memref<128x128xbf16, #tpu.memory_space<vmem>>, vector<128x128xbf16>
    %cst_22 = arith.constant dense<0.000000e+00> : vector<32x128xf32>
    %27 = tpu.matmul %23, %26, %cst_22 {dimension_numbers = #tpu.dot_dimension_numbers<[1], [0], [0], [1], [0, 0, 1, 1], [], []>} : vector<32x128xbf16>, vector<128x128xbf16>, vector<32x128xf32> -> vector<32x128xf32>
    %c0_23 = arith.constant 0 : index
    %c0_24 = arith.constant 0 : index
    %28 = vector.load %arg9[%c0_23, %c0_24] : memref<128x128xbf16, #tpu.memory_space<vmem>>, vector<128x128xbf16>
    %cst_25 = arith.constant dense<0.000000e+00> : vector<32x128xf32>
    %29 = tpu.matmul %21, %28, %cst_25 {dimension_numbers = #tpu.dot_dimension_numbers<[1], [0], [0], [1], [0, 0, 1, 1], [], []>} : vector<32x128xbf16>, vector<128x128xbf16>, vector<32x128xf32> -> vector<32x128xf32>
    %30 = arith.addf %27, %29 : vector<32x128xf32>
    %c0_26 = arith.constant 0 : index
    %c0_27 = arith.constant 0 : index
    %31 = vector.load %arg10[%c0_26, %c0_27] : memref<128x128xbf16, #tpu.memory_space<vmem>>, vector<128x128xbf16>
    %cst_28 = arith.constant dense<0.000000e+00> : vector<32x128xf32>
    %32 = tpu.matmul %25, %31, %cst_28 {dimension_numbers = #tpu.dot_dimension_numbers<[1], [0], [0], [1], [0, 0, 1, 1], [], []>} : vector<32x128xbf16>, vector<128x128xbf16>, vector<32x128xf32> -> vector<32x128xf32>
    %33 = arith.addf %30, %32 : vector<32x128xf32>
    %c0_29 = arith.constant 0 : index
    %c0_30 = arith.constant 0 : index
    %34 = vector.load %arg11[%c0_29, %c0_30] : memref<1x128xf32, #tpu.memory_space<vmem>>, vector<1x128xf32>
    %35 = vector.broadcast %34 : vector<1x128xf32> to vector<32x128xf32>
    %36 = arith.addf %33, %35 : vector<32x128xf32>
    %cst_31 = arith.constant 0.000000e+00 : f32
    %37 = vector.broadcast %cst_31 : f32 to vector<32x128xf32>
    %38 = arith.maximumf %36, %37 : vector<32x128xf32>
    %cst_32 = arith.constant dense<0.000000e+00> : vector<128xf32>
    %39 = vector.multi_reduction <add>, %38, %cst_32 [0] : vector<32x128xf32> to vector<128xf32>
    %40 = vector.shape_cast %39 : vector<128xf32> to vector<1x128xf32>
    %c0_33 = arith.constant 0 : index
    %c0_34 = arith.constant 0 : index
    %41 = vector.load %arg14[%c0_33, %c0_34] : memref<128x8xf32, #tpu.memory_space<vmem>>, vector<128x8xf32>
    %cst_35 = arith.constant dense<0.000000e+00> : vector<1x8xf32>
    %42 = tpu.matmul %40, %41, %cst_35 {dimension_numbers = #tpu.dot_dimension_numbers<[1], [0], [0], [1], [0, 0, 1, 1], [], []>} : vector<1x128xf32>, vector<128x8xf32>, vector<1x8xf32> -> vector<1x8xf32>
    %43 = arith.mulf %38, %38 : vector<32x128xf32>
    %cst_36 = arith.constant dense<0.000000e+00> : vector<128xf32>
    %44 = vector.multi_reduction <add>, %43, %cst_36 [0] : vector<32x128xf32> to vector<128xf32>
    %45 = vector.shape_cast %44 : vector<128xf32> to vector<1x128xf32>
    %c0_37 = arith.constant 0 : index
    %c0_38 = arith.constant 0 : index
    %46 = vector.load %arg14[%c0_37, %c0_38] : memref<128x8xf32, #tpu.memory_space<vmem>>, vector<128x8xf32>
    %cst_39 = arith.constant dense<0.000000e+00> : vector<1x8xf32>
    %47 = tpu.matmul %45, %46, %cst_39 {dimension_numbers = #tpu.dot_dimension_numbers<[1], [0], [0], [1], [0, 0, 1, 1], [], []>} : vector<1x128xf32>, vector<128x8xf32>, vector<1x8xf32> -> vector<1x8xf32>
    %cst_40 = arith.constant 0.001953125 : f32
    %48 = vector.broadcast %cst_40 : f32 to vector<1x8xf32>
    %49 = arith.mulf %42, %48 : vector<1x8xf32>
    %cst_41 = arith.constant 0.001953125 : f32
    %50 = vector.broadcast %cst_41 : f32 to vector<1x8xf32>
    %51 = arith.mulf %47, %50 : vector<1x8xf32>
    %52 = arith.mulf %49, %49 : vector<1x8xf32>
    %53 = arith.subf %51, %52 : vector<1x8xf32>
    %c0_42 = arith.constant 0 : index
    %c0_43 = arith.constant 0 : index
    %54 = vector.load %arg12[%c0_42, %c0_43] : memref<1x8xf32, #tpu.memory_space<vmem>>, vector<1x8xf32>
    %cst_44 = arith.constant 9.99999974E-6 : f32
    %55 = vector.broadcast %cst_44 : f32 to vector<1x8xf32>
    %56 = arith.addf %53, %55 : vector<1x8xf32>
    %57 = math.rsqrt %56 : vector<1x8xf32>
    %58 = arith.mulf %54, %57 : vector<1x8xf32>
    %c0_45 = arith.constant 0 : index
    %c0_46 = arith.constant 0 : index
    %59 = vector.load %arg13[%c0_45, %c0_46] : memref<1x8xf32, #tpu.memory_space<vmem>>, vector<1x8xf32>
    %60 = arith.mulf %49, %58 : vector<1x8xf32>
    %61 = arith.subf %59, %60 : vector<1x8xf32>
    %c0_47 = arith.constant 0 : index
    %c0_48 = arith.constant 0 : index
    %62 = vector.load %arg15[%c0_47, %c0_48] : memref<8x128xf32, #tpu.memory_space<vmem>>, vector<8x128xf32>
    %cst_49 = arith.constant dense<0.000000e+00> : vector<1x128xf32>
    %63 = tpu.matmul %58, %62, %cst_49 {dimension_numbers = #tpu.dot_dimension_numbers<[1], [0], [0], [1], [0, 0, 1, 1], [], []>} : vector<1x8xf32>, vector<8x128xf32>, vector<1x128xf32> -> vector<1x128xf32>
    %c0_50 = arith.constant 0 : index
    %c0_51 = arith.constant 0 : index
    %64 = vector.load %arg15[%c0_50, %c0_51] : memref<8x128xf32, #tpu.memory_space<vmem>>, vector<8x128xf32>
    %cst_52 = arith.constant dense<0.000000e+00> : vector<1x128xf32>
    %65 = tpu.matmul %61, %64, %cst_52 {dimension_numbers = #tpu.dot_dimension_numbers<[1], [0], [0], [1], [0, 0, 1, 1], [], []>} : vector<1x8xf32>, vector<8x128xf32>, vector<1x128xf32> -> vector<1x128xf32>
    %66 = vector.broadcast %63 : vector<1x128xf32> to vector<32x128xf32>
    %67 = arith.mulf %38, %66 : vector<32x128xf32>
    %68 = vector.broadcast %65 : vector<1x128xf32> to vector<32x128xf32>
    %69 = arith.addf %67, %68 : vector<32x128xf32>
    %c0_53 = arith.constant 0 : index
    %c0_54 = arith.constant 0 : index
    %70 = vector.load %arg20[%c0_53, %c0_54] : memref<32x128xf32, #tpu.memory_space<vmem>>, vector<32x128xf32>
    tpu.vector_store %arg20[%c0_53, %c0_54], %69 {strides = array<i32>} : memref<32x128xf32, #tpu.memory_space<vmem>>, vector<32x128xf32>,
    %71 = arith.truncf %69 : vector<32x128xf32> to vector<32x128xbf16>
    %c0_55 = arith.constant 0 : index
    %c0_56 = arith.constant 0 : index
    %72 = vector.load %arg16[%c0_55, %c0_56] : memref<128x64xbf16, #tpu.memory_space<vmem>>, vector<128x64xbf16>
    %cst_57 = arith.constant dense<0.000000e+00> : vector<32x64xf32>
    %73 = tpu.matmul %71, %72, %cst_57 {dimension_numbers = #tpu.dot_dimension_numbers<[1], [0], [0], [1], [0, 0, 1, 1], [], []>} : vector<32x128xbf16>, vector<128x64xbf16>, vector<32x64xf32> -> vector<32x64xf32>
    %c0_58 = arith.constant 0 : index
    %c0_59 = arith.constant 0 : index
    %74 = vector.load %arg17[%c0_58, %c0_59] : memref<128x64xbf16, #tpu.memory_space<vmem>>, vector<128x64xbf16>
    %cst_60 = arith.constant dense<0.000000e+00> : vector<32x64xf32>
    %75 = tpu.matmul %71, %74, %cst_60 {dimension_numbers = #tpu.dot_dimension_numbers<[1], [0], [0], [1], [0, 0, 1, 1], [], []>} : vector<32x128xbf16>, vector<128x64xbf16>, vector<32x64xf32> -> vector<32x64xf32>
    %76 = arith.maximumf %73, %75 : vector<32x64xf32>
    %77 = arith.truncf %76 : vector<32x64xf32> to vector<32x64xbf16>
    %c0_61 = arith.constant 0 : index
    %c0_62 = arith.constant 0 : index
    %78 = vector.load %arg18[%c0_61, %c0_62] : memref<16x32xbf16, #tpu.memory_space<vmem>>, vector<16x32xbf16>
    %cst_63 = arith.constant dense<0.000000e+00> : vector<16x64xf32>
    %79 = tpu.matmul %78, %77, %cst_63 {dimension_numbers = #tpu.dot_dimension_numbers<[1], [0], [0], [1], [0, 0, 1, 1], [], []>} : vector<16x32xbf16>, vector<32x64xbf16>, vector<16x64xf32> -> vector<16x64xf32>
    %c0_64 = arith.constant 0 : index
    %c0_65 = arith.constant 0 : index
    %80 = vector.load %arg19[%c0_64, %c0_65] : memref<16x32xbf16, #tpu.memory_space<vmem>>, vector<16x32xbf16>
    %cst_66 = arith.constant dense<0.000000e+00> : vector<16x64xf32>
    %81 = tpu.matmul %80, %77, %cst_66 {dimension_numbers = #tpu.dot_dimension_numbers<[1], [0], [0], [1], [0, 0, 1, 1], [], []>} : vector<16x32xbf16>, vector<32x64xbf16>, vector<16x64xf32> -> vector<16x64xf32>
    %82 = arith.maximumf %79, %81 : vector<16x64xf32>
    %c0_67 = arith.constant 0 : index
    %c0_68 = arith.constant 0 : index
    %83 = vector.load %arg21[%c0_67, %c0_68] : memref<16x64xf32, #tpu.memory_space<vmem>>, vector<16x64xf32>
    tpu.vector_store %arg21[%c0_67, %c0_68], %82 {strides = array<i32>} : memref<16x64xf32, #tpu.memory_space<vmem>>, vector<16x64xf32>,
    return
  }
  func.func @transform_0(%arg0: i32) -> (i32, i32) {
    %c0_i32 = arith.constant 0 : i32
    %c0_i32_0 = arith.constant 0 : i32
    %c0_i32_1 = arith.constant 0 : i32
    return %c0_i32, %c0_i32_0 : i32, i32
  }
  func.func @transform_1(%arg0: i32) -> (i32, i32) {
    %c0_i32 = arith.constant 0 : i32
    %c0_i32_0 = arith.constant 0 : i32
    %c0_i32_1 = arith.constant 0 : i32
    return %c0_i32, %c0_i32_0 : i32, i32
  }
  func.func @transform_2(%arg0: i32) -> (i32, i32) {
    %c0_i32 = arith.constant 0 : i32
    %c0_i32_0 = arith.constant 0 : i32
    %c0_i32_1 = arith.constant 0 : i32
    return %c0_i32, %c0_i32_0 : i32, i32
  }
  func.func @transform_3(%arg0: i32) -> (i32, i32) {
    %c0_i32 = arith.constant 0 : i32
    %c0_i32_0 = arith.constant 0 : i32
    %c0_i32_1 = arith.constant 0 : i32
    return %c0_i32, %c0_i32_0 : i32, i32
  }
  func.func @transform_4(%arg0: i32) -> (i32, i32) {
    %c0_i32 = arith.constant 0 : i32
    %c0_i32_0 = arith.constant 0 : i32
    %c0_i32_1 = arith.constant 0 : i32
    return %c0_i32, %c0_i32_0 : i32, i32
  }
  func.func @transform_5(%arg0: i32) -> (i32, i32) {
    %c0_i32 = arith.constant 0 : i32
    %c0_i32_0 = arith.constant 0 : i32
    %c0_i32_1 = arith.constant 0 : i32
    return %c0_i32, %c0_i32_0 : i32, i32
  }
  func.func @transform_6(%arg0: i32) -> (i32, i32) {
    %c0_i32 = arith.constant 0 : i32
    %c0_i32_0 = arith.constant 0 : i32
    %c0_i32_1 = arith.constant 0 : i32
    return %c0_i32, %c0_i32_0 : i32, i32
  }
  func.func @transform_7(%arg0: i32) -> (i32, i32) {
    %c0_i32 = arith.constant 0 : i32
    %c0_i32_0 = arith.constant 0 : i32
    %c0_i32_1 = arith.constant 0 : i32
    return %c0_i32, %c0_i32_0 : i32, i32
  }
  func.func @transform_8(%arg0: i32) -> (i32, i32) {
    %c0_i32 = arith.constant 0 : i32
    %c0_i32_0 = arith.constant 0 : i32
    %c0_i32_1 = arith.constant 0 : i32
    return %c0_i32, %c0_i32_0 : i32, i32
  }
  func.func @transform_9(%arg0: i32) -> (i32, i32) {
    %c0_i32 = arith.constant 0 : i32
    %c0_i32_0 = arith.constant 0 : i32
    %c0_i32_1 = arith.constant 0 : i32
    return %c0_i32, %c0_i32_0 : i32, i32
  }
  func.func @transform_10(%arg0: i32) -> (i32, i32) {
    %c0_i32 = arith.constant 0 : i32
    %c0_i32_0 = arith.constant 0 : i32
    %c0_i32_1 = arith.constant 0 : i32
    return %c0_i32, %c0_i32_0 : i32, i32
  }
  func.func @transform_11(%arg0: i32) -> (i32, i32) {
    %c0_i32 = arith.constant 0 : i32
    %c0_i32_0 = arith.constant 0 : i32
    %c0_i32_1 = arith.constant 0 : i32
    return %c0_i32, %c0_i32_0 : i32, i32
  }
  func.func @transform_12(%arg0: i32) -> (i32, i32) {
    %c0_i32 = arith.constant 0 : i32
    %c0_i32_0 = arith.constant 0 : i32
    %c0_i32_1 = arith.constant 0 : i32
    return %c0_i32, %c0_i32_0 : i32, i32
  }
  func.func @transform_13(%arg0: i32) -> (i32, i32) {
    %c0_i32 = arith.constant 0 : i32
    %c0_i32_0 = arith.constant 0 : i32
    %c0_i32_1 = arith.constant 0 : i32
    return %c0_i32, %c0_i32_0 : i32, i32
  }
  func.func @transform_14(%arg0: i32) -> (i32, i32) {
    %c0_i32 = arith.constant 0 : i32
    %c0_i32_0 = arith.constant 0 : i32
    %c0_i32_1 = arith.constant 0 : i32
    return %c0_i32, %c0_i32_0 : i32, i32
  }
  func.func @transform_15(%arg0: i32) -> (i32, i32) {
    %c0_i32 = arith.constant 0 : i32
    %c0_i32_0 = arith.constant 0 : i32
    %c0_i32_1 = arith.constant 0 : i32
    return %c0_i32, %c0_i32_0 : i32, i32
  }
  func.func @transform_16(%arg0: i32) -> (i32, i32) {
    %c0_i32 = arith.constant 0 : i32
    %c0_i32_0 = arith.constant 0 : i32
    %c0_i32_1 = arith.constant 0 : i32
    return %c0_i32, %c0_i32_0 : i32, i32
  }
  func.func @transform_17(%arg0: i32) -> (i32, i32) {
    %c0_i32 = arith.constant 0 : i32
    %c0_i32_0 = arith.constant 0 : i32
    %c0_i32_1 = arith.constant 0 : i32
    return %c0_i32, %c0_i32_0 : i32, i32
  }
  func.func @transform_18(%arg0: i32) -> (i32, i32) {
    %c0_i32 = arith.constant 0 : i32
    %c0_i32_0 = arith.constant 0 : i32
    %c0_i32_1 = arith.constant 0 : i32
    return %c0_i32, %c0_i32_0 : i32, i32
  }
  func.func @transform_19(%arg0: i32) -> (i32, i32) {
    %c0_i32 = arith.constant 0 : i32
    %c0_i32_0 = arith.constant 0 : i32
    %c0_i32_1 = arith.constant 0 : i32
    return %c0_i32, %c0_i32_0 : i32, i32
  }
  func.func @transform_20(%arg0: i32) -> (i32, i32) {
    %c0_i32 = arith.constant 0 : i32
    %c0_i32_0 = arith.constant 0 : i32
    %c0_i32_1 = arith.constant 0 : i32
    return %c0_i32, %c0_i32_0 : i32, i32
  }
}

module attributes {stable_mosaic.version = 11 : i64} {
  func.func @_encoder_stage_kernel(%arg0: i32, %arg1: memref<16x64xf32, #tpu.memory_space<vmem>>, %arg2: memref<16x16xbf16, #tpu.memory_space<vmem>>, %arg3: memref<16x16xbf16, #tpu.memory_space<vmem>>, %arg4: memref<64x128xbf16, #tpu.memory_space<vmem>>, %arg5: memref<64x128xbf16, #tpu.memory_space<vmem>>, %arg6: memref<64x128xbf16, #tpu.memory_space<vmem>>, %arg7: memref<1x128xf32, #tpu.memory_space<vmem>>, %arg8: memref<128x128xbf16, #tpu.memory_space<vmem>>, %arg9: memref<128x128xbf16, #tpu.memory_space<vmem>>, %arg10: memref<128x128xbf16, #tpu.memory_space<vmem>>, %arg11: memref<1x128xf32, #tpu.memory_space<vmem>>, %arg12: memref<1x16xf32, #tpu.memory_space<vmem>>, %arg13: memref<1x16xf32, #tpu.memory_space<vmem>>, %arg14: memref<128x16xf32, #tpu.memory_space<vmem>>, %arg15: memref<16x128xf32, #tpu.memory_space<vmem>>, %arg16: memref<128x64xbf16, #tpu.memory_space<vmem>>, %arg17: memref<128x64xbf16, #tpu.memory_space<vmem>>, %arg18: memref<8x16xbf16, #tpu.memory_space<vmem>>, %arg19: memref<8x16xbf16, #tpu.memory_space<vmem>>, %arg20: memref<16x128xf32, #tpu.memory_space<vmem>>, %arg21: memref<8x64xf32, #tpu.memory_space<vmem>>) attributes {dimension_semantics = [#tpu.dimension_semantics<arbitrary>], iteration_bounds = array<i64: 1>, scalar_prefetch = 0 : i64, scratch_operands = 0 : i64, tpu.core_type = #tpu.core_type<tc>, window_params = [{pipeline_mode = #tpu.pipeline_mode<synchronous>, transform_indices = @transform_0, window_bounds = array<i64: 16, 64>}, {pipeline_mode = #tpu.pipeline_mode<synchronous>, transform_indices = @transform_1, window_bounds = array<i64: 16, 16>}, {pipeline_mode = #tpu.pipeline_mode<synchronous>, transform_indices = @transform_2, window_bounds = array<i64: 16, 16>}, {pipeline_mode = #tpu.pipeline_mode<synchronous>, transform_indices = @transform_3, window_bounds = array<i64: 64, 128>}, {pipeline_mode = #tpu.pipeline_mode<synchronous>, transform_indices = @transform_4, window_bounds = array<i64: 64, 128>}, {pipeline_mode = #tpu.pipeline_mode<synchronous>, transform_indices = @transform_5, window_bounds = array<i64: 64, 128>}, {pipeline_mode = #tpu.pipeline_mode<synchronous>, transform_indices = @transform_6, window_bounds = array<i64: 1, 128>}, {pipeline_mode = #tpu.pipeline_mode<synchronous>, transform_indices = @transform_7, window_bounds = array<i64: 128, 128>}, {pipeline_mode = #tpu.pipeline_mode<synchronous>, transform_indices = @transform_8, window_bounds = array<i64: 128, 128>}, {pipeline_mode = #tpu.pipeline_mode<synchronous>, transform_indices = @transform_9, window_bounds = array<i64: 128, 128>}, {pipeline_mode = #tpu.pipeline_mode<synchronous>, transform_indices = @transform_10, window_bounds = array<i64: 1, 128>}, {pipeline_mode = #tpu.pipeline_mode<synchronous>, transform_indices = @transform_11, window_bounds = array<i64: 1, 16>}, {pipeline_mode = #tpu.pipeline_mode<synchronous>, transform_indices = @transform_12, window_bounds = array<i64: 1, 16>}, {pipeline_mode = #tpu.pipeline_mode<synchronous>, transform_indices = @transform_13, window_bounds = array<i64: 128, 16>}, {pipeline_mode = #tpu.pipeline_mode<synchronous>, transform_indices = @transform_14, window_bounds = array<i64: 16, 128>}, {pipeline_mode = #tpu.pipeline_mode<synchronous>, transform_indices = @transform_15, window_bounds = array<i64: 128, 64>}, {pipeline_mode = #tpu.pipeline_mode<synchronous>, transform_indices = @transform_16, window_bounds = array<i64: 128, 64>}, {pipeline_mode = #tpu.pipeline_mode<synchronous>, transform_indices = @transform_17, window_bounds = array<i64: 8, 16>}, {pipeline_mode = #tpu.pipeline_mode<synchronous>, transform_indices = @transform_18, window_bounds = array<i64: 8, 16>}, {pipeline_mode = #tpu.pipeline_mode<synchronous>, transform_indices = @transform_19, window_bounds = array<i64: 16, 128>}, {pipeline_mode = #tpu.pipeline_mode<synchronous>, transform_indices = @transform_20, window_bounds = array<i64: 8, 64>}]} {
    %c0 = arith.constant 0 : index
    %c0_0 = arith.constant 0 : index
    %0 = vector.load %arg2[%c0, %c0_0] : memref<16x16xbf16, #tpu.memory_space<vmem>>, vector<16x16xbf16>
    %c0_1 = arith.constant 0 : index
    %c0_2 = arith.constant 0 : index
    %1 = vector.load %arg3[%c0_1, %c0_2] : memref<16x16xbf16, #tpu.memory_space<vmem>>, vector<16x16xbf16>
    %c0_3 = arith.constant 0 : index
    %c0_4 = arith.constant 0 : index
    %2 = vector.load %arg1[%c0_3, %c0_4] : memref<16x64xf32, #tpu.memory_space<vmem>>, vector<16x64xf32>
    %3 = arith.truncf %2 : vector<16x64xf32> to vector<16x64xbf16>
    %cst = arith.constant dense<0.000000e+00> : vector<16x64xf32>
    %4 = tpu.matmul %0, %3, %cst {dimension_numbers = #tpu.dot_dimension_numbers<[1], [0], [0], [1], [0, 0, 1, 1], [], []>} : vector<16x16xbf16>, vector<16x64xbf16>, vector<16x64xf32> -> vector<16x64xf32>
    %5 = arith.truncf %4 : vector<16x64xf32> to vector<16x64xbf16>
    %cst_5 = arith.constant dense<0.000000e+00> : vector<16x64xf32>
    %6 = tpu.matmul %1, %3, %cst_5 {dimension_numbers = #tpu.dot_dimension_numbers<[1], [0], [0], [1], [0, 0, 1, 1], [], []>} : vector<16x16xbf16>, vector<16x64xbf16>, vector<16x64xf32> -> vector<16x64xf32>
    %7 = arith.truncf %6 : vector<16x64xf32> to vector<16x64xbf16>
    %c0_6 = arith.constant 0 : index
    %c0_7 = arith.constant 0 : index
    %8 = vector.load %arg4[%c0_6, %c0_7] : memref<64x128xbf16, #tpu.memory_space<vmem>>, vector<64x128xbf16>
    %cst_8 = arith.constant dense<0.000000e+00> : vector<16x128xf32>
    %9 = tpu.matmul %5, %8, %cst_8 {dimension_numbers = #tpu.dot_dimension_numbers<[1], [0], [0], [1], [0, 0, 1, 1], [], []>} : vector<16x64xbf16>, vector<64x128xbf16>, vector<16x128xf32> -> vector<16x128xf32>
    %c0_9 = arith.constant 0 : index
    %c0_10 = arith.constant 0 : index
    %10 = vector.load %arg5[%c0_9, %c0_10] : memref<64x128xbf16, #tpu.memory_space<vmem>>, vector<64x128xbf16>
    %cst_11 = arith.constant dense<0.000000e+00> : vector<16x128xf32>
    %11 = tpu.matmul %3, %10, %cst_11 {dimension_numbers = #tpu.dot_dimension_numbers<[1], [0], [0], [1], [0, 0, 1, 1], [], []>} : vector<16x64xbf16>, vector<64x128xbf16>, vector<16x128xf32> -> vector<16x128xf32>
    %12 = arith.addf %9, %11 : vector<16x128xf32>
    %c0_12 = arith.constant 0 : index
    %c0_13 = arith.constant 0 : index
    %13 = vector.load %arg6[%c0_12, %c0_13] : memref<64x128xbf16, #tpu.memory_space<vmem>>, vector<64x128xbf16>
    %cst_14 = arith.constant dense<0.000000e+00> : vector<16x128xf32>
    %14 = tpu.matmul %7, %13, %cst_14 {dimension_numbers = #tpu.dot_dimension_numbers<[1], [0], [0], [1], [0, 0, 1, 1], [], []>} : vector<16x64xbf16>, vector<64x128xbf16>, vector<16x128xf32> -> vector<16x128xf32>
    %15 = arith.addf %12, %14 : vector<16x128xf32>
    %c0_15 = arith.constant 0 : index
    %c0_16 = arith.constant 0 : index
    %16 = vector.load %arg7[%c0_15, %c0_16] : memref<1x128xf32, #tpu.memory_space<vmem>>, vector<1x128xf32>
    %17 = vector.broadcast %16 : vector<1x128xf32> to vector<16x128xf32>
    %18 = arith.addf %15, %17 : vector<16x128xf32>
    %cst_17 = arith.constant 0.000000e+00 : f32
    %19 = vector.broadcast %cst_17 : f32 to vector<16x128xf32>
    %20 = arith.maximumf %18, %19 : vector<16x128xf32>
    %21 = arith.truncf %20 : vector<16x128xf32> to vector<16x128xbf16>
    %cst_18 = arith.constant dense<0.000000e+00> : vector<16x128xf32>
    %22 = tpu.matmul %0, %21, %cst_18 {dimension_numbers = #tpu.dot_dimension_numbers<[1], [0], [0], [1], [0, 0, 1, 1], [], []>} : vector<16x16xbf16>, vector<16x128xbf16>, vector<16x128xf32> -> vector<16x128xf32>
    %23 = arith.truncf %22 : vector<16x128xf32> to vector<16x128xbf16>
    %cst_19 = arith.constant dense<0.000000e+00> : vector<16x128xf32>
    %24 = tpu.matmul %1, %21, %cst_19 {dimension_numbers = #tpu.dot_dimension_numbers<[1], [0], [0], [1], [0, 0, 1, 1], [], []>} : vector<16x16xbf16>, vector<16x128xbf16>, vector<16x128xf32> -> vector<16x128xf32>
    %25 = arith.truncf %24 : vector<16x128xf32> to vector<16x128xbf16>
    %c0_20 = arith.constant 0 : index
    %c0_21 = arith.constant 0 : index
    %26 = vector.load %arg8[%c0_20, %c0_21] : memref<128x128xbf16, #tpu.memory_space<vmem>>, vector<128x128xbf16>
    %cst_22 = arith.constant dense<0.000000e+00> : vector<16x128xf32>
    %27 = tpu.matmul %23, %26, %cst_22 {dimension_numbers = #tpu.dot_dimension_numbers<[1], [0], [0], [1], [0, 0, 1, 1], [], []>} : vector<16x128xbf16>, vector<128x128xbf16>, vector<16x128xf32> -> vector<16x128xf32>
    %c0_23 = arith.constant 0 : index
    %c0_24 = arith.constant 0 : index
    %28 = vector.load %arg9[%c0_23, %c0_24] : memref<128x128xbf16, #tpu.memory_space<vmem>>, vector<128x128xbf16>
    %cst_25 = arith.constant dense<0.000000e+00> : vector<16x128xf32>
    %29 = tpu.matmul %21, %28, %cst_25 {dimension_numbers = #tpu.dot_dimension_numbers<[1], [0], [0], [1], [0, 0, 1, 1], [], []>} : vector<16x128xbf16>, vector<128x128xbf16>, vector<16x128xf32> -> vector<16x128xf32>
    %30 = arith.addf %27, %29 : vector<16x128xf32>
    %c0_26 = arith.constant 0 : index
    %c0_27 = arith.constant 0 : index
    %31 = vector.load %arg10[%c0_26, %c0_27] : memref<128x128xbf16, #tpu.memory_space<vmem>>, vector<128x128xbf16>
    %cst_28 = arith.constant dense<0.000000e+00> : vector<16x128xf32>
    %32 = tpu.matmul %25, %31, %cst_28 {dimension_numbers = #tpu.dot_dimension_numbers<[1], [0], [0], [1], [0, 0, 1, 1], [], []>} : vector<16x128xbf16>, vector<128x128xbf16>, vector<16x128xf32> -> vector<16x128xf32>
    %33 = arith.addf %30, %32 : vector<16x128xf32>
    %c0_29 = arith.constant 0 : index
    %c0_30 = arith.constant 0 : index
    %34 = vector.load %arg11[%c0_29, %c0_30] : memref<1x128xf32, #tpu.memory_space<vmem>>, vector<1x128xf32>
    %35 = vector.broadcast %34 : vector<1x128xf32> to vector<16x128xf32>
    %36 = arith.addf %33, %35 : vector<16x128xf32>
    %cst_31 = arith.constant 0.000000e+00 : f32
    %37 = vector.broadcast %cst_31 : f32 to vector<16x128xf32>
    %38 = arith.maximumf %36, %37 : vector<16x128xf32>
    %cst_32 = arith.constant dense<0.000000e+00> : vector<128xf32>
    %39 = vector.multi_reduction <add>, %38, %cst_32 [0] : vector<16x128xf32> to vector<128xf32>
    %40 = vector.shape_cast %39 : vector<128xf32> to vector<1x128xf32>
    %c0_33 = arith.constant 0 : index
    %c0_34 = arith.constant 0 : index
    %41 = vector.load %arg14[%c0_33, %c0_34] : memref<128x16xf32, #tpu.memory_space<vmem>>, vector<128x16xf32>
    %cst_35 = arith.constant dense<0.000000e+00> : vector<1x16xf32>
    %42 = tpu.matmul %40, %41, %cst_35 {dimension_numbers = #tpu.dot_dimension_numbers<[1], [0], [0], [1], [0, 0, 1, 1], [], []>} : vector<1x128xf32>, vector<128x16xf32>, vector<1x16xf32> -> vector<1x16xf32>
    %43 = arith.mulf %38, %38 : vector<16x128xf32>
    %cst_36 = arith.constant dense<0.000000e+00> : vector<128xf32>
    %44 = vector.multi_reduction <add>, %43, %cst_36 [0] : vector<16x128xf32> to vector<128xf32>
    %45 = vector.shape_cast %44 : vector<128xf32> to vector<1x128xf32>
    %c0_37 = arith.constant 0 : index
    %c0_38 = arith.constant 0 : index
    %46 = vector.load %arg14[%c0_37, %c0_38] : memref<128x16xf32, #tpu.memory_space<vmem>>, vector<128x16xf32>
    %cst_39 = arith.constant dense<0.000000e+00> : vector<1x16xf32>
    %47 = tpu.matmul %45, %46, %cst_39 {dimension_numbers = #tpu.dot_dimension_numbers<[1], [0], [0], [1], [0, 0, 1, 1], [], []>} : vector<1x128xf32>, vector<128x16xf32>, vector<1x16xf32> -> vector<1x16xf32>
    %cst_40 = arith.constant 7.812500e-03 : f32
    %48 = vector.broadcast %cst_40 : f32 to vector<1x16xf32>
    %49 = arith.mulf %42, %48 : vector<1x16xf32>
    %cst_41 = arith.constant 7.812500e-03 : f32
    %50 = vector.broadcast %cst_41 : f32 to vector<1x16xf32>
    %51 = arith.mulf %47, %50 : vector<1x16xf32>
    %52 = arith.mulf %49, %49 : vector<1x16xf32>
    %53 = arith.subf %51, %52 : vector<1x16xf32>
    %c0_42 = arith.constant 0 : index
    %c0_43 = arith.constant 0 : index
    %54 = vector.load %arg12[%c0_42, %c0_43] : memref<1x16xf32, #tpu.memory_space<vmem>>, vector<1x16xf32>
    %cst_44 = arith.constant 9.99999974E-6 : f32
    %55 = vector.broadcast %cst_44 : f32 to vector<1x16xf32>
    %56 = arith.addf %53, %55 : vector<1x16xf32>
    %57 = math.rsqrt %56 : vector<1x16xf32>
    %58 = arith.mulf %54, %57 : vector<1x16xf32>
    %c0_45 = arith.constant 0 : index
    %c0_46 = arith.constant 0 : index
    %59 = vector.load %arg13[%c0_45, %c0_46] : memref<1x16xf32, #tpu.memory_space<vmem>>, vector<1x16xf32>
    %60 = arith.mulf %49, %58 : vector<1x16xf32>
    %61 = arith.subf %59, %60 : vector<1x16xf32>
    %c0_47 = arith.constant 0 : index
    %c0_48 = arith.constant 0 : index
    %62 = vector.load %arg15[%c0_47, %c0_48] : memref<16x128xf32, #tpu.memory_space<vmem>>, vector<16x128xf32>
    %cst_49 = arith.constant dense<0.000000e+00> : vector<1x128xf32>
    %63 = tpu.matmul %58, %62, %cst_49 {dimension_numbers = #tpu.dot_dimension_numbers<[1], [0], [0], [1], [0, 0, 1, 1], [], []>} : vector<1x16xf32>, vector<16x128xf32>, vector<1x128xf32> -> vector<1x128xf32>
    %c0_50 = arith.constant 0 : index
    %c0_51 = arith.constant 0 : index
    %64 = vector.load %arg15[%c0_50, %c0_51] : memref<16x128xf32, #tpu.memory_space<vmem>>, vector<16x128xf32>
    %cst_52 = arith.constant dense<0.000000e+00> : vector<1x128xf32>
    %65 = tpu.matmul %61, %64, %cst_52 {dimension_numbers = #tpu.dot_dimension_numbers<[1], [0], [0], [1], [0, 0, 1, 1], [], []>} : vector<1x16xf32>, vector<16x128xf32>, vector<1x128xf32> -> vector<1x128xf32>
    %66 = vector.broadcast %63 : vector<1x128xf32> to vector<16x128xf32>
    %67 = arith.mulf %38, %66 : vector<16x128xf32>
    %68 = vector.broadcast %65 : vector<1x128xf32> to vector<16x128xf32>
    %69 = arith.addf %67, %68 : vector<16x128xf32>
    %c0_53 = arith.constant 0 : index
    %c0_54 = arith.constant 0 : index
    %70 = vector.load %arg20[%c0_53, %c0_54] : memref<16x128xf32, #tpu.memory_space<vmem>>, vector<16x128xf32>
    tpu.vector_store %arg20[%c0_53, %c0_54], %69 {strides = array<i32>} : memref<16x128xf32, #tpu.memory_space<vmem>>, vector<16x128xf32>,
    %71 = arith.truncf %69 : vector<16x128xf32> to vector<16x128xbf16>
    %c0_55 = arith.constant 0 : index
    %c0_56 = arith.constant 0 : index
    %72 = vector.load %arg16[%c0_55, %c0_56] : memref<128x64xbf16, #tpu.memory_space<vmem>>, vector<128x64xbf16>
    %cst_57 = arith.constant dense<0.000000e+00> : vector<16x64xf32>
    %73 = tpu.matmul %71, %72, %cst_57 {dimension_numbers = #tpu.dot_dimension_numbers<[1], [0], [0], [1], [0, 0, 1, 1], [], []>} : vector<16x128xbf16>, vector<128x64xbf16>, vector<16x64xf32> -> vector<16x64xf32>
    %c0_58 = arith.constant 0 : index
    %c0_59 = arith.constant 0 : index
    %74 = vector.load %arg17[%c0_58, %c0_59] : memref<128x64xbf16, #tpu.memory_space<vmem>>, vector<128x64xbf16>
    %cst_60 = arith.constant dense<0.000000e+00> : vector<16x64xf32>
    %75 = tpu.matmul %71, %74, %cst_60 {dimension_numbers = #tpu.dot_dimension_numbers<[1], [0], [0], [1], [0, 0, 1, 1], [], []>} : vector<16x128xbf16>, vector<128x64xbf16>, vector<16x64xf32> -> vector<16x64xf32>
    %76 = arith.maximumf %73, %75 : vector<16x64xf32>
    %77 = arith.truncf %76 : vector<16x64xf32> to vector<16x64xbf16>
    %c0_61 = arith.constant 0 : index
    %c0_62 = arith.constant 0 : index
    %78 = vector.load %arg18[%c0_61, %c0_62] : memref<8x16xbf16, #tpu.memory_space<vmem>>, vector<8x16xbf16>
    %cst_63 = arith.constant dense<0.000000e+00> : vector<8x64xf32>
    %79 = tpu.matmul %78, %77, %cst_63 {dimension_numbers = #tpu.dot_dimension_numbers<[1], [0], [0], [1], [0, 0, 1, 1], [], []>} : vector<8x16xbf16>, vector<16x64xbf16>, vector<8x64xf32> -> vector<8x64xf32>
    %c0_64 = arith.constant 0 : index
    %c0_65 = arith.constant 0 : index
    %80 = vector.load %arg19[%c0_64, %c0_65] : memref<8x16xbf16, #tpu.memory_space<vmem>>, vector<8x16xbf16>
    %cst_66 = arith.constant dense<0.000000e+00> : vector<8x64xf32>
    %81 = tpu.matmul %80, %77, %cst_66 {dimension_numbers = #tpu.dot_dimension_numbers<[1], [0], [0], [1], [0, 0, 1, 1], [], []>} : vector<8x16xbf16>, vector<16x64xbf16>, vector<8x64xf32> -> vector<8x64xf32>
    %82 = arith.maximumf %79, %81 : vector<8x64xf32>
    %c0_67 = arith.constant 0 : index
    %c0_68 = arith.constant 0 : index
    %83 = vector.load %arg21[%c0_67, %c0_68] : memref<8x64xf32, #tpu.memory_space<vmem>>, vector<8x64xf32>
    tpu.vector_store %arg21[%c0_67, %c0_68], %82 {strides = array<i32>} : memref<8x64xf32, #tpu.memory_space<vmem>>, vector<8x64xf32>,
    return
  }
  func.func @transform_0(%arg0: i32) -> (i32, i32) {
    %c0_i32 = arith.constant 0 : i32
    %c0_i32_0 = arith.constant 0 : i32
    %c0_i32_1 = arith.constant 0 : i32
    return %c0_i32, %c0_i32_0 : i32, i32
  }
  func.func @transform_1(%arg0: i32) -> (i32, i32) {
    %c0_i32 = arith.constant 0 : i32
    %c0_i32_0 = arith.constant 0 : i32
    %c0_i32_1 = arith.constant 0 : i32
    return %c0_i32, %c0_i32_0 : i32, i32
  }
  func.func @transform_2(%arg0: i32) -> (i32, i32) {
    %c0_i32 = arith.constant 0 : i32
    %c0_i32_0 = arith.constant 0 : i32
    %c0_i32_1 = arith.constant 0 : i32
    return %c0_i32, %c0_i32_0 : i32, i32
  }
  func.func @transform_3(%arg0: i32) -> (i32, i32) {
    %c0_i32 = arith.constant 0 : i32
    %c0_i32_0 = arith.constant 0 : i32
    %c0_i32_1 = arith.constant 0 : i32
    return %c0_i32, %c0_i32_0 : i32, i32
  }
  func.func @transform_4(%arg0: i32) -> (i32, i32) {
    %c0_i32 = arith.constant 0 : i32
    %c0_i32_0 = arith.constant 0 : i32
    %c0_i32_1 = arith.constant 0 : i32
    return %c0_i32, %c0_i32_0 : i32, i32
  }
  func.func @transform_5(%arg0: i32) -> (i32, i32) {
    %c0_i32 = arith.constant 0 : i32
    %c0_i32_0 = arith.constant 0 : i32
    %c0_i32_1 = arith.constant 0 : i32
    return %c0_i32, %c0_i32_0 : i32, i32
  }
  func.func @transform_6(%arg0: i32) -> (i32, i32) {
    %c0_i32 = arith.constant 0 : i32
    %c0_i32_0 = arith.constant 0 : i32
    %c0_i32_1 = arith.constant 0 : i32
    return %c0_i32, %c0_i32_0 : i32, i32
  }
  func.func @transform_7(%arg0: i32) -> (i32, i32) {
    %c0_i32 = arith.constant 0 : i32
    %c0_i32_0 = arith.constant 0 : i32
    %c0_i32_1 = arith.constant 0 : i32
    return %c0_i32, %c0_i32_0 : i32, i32
  }
  func.func @transform_8(%arg0: i32) -> (i32, i32) {
    %c0_i32 = arith.constant 0 : i32
    %c0_i32_0 = arith.constant 0 : i32
    %c0_i32_1 = arith.constant 0 : i32
    return %c0_i32, %c0_i32_0 : i32, i32
  }
  func.func @transform_9(%arg0: i32) -> (i32, i32) {
    %c0_i32 = arith.constant 0 : i32
    %c0_i32_0 = arith.constant 0 : i32
    %c0_i32_1 = arith.constant 0 : i32
    return %c0_i32, %c0_i32_0 : i32, i32
  }
  func.func @transform_10(%arg0: i32) -> (i32, i32) {
    %c0_i32 = arith.constant 0 : i32
    %c0_i32_0 = arith.constant 0 : i32
    %c0_i32_1 = arith.constant 0 : i32
    return %c0_i32, %c0_i32_0 : i32, i32
  }
  func.func @transform_11(%arg0: i32) -> (i32, i32) {
    %c0_i32 = arith.constant 0 : i32
    %c0_i32_0 = arith.constant 0 : i32
    %c0_i32_1 = arith.constant 0 : i32
    return %c0_i32, %c0_i32_0 : i32, i32
  }
  func.func @transform_12(%arg0: i32) -> (i32, i32) {
    %c0_i32 = arith.constant 0 : i32
    %c0_i32_0 = arith.constant 0 : i32
    %c0_i32_1 = arith.constant 0 : i32
    return %c0_i32, %c0_i32_0 : i32, i32
  }
  func.func @transform_13(%arg0: i32) -> (i32, i32) {
    %c0_i32 = arith.constant 0 : i32
    %c0_i32_0 = arith.constant 0 : i32
    %c0_i32_1 = arith.constant 0 : i32
    return %c0_i32, %c0_i32_0 : i32, i32
  }
  func.func @transform_14(%arg0: i32) -> (i32, i32) {
    %c0_i32 = arith.constant 0 : i32
    %c0_i32_0 = arith.constant 0 : i32
    %c0_i32_1 = arith.constant 0 : i32
    return %c0_i32, %c0_i32_0 : i32, i32
  }
  func.func @transform_15(%arg0: i32) -> (i32, i32) {
    %c0_i32 = arith.constant 0 : i32
    %c0_i32_0 = arith.constant 0 : i32
    %c0_i32_1 = arith.constant 0 : i32
    return %c0_i32, %c0_i32_0 : i32, i32
  }
  func.func @transform_16(%arg0: i32) -> (i32, i32) {
    %c0_i32 = arith.constant 0 : i32
    %c0_i32_0 = arith.constant 0 : i32
    %c0_i32_1 = arith.constant 0 : i32
    return %c0_i32, %c0_i32_0 : i32, i32
  }
  func.func @transform_17(%arg0: i32) -> (i32, i32) {
    %c0_i32 = arith.constant 0 : i32
    %c0_i32_0 = arith.constant 0 : i32
    %c0_i32_1 = arith.constant 0 : i32
    return %c0_i32, %c0_i32_0 : i32, i32
  }
  func.func @transform_18(%arg0: i32) -> (i32, i32) {
    %c0_i32 = arith.constant 0 : i32
    %c0_i32_0 = arith.constant 0 : i32
    %c0_i32_1 = arith.constant 0 : i32
    return %c0_i32, %c0_i32_0 : i32, i32
  }
  func.func @transform_19(%arg0: i32) -> (i32, i32) {
    %c0_i32 = arith.constant 0 : i32
    %c0_i32_0 = arith.constant 0 : i32
    %c0_i32_1 = arith.constant 0 : i32
    return %c0_i32, %c0_i32_0 : i32, i32
  }
  func.func @transform_20(%arg0: i32) -> (i32, i32) {
    %c0_i32 = arith.constant 0 : i32
    %c0_i32_0 = arith.constant 0 : i32
    %c0_i32_1 = arith.constant 0 : i32
    return %c0_i32, %c0_i32_0 : i32, i32
  }
}

module attributes {stable_mosaic.version = 11 : i64} {
  func.func @_encoder_stage_kernel(%arg0: i32, %arg1: memref<8x64xf32, #tpu.memory_space<vmem>>, %arg2: memref<8x8xbf16, #tpu.memory_space<vmem>>, %arg3: memref<8x8xbf16, #tpu.memory_space<vmem>>, %arg4: memref<64x128xbf16, #tpu.memory_space<vmem>>, %arg5: memref<64x128xbf16, #tpu.memory_space<vmem>>, %arg6: memref<64x128xbf16, #tpu.memory_space<vmem>>, %arg7: memref<1x128xf32, #tpu.memory_space<vmem>>, %arg8: memref<128x128xbf16, #tpu.memory_space<vmem>>, %arg9: memref<128x128xbf16, #tpu.memory_space<vmem>>, %arg10: memref<128x128xbf16, #tpu.memory_space<vmem>>, %arg11: memref<1x128xf32, #tpu.memory_space<vmem>>, %arg12: memref<8x128xf32, #tpu.memory_space<vmem>>) attributes {dimension_semantics = [#tpu.dimension_semantics<arbitrary>], iteration_bounds = array<i64: 1>, scalar_prefetch = 0 : i64, scratch_operands = 0 : i64, tpu.core_type = #tpu.core_type<tc>, window_params = [{pipeline_mode = #tpu.pipeline_mode<synchronous>, transform_indices = @transform_0, window_bounds = array<i64: 8, 64>}, {pipeline_mode = #tpu.pipeline_mode<synchronous>, transform_indices = @transform_1, window_bounds = array<i64: 8, 8>}, {pipeline_mode = #tpu.pipeline_mode<synchronous>, transform_indices = @transform_2, window_bounds = array<i64: 8, 8>}, {pipeline_mode = #tpu.pipeline_mode<synchronous>, transform_indices = @transform_3, window_bounds = array<i64: 64, 128>}, {pipeline_mode = #tpu.pipeline_mode<synchronous>, transform_indices = @transform_4, window_bounds = array<i64: 64, 128>}, {pipeline_mode = #tpu.pipeline_mode<synchronous>, transform_indices = @transform_5, window_bounds = array<i64: 64, 128>}, {pipeline_mode = #tpu.pipeline_mode<synchronous>, transform_indices = @transform_6, window_bounds = array<i64: 1, 128>}, {pipeline_mode = #tpu.pipeline_mode<synchronous>, transform_indices = @transform_7, window_bounds = array<i64: 128, 128>}, {pipeline_mode = #tpu.pipeline_mode<synchronous>, transform_indices = @transform_8, window_bounds = array<i64: 128, 128>}, {pipeline_mode = #tpu.pipeline_mode<synchronous>, transform_indices = @transform_9, window_bounds = array<i64: 128, 128>}, {pipeline_mode = #tpu.pipeline_mode<synchronous>, transform_indices = @transform_10, window_bounds = array<i64: 1, 128>}, {pipeline_mode = #tpu.pipeline_mode<synchronous>, transform_indices = @transform_11, window_bounds = array<i64: 8, 128>}]} {
    %c0 = arith.constant 0 : index
    %c0_0 = arith.constant 0 : index
    %0 = vector.load %arg2[%c0, %c0_0] : memref<8x8xbf16, #tpu.memory_space<vmem>>, vector<8x8xbf16>
    %c0_1 = arith.constant 0 : index
    %c0_2 = arith.constant 0 : index
    %1 = vector.load %arg3[%c0_1, %c0_2] : memref<8x8xbf16, #tpu.memory_space<vmem>>, vector<8x8xbf16>
    %c0_3 = arith.constant 0 : index
    %c0_4 = arith.constant 0 : index
    %2 = vector.load %arg1[%c0_3, %c0_4] : memref<8x64xf32, #tpu.memory_space<vmem>>, vector<8x64xf32>
    %3 = arith.truncf %2 : vector<8x64xf32> to vector<8x64xbf16>
    %cst = arith.constant dense<0.000000e+00> : vector<8x64xf32>
    %4 = tpu.matmul %0, %3, %cst {dimension_numbers = #tpu.dot_dimension_numbers<[1], [0], [0], [1], [0, 0, 1, 1], [], []>} : vector<8x8xbf16>, vector<8x64xbf16>, vector<8x64xf32> -> vector<8x64xf32>
    %5 = arith.truncf %4 : vector<8x64xf32> to vector<8x64xbf16>
    %cst_5 = arith.constant dense<0.000000e+00> : vector<8x64xf32>
    %6 = tpu.matmul %1, %3, %cst_5 {dimension_numbers = #tpu.dot_dimension_numbers<[1], [0], [0], [1], [0, 0, 1, 1], [], []>} : vector<8x8xbf16>, vector<8x64xbf16>, vector<8x64xf32> -> vector<8x64xf32>
    %7 = arith.truncf %6 : vector<8x64xf32> to vector<8x64xbf16>
    %c0_6 = arith.constant 0 : index
    %c0_7 = arith.constant 0 : index
    %8 = vector.load %arg4[%c0_6, %c0_7] : memref<64x128xbf16, #tpu.memory_space<vmem>>, vector<64x128xbf16>
    %cst_8 = arith.constant dense<0.000000e+00> : vector<8x128xf32>
    %9 = tpu.matmul %5, %8, %cst_8 {dimension_numbers = #tpu.dot_dimension_numbers<[1], [0], [0], [1], [0, 0, 1, 1], [], []>} : vector<8x64xbf16>, vector<64x128xbf16>, vector<8x128xf32> -> vector<8x128xf32>
    %c0_9 = arith.constant 0 : index
    %c0_10 = arith.constant 0 : index
    %10 = vector.load %arg5[%c0_9, %c0_10] : memref<64x128xbf16, #tpu.memory_space<vmem>>, vector<64x128xbf16>
    %cst_11 = arith.constant dense<0.000000e+00> : vector<8x128xf32>
    %11 = tpu.matmul %3, %10, %cst_11 {dimension_numbers = #tpu.dot_dimension_numbers<[1], [0], [0], [1], [0, 0, 1, 1], [], []>} : vector<8x64xbf16>, vector<64x128xbf16>, vector<8x128xf32> -> vector<8x128xf32>
    %12 = arith.addf %9, %11 : vector<8x128xf32>
    %c0_12 = arith.constant 0 : index
    %c0_13 = arith.constant 0 : index
    %13 = vector.load %arg6[%c0_12, %c0_13] : memref<64x128xbf16, #tpu.memory_space<vmem>>, vector<64x128xbf16>
    %cst_14 = arith.constant dense<0.000000e+00> : vector<8x128xf32>
    %14 = tpu.matmul %7, %13, %cst_14 {dimension_numbers = #tpu.dot_dimension_numbers<[1], [0], [0], [1], [0, 0, 1, 1], [], []>} : vector<8x64xbf16>, vector<64x128xbf16>, vector<8x128xf32> -> vector<8x128xf32>
    %15 = arith.addf %12, %14 : vector<8x128xf32>
    %c0_15 = arith.constant 0 : index
    %c0_16 = arith.constant 0 : index
    %16 = vector.load %arg7[%c0_15, %c0_16] : memref<1x128xf32, #tpu.memory_space<vmem>>, vector<1x128xf32>
    %17 = vector.broadcast %16 : vector<1x128xf32> to vector<8x128xf32>
    %18 = arith.addf %15, %17 : vector<8x128xf32>
    %cst_17 = arith.constant 0.000000e+00 : f32
    %19 = vector.broadcast %cst_17 : f32 to vector<8x128xf32>
    %20 = arith.maximumf %18, %19 : vector<8x128xf32>
    %21 = arith.truncf %20 : vector<8x128xf32> to vector<8x128xbf16>
    %cst_18 = arith.constant dense<0.000000e+00> : vector<8x128xf32>
    %22 = tpu.matmul %0, %21, %cst_18 {dimension_numbers = #tpu.dot_dimension_numbers<[1], [0], [0], [1], [0, 0, 1, 1], [], []>} : vector<8x8xbf16>, vector<8x128xbf16>, vector<8x128xf32> -> vector<8x128xf32>
    %23 = arith.truncf %22 : vector<8x128xf32> to vector<8x128xbf16>
    %cst_19 = arith.constant dense<0.000000e+00> : vector<8x128xf32>
    %24 = tpu.matmul %1, %21, %cst_19 {dimension_numbers = #tpu.dot_dimension_numbers<[1], [0], [0], [1], [0, 0, 1, 1], [], []>} : vector<8x8xbf16>, vector<8x128xbf16>, vector<8x128xf32> -> vector<8x128xf32>
    %25 = arith.truncf %24 : vector<8x128xf32> to vector<8x128xbf16>
    %c0_20 = arith.constant 0 : index
    %c0_21 = arith.constant 0 : index
    %26 = vector.load %arg8[%c0_20, %c0_21] : memref<128x128xbf16, #tpu.memory_space<vmem>>, vector<128x128xbf16>
    %cst_22 = arith.constant dense<0.000000e+00> : vector<8x128xf32>
    %27 = tpu.matmul %23, %26, %cst_22 {dimension_numbers = #tpu.dot_dimension_numbers<[1], [0], [0], [1], [0, 0, 1, 1], [], []>} : vector<8x128xbf16>, vector<128x128xbf16>, vector<8x128xf32> -> vector<8x128xf32>
    %c0_23 = arith.constant 0 : index
    %c0_24 = arith.constant 0 : index
    %28 = vector.load %arg9[%c0_23, %c0_24] : memref<128x128xbf16, #tpu.memory_space<vmem>>, vector<128x128xbf16>
    %cst_25 = arith.constant dense<0.000000e+00> : vector<8x128xf32>
    %29 = tpu.matmul %21, %28, %cst_25 {dimension_numbers = #tpu.dot_dimension_numbers<[1], [0], [0], [1], [0, 0, 1, 1], [], []>} : vector<8x128xbf16>, vector<128x128xbf16>, vector<8x128xf32> -> vector<8x128xf32>
    %30 = arith.addf %27, %29 : vector<8x128xf32>
    %c0_26 = arith.constant 0 : index
    %c0_27 = arith.constant 0 : index
    %31 = vector.load %arg10[%c0_26, %c0_27] : memref<128x128xbf16, #tpu.memory_space<vmem>>, vector<128x128xbf16>
    %cst_28 = arith.constant dense<0.000000e+00> : vector<8x128xf32>
    %32 = tpu.matmul %25, %31, %cst_28 {dimension_numbers = #tpu.dot_dimension_numbers<[1], [0], [0], [1], [0, 0, 1, 1], [], []>} : vector<8x128xbf16>, vector<128x128xbf16>, vector<8x128xf32> -> vector<8x128xf32>
    %33 = arith.addf %30, %32 : vector<8x128xf32>
    %c0_29 = arith.constant 0 : index
    %c0_30 = arith.constant 0 : index
    %34 = vector.load %arg11[%c0_29, %c0_30] : memref<1x128xf32, #tpu.memory_space<vmem>>, vector<1x128xf32>
    %35 = vector.broadcast %34 : vector<1x128xf32> to vector<8x128xf32>
    %36 = arith.addf %33, %35 : vector<8x128xf32>
    %cst_31 = arith.constant 0.000000e+00 : f32
    %37 = vector.broadcast %cst_31 : f32 to vector<8x128xf32>
    %38 = arith.maximumf %36, %37 : vector<8x128xf32>
    %c0_32 = arith.constant 0 : index
    %c0_33 = arith.constant 0 : index
    %39 = vector.load %arg12[%c0_32, %c0_33] : memref<8x128xf32, #tpu.memory_space<vmem>>, vector<8x128xf32>
    tpu.vector_store %arg12[%c0_32, %c0_33], %38 {strides = array<i32>} : memref<8x128xf32, #tpu.memory_space<vmem>>, vector<8x128xf32>,
    return
  }
  func.func @transform_0(%arg0: i32) -> (i32, i32) {
    %c0_i32 = arith.constant 0 : i32
    %c0_i32_0 = arith.constant 0 : i32
    %c0_i32_1 = arith.constant 0 : i32
    return %c0_i32, %c0_i32_0 : i32, i32
  }
  func.func @transform_1(%arg0: i32) -> (i32, i32) {
    %c0_i32 = arith.constant 0 : i32
    %c0_i32_0 = arith.constant 0 : i32
    %c0_i32_1 = arith.constant 0 : i32
    return %c0_i32, %c0_i32_0 : i32, i32
  }
  func.func @transform_2(%arg0: i32) -> (i32, i32) {
    %c0_i32 = arith.constant 0 : i32
    %c0_i32_0 = arith.constant 0 : i32
    %c0_i32_1 = arith.constant 0 : i32
    return %c0_i32, %c0_i32_0 : i32, i32
  }
  func.func @transform_3(%arg0: i32) -> (i32, i32) {
    %c0_i32 = arith.constant 0 : i32
    %c0_i32_0 = arith.constant 0 : i32
    %c0_i32_1 = arith.constant 0 : i32
    return %c0_i32, %c0_i32_0 : i32, i32
  }
  func.func @transform_4(%arg0: i32) -> (i32, i32) {
    %c0_i32 = arith.constant 0 : i32
    %c0_i32_0 = arith.constant 0 : i32
    %c0_i32_1 = arith.constant 0 : i32
    return %c0_i32, %c0_i32_0 : i32, i32
  }
  func.func @transform_5(%arg0: i32) -> (i32, i32) {
    %c0_i32 = arith.constant 0 : i32
    %c0_i32_0 = arith.constant 0 : i32
    %c0_i32_1 = arith.constant 0 : i32
    return %c0_i32, %c0_i32_0 : i32, i32
  }
  func.func @transform_6(%arg0: i32) -> (i32, i32) {
    %c0_i32 = arith.constant 0 : i32
    %c0_i32_0 = arith.constant 0 : i32
    %c0_i32_1 = arith.constant 0 : i32
    return %c0_i32, %c0_i32_0 : i32, i32
  }
  func.func @transform_7(%arg0: i32) -> (i32, i32) {
    %c0_i32 = arith.constant 0 : i32
    %c0_i32_0 = arith.constant 0 : i32
    %c0_i32_1 = arith.constant 0 : i32
    return %c0_i32, %c0_i32_0 : i32, i32
  }
  func.func @transform_8(%arg0: i32) -> (i32, i32) {
    %c0_i32 = arith.constant 0 : i32
    %c0_i32_0 = arith.constant 0 : i32
    %c0_i32_1 = arith.constant 0 : i32
    return %c0_i32, %c0_i32_0 : i32, i32
  }
  func.func @transform_9(%arg0: i32) -> (i32, i32) {
    %c0_i32 = arith.constant 0 : i32
    %c0_i32_0 = arith.constant 0 : i32
    %c0_i32_1 = arith.constant 0 : i32
    return %c0_i32, %c0_i32_0 : i32, i32
  }
  func.func @transform_10(%arg0: i32) -> (i32, i32) {
    %c0_i32 = arith.constant 0 : i32
    %c0_i32_0 = arith.constant 0 : i32
    %c0_i32_1 = arith.constant 0 : i32
    return %c0_i32, %c0_i32_0 : i32, i32
  }
  func.func @transform_11(%arg0: i32) -> (i32, i32) {
    %c0_i32 = arith.constant 0 : i32
    %c0_i32_0 = arith.constant 0 : i32
    %c0_i32_1 = arith.constant 0 : i32
    return %c0_i32, %c0_i32_0 : i32, i32
  }
}

module attributes {stable_mosaic.version = 11 : i64} {
  func.func @_bottleneck_kernel(%arg0: i32, %arg1: memref<2x512xf32, #tpu.memory_space<vmem>>, %arg2: memref<2x16xf32, #tpu.memory_space<vmem>>, %arg3: memref<512x16xbf16, #tpu.memory_space<vmem>>, %arg4: memref<1x16xf32, #tpu.memory_space<vmem>>, %arg5: memref<512x16xbf16, #tpu.memory_space<vmem>>, %arg6: memref<1x16xf32, #tpu.memory_space<vmem>>, %arg7: memref<16x512xbf16, #tpu.memory_space<vmem>>, %arg8: memref<1x512xf32, #tpu.memory_space<vmem>>, %arg9: memref<2x512xf32, #tpu.memory_space<vmem>>) attributes {dimension_semantics = [#tpu.dimension_semantics<arbitrary>], iteration_bounds = array<i64: 1>, scalar_prefetch = 0 : i64, scratch_operands = 0 : i64, tpu.core_type = #tpu.core_type<tc>, window_params = [{pipeline_mode = #tpu.pipeline_mode<synchronous>, transform_indices = @transform_0, window_bounds = array<i64: 2, 512>}, {pipeline_mode = #tpu.pipeline_mode<synchronous>, transform_indices = @transform_1, window_bounds = array<i64: 2, 16>}, {pipeline_mode = #tpu.pipeline_mode<synchronous>, transform_indices = @transform_2, window_bounds = array<i64: 512, 16>}, {pipeline_mode = #tpu.pipeline_mode<synchronous>, transform_indices = @transform_3, window_bounds = array<i64: 1, 16>}, {pipeline_mode = #tpu.pipeline_mode<synchronous>, transform_indices = @transform_4, window_bounds = array<i64: 512, 16>}, {pipeline_mode = #tpu.pipeline_mode<synchronous>, transform_indices = @transform_5, window_bounds = array<i64: 1, 16>}, {pipeline_mode = #tpu.pipeline_mode<synchronous>, transform_indices = @transform_6, window_bounds = array<i64: 16, 512>}, {pipeline_mode = #tpu.pipeline_mode<synchronous>, transform_indices = @transform_7, window_bounds = array<i64: 1, 512>}, {pipeline_mode = #tpu.pipeline_mode<synchronous>, transform_indices = @transform_8, window_bounds = array<i64: 2, 512>}]} {
    %c0 = arith.constant 0 : index
    %c0_0 = arith.constant 0 : index
    %0 = vector.load %arg1[%c0, %c0_0] : memref<2x512xf32, #tpu.memory_space<vmem>>, vector<2x512xf32>
    %1 = arith.truncf %0 : vector<2x512xf32> to vector<2x512xbf16>
    %c0_1 = arith.constant 0 : index
    %c0_2 = arith.constant 0 : index
    %2 = vector.load %arg3[%c0_1, %c0_2] : memref<512x16xbf16, #tpu.memory_space<vmem>>, vector<512x16xbf16>
    %cst = arith.constant dense<0.000000e+00> : vector<2x16xf32>
    %3 = tpu.matmul %1, %2, %cst {dimension_numbers = #tpu.dot_dimension_numbers<[1], [0], [0], [1], [0, 0, 1, 1], [], []>} : vector<2x512xbf16>, vector<512x16xbf16>, vector<2x16xf32> -> vector<2x16xf32>
    %c0_3 = arith.constant 0 : index
    %c0_4 = arith.constant 0 : index
    %4 = vector.load %arg4[%c0_3, %c0_4] : memref<1x16xf32, #tpu.memory_space<vmem>>, vector<1x16xf32>
    %5 = vector.broadcast %4 : vector<1x16xf32> to vector<2x16xf32>
    %6 = arith.addf %3, %5 : vector<2x16xf32>
    %c0_5 = arith.constant 0 : index
    %c0_6 = arith.constant 0 : index
    %7 = vector.load %arg5[%c0_5, %c0_6] : memref<512x16xbf16, #tpu.memory_space<vmem>>, vector<512x16xbf16>
    %cst_7 = arith.constant dense<0.000000e+00> : vector<2x16xf32>
    %8 = tpu.matmul %1, %7, %cst_7 {dimension_numbers = #tpu.dot_dimension_numbers<[1], [0], [0], [1], [0, 0, 1, 1], [], []>} : vector<2x512xbf16>, vector<512x16xbf16>, vector<2x16xf32> -> vector<2x16xf32>
    %c0_8 = arith.constant 0 : index
    %c0_9 = arith.constant 0 : index
    %9 = vector.load %arg6[%c0_8, %c0_9] : memref<1x16xf32, #tpu.memory_space<vmem>>, vector<1x16xf32>
    %10 = vector.broadcast %9 : vector<1x16xf32> to vector<2x16xf32>
    %11 = arith.addf %8, %10 : vector<2x16xf32>
    %cst_10 = arith.constant 5.000000e-01 : f32
    %12 = vector.broadcast %cst_10 : f32 to vector<2x16xf32>
    %13 = arith.mulf %12, %11 : vector<2x16xf32>
    %14 = math.exp %13 : vector<2x16xf32>
    %c0_11 = arith.constant 0 : index
    %c0_12 = arith.constant 0 : index
    %15 = vector.load %arg2[%c0_11, %c0_12] : memref<2x16xf32, #tpu.memory_space<vmem>>, vector<2x16xf32>
    %16 = arith.mulf %14, %15 : vector<2x16xf32>
    %17 = arith.addf %6, %16 : vector<2x16xf32>
    %18 = arith.mulf %14, %17 : vector<2x16xf32>
    %19 = arith.addf %6, %18 : vector<2x16xf32>
    %20 = arith.truncf %19 : vector<2x16xf32> to vector<2x16xbf16>
    %c0_13 = arith.constant 0 : index
    %c0_14 = arith.constant 0 : index
    %21 = vector.load %arg7[%c0_13, %c0_14] : memref<16x512xbf16, #tpu.memory_space<vmem>>, vector<16x512xbf16>
    %cst_15 = arith.constant dense<0.000000e+00> : vector<2x512xf32>
    %22 = tpu.matmul %20, %21, %cst_15 {dimension_numbers = #tpu.dot_dimension_numbers<[1], [0], [0], [1], [0, 0, 1, 1], [], []>} : vector<2x16xbf16>, vector<16x512xbf16>, vector<2x512xf32> -> vector<2x512xf32>
    %c0_16 = arith.constant 0 : index
    %c0_17 = arith.constant 0 : index
    %23 = vector.load %arg8[%c0_16, %c0_17] : memref<1x512xf32, #tpu.memory_space<vmem>>, vector<1x512xf32>
    %24 = vector.broadcast %23 : vector<1x512xf32> to vector<2x512xf32>
    %25 = arith.addf %22, %24 : vector<2x512xf32>
    %cst_18 = arith.constant 0.000000e+00 : f32
    %26 = vector.broadcast %cst_18 : f32 to vector<2x512xf32>
    %27 = arith.maximumf %25, %26 : vector<2x512xf32>
    %c0_19 = arith.constant 0 : index
    %c0_20 = arith.constant 0 : index
    %28 = vector.load %arg9[%c0_19, %c0_20] : memref<2x512xf32, #tpu.memory_space<vmem>>, vector<2x512xf32>
    tpu.vector_store %arg9[%c0_19, %c0_20], %27 {strides = array<i32>} : memref<2x512xf32, #tpu.memory_space<vmem>>, vector<2x512xf32>,
    return
  }
  func.func @transform_0(%arg0: i32) -> (i32, i32) {
    %c0_i32 = arith.constant 0 : i32
    %c0_i32_0 = arith.constant 0 : i32
    %c0_i32_1 = arith.constant 0 : i32
    return %c0_i32, %c0_i32_0 : i32, i32
  }
  func.func @transform_1(%arg0: i32) -> (i32, i32) {
    %c0_i32 = arith.constant 0 : i32
    %c0_i32_0 = arith.constant 0 : i32
    %c0_i32_1 = arith.constant 0 : i32
    return %c0_i32, %c0_i32_0 : i32, i32
  }
  func.func @transform_2(%arg0: i32) -> (i32, i32) {
    %c0_i32 = arith.constant 0 : i32
    %c0_i32_0 = arith.constant 0 : i32
    %c0_i32_1 = arith.constant 0 : i32
    return %c0_i32, %c0_i32_0 : i32, i32
  }
  func.func @transform_3(%arg0: i32) -> (i32, i32) {
    %c0_i32 = arith.constant 0 : i32
    %c0_i32_0 = arith.constant 0 : i32
    %c0_i32_1 = arith.constant 0 : i32
    return %c0_i32, %c0_i32_0 : i32, i32
  }
  func.func @transform_4(%arg0: i32) -> (i32, i32) {
    %c0_i32 = arith.constant 0 : i32
    %c0_i32_0 = arith.constant 0 : i32
    %c0_i32_1 = arith.constant 0 : i32
    return %c0_i32, %c0_i32_0 : i32, i32
  }
  func.func @transform_5(%arg0: i32) -> (i32, i32) {
    %c0_i32 = arith.constant 0 : i32
    %c0_i32_0 = arith.constant 0 : i32
    %c0_i32_1 = arith.constant 0 : i32
    return %c0_i32, %c0_i32_0 : i32, i32
  }
  func.func @transform_6(%arg0: i32) -> (i32, i32) {
    %c0_i32 = arith.constant 0 : i32
    %c0_i32_0 = arith.constant 0 : i32
    %c0_i32_1 = arith.constant 0 : i32
    return %c0_i32, %c0_i32_0 : i32, i32
  }
  func.func @transform_7(%arg0: i32) -> (i32, i32) {
    %c0_i32 = arith.constant 0 : i32
    %c0_i32_0 = arith.constant 0 : i32
    %c0_i32_1 = arith.constant 0 : i32
    return %c0_i32, %c0_i32_0 : i32, i32
  }
  func.func @transform_8(%arg0: i32) -> (i32, i32) {
    %c0_i32 = arith.constant 0 : i32
    %c0_i32_0 = arith.constant 0 : i32
    %c0_i32_1 = arith.constant 0 : i32
    return %c0_i32, %c0_i32_0 : i32, i32
  }
}

module attributes {stable_mosaic.version = 11 : i64} {
  func.func @_decoder_stage_kernel(%arg0: i32, %arg1: memref<8x128xf32, #tpu.memory_space<vmem>>, %arg2: memref<16x128xf32, #tpu.memory_space<vmem>>, %arg3: memref<16x8xbf16, #tpu.memory_space<vmem>>, %arg4: memref<128x128xbf16, #tpu.memory_space<vmem>>, %arg5: memref<1x128xf32, #tpu.memory_space<vmem>>, %arg6: memref<1x16xf32, #tpu.memory_space<vmem>>, %arg7: memref<1x16xf32, #tpu.memory_space<vmem>>, %arg8: memref<128x16xf32, #tpu.memory_space<vmem>>, %arg9: memref<16x128xf32, #tpu.memory_space<vmem>>, %arg10: memref<16x16xbf16, #tpu.memory_space<vmem>>, %arg11: memref<16x16xbf16, #tpu.memory_space<vmem>>, %arg12: memref<128x128xbf16, #tpu.memory_space<vmem>>, %arg13: memref<128x128xbf16, #tpu.memory_space<vmem>>, %arg14: memref<128x128xbf16, #tpu.memory_space<vmem>>, %arg15: memref<128x128xbf16, #tpu.memory_space<vmem>>, %arg16: memref<128x128xbf16, #tpu.memory_space<vmem>>, %arg17: memref<128x128xbf16, #tpu.memory_space<vmem>>, %arg18: memref<1x128xf32, #tpu.memory_space<vmem>>, %arg19: memref<128x128xbf16, #tpu.memory_space<vmem>>, %arg20: memref<128x128xbf16, #tpu.memory_space<vmem>>, %arg21: memref<128x128xbf16, #tpu.memory_space<vmem>>, %arg22: memref<1x128xf32, #tpu.memory_space<vmem>>, %arg23: memref<16x128xf32, #tpu.memory_space<vmem>>) attributes {dimension_semantics = [#tpu.dimension_semantics<arbitrary>], iteration_bounds = array<i64: 1>, scalar_prefetch = 0 : i64, scratch_operands = 0 : i64, tpu.core_type = #tpu.core_type<tc>, window_params = [{pipeline_mode = #tpu.pipeline_mode<synchronous>, transform_indices = @transform_0, window_bounds = array<i64: 8, 128>}, {pipeline_mode = #tpu.pipeline_mode<synchronous>, transform_indices = @transform_1, window_bounds = array<i64: 16, 128>}, {pipeline_mode = #tpu.pipeline_mode<synchronous>, transform_indices = @transform_2, window_bounds = array<i64: 16, 8>}, {pipeline_mode = #tpu.pipeline_mode<synchronous>, transform_indices = @transform_3, window_bounds = array<i64: 128, 128>}, {pipeline_mode = #tpu.pipeline_mode<synchronous>, transform_indices = @transform_4, window_bounds = array<i64: 1, 128>}, {pipeline_mode = #tpu.pipeline_mode<synchronous>, transform_indices = @transform_5, window_bounds = array<i64: 1, 16>}, {pipeline_mode = #tpu.pipeline_mode<synchronous>, transform_indices = @transform_6, window_bounds = array<i64: 1, 16>}, {pipeline_mode = #tpu.pipeline_mode<synchronous>, transform_indices = @transform_7, window_bounds = array<i64: 128, 16>}, {pipeline_mode = #tpu.pipeline_mode<synchronous>, transform_indices = @transform_8, window_bounds = array<i64: 16, 128>}, {pipeline_mode = #tpu.pipeline_mode<synchronous>, transform_indices = @transform_9, window_bounds = array<i64: 16, 16>}, {pipeline_mode = #tpu.pipeline_mode<synchronous>, transform_indices = @transform_10, window_bounds = array<i64: 16, 16>}, {pipeline_mode = #tpu.pipeline_mode<synchronous>, transform_indices = @transform_11, window_bounds = array<i64: 128, 128>}, {pipeline_mode = #tpu.pipeline_mode<synchronous>, transform_indices = @transform_12, window_bounds = array<i64: 128, 128>}, {pipeline_mode = #tpu.pipeline_mode<synchronous>, transform_indices = @transform_13, window_bounds = array<i64: 128, 128>}, {pipeline_mode = #tpu.pipeline_mode<synchronous>, transform_indices = @transform_14, window_bounds = array<i64: 128, 128>}, {pipeline_mode = #tpu.pipeline_mode<synchronous>, transform_indices = @transform_15, window_bounds = array<i64: 128, 128>}, {pipeline_mode = #tpu.pipeline_mode<synchronous>, transform_indices = @transform_16, window_bounds = array<i64: 128, 128>}, {pipeline_mode = #tpu.pipeline_mode<synchronous>, transform_indices = @transform_17, window_bounds = array<i64: 1, 128>}, {pipeline_mode = #tpu.pipeline_mode<synchronous>, transform_indices = @transform_18, window_bounds = array<i64: 128, 128>}, {pipeline_mode = #tpu.pipeline_mode<synchronous>, transform_indices = @transform_19, window_bounds = array<i64: 128, 128>}, {pipeline_mode = #tpu.pipeline_mode<synchronous>, transform_indices = @transform_20, window_bounds = array<i64: 128, 128>}, {pipeline_mode = #tpu.pipeline_mode<synchronous>, transform_indices = @transform_21, window_bounds = array<i64: 1, 128>}, {pipeline_mode = #tpu.pipeline_mode<synchronous>, transform_indices = @transform_22, window_bounds = array<i64: 16, 128>}]} {
    %c0 = arith.constant 0 : index
    %c0_0 = arith.constant 0 : index
    %0 = vector.load %arg10[%c0, %c0_0] : memref<16x16xbf16, #tpu.memory_space<vmem>>, vector<16x16xbf16>
    %c0_1 = arith.constant 0 : index
    %c0_2 = arith.constant 0 : index
    %1 = vector.load %arg11[%c0_1, %c0_2] : memref<16x16xbf16, #tpu.memory_space<vmem>>, vector<16x16xbf16>
    %c0_3 = arith.constant 0 : index
    %c0_4 = arith.constant 0 : index
    %2 = vector.load %arg1[%c0_3, %c0_4] : memref<8x128xf32, #tpu.memory_space<vmem>>, vector<8x128xf32>
    %3 = arith.truncf %2 : vector<8x128xf32> to vector<8x128xbf16>
    %c0_5 = arith.constant 0 : index
    %c0_6 = arith.constant 0 : index
    %4 = vector.load %arg3[%c0_5, %c0_6] : memref<16x8xbf16, #tpu.memory_space<vmem>>, vector<16x8xbf16>
    %cst = arith.constant dense<0.000000e+00> : vector<16x128xf32>
    %5 = tpu.matmul %4, %3, %cst {dimension_numbers = #tpu.dot_dimension_numbers<[1], [0], [0], [1], [0, 0, 1, 1], [], []>} : vector<16x8xbf16>, vector<8x128xbf16>, vector<16x128xf32> -> vector<16x128xf32>
    %6 = arith.truncf %5 : vector<16x128xf32> to vector<16x128xbf16>
    %c0_7 = arith.constant 0 : index
    %c0_8 = arith.constant 0 : index
    %7 = vector.load %arg4[%c0_7, %c0_8] : memref<128x128xbf16, #tpu.memory_space<vmem>>, vector<128x128xbf16>
    %cst_9 = arith.constant dense<0.000000e+00> : vector<16x128xf32>
    %8 = tpu.matmul %6, %7, %cst_9 {dimension_numbers = #tpu.dot_dimension_numbers<[1], [0], [0], [1], [0, 0, 1, 1], [], []>} : vector<16x128xbf16>, vector<128x128xbf16>, vector<16x128xf32> -> vector<16x128xf32>
    %c0_10 = arith.constant 0 : index
    %c0_11 = arith.constant 0 : index
    %9 = vector.load %arg5[%c0_10, %c0_11] : memref<1x128xf32, #tpu.memory_space<vmem>>, vector<1x128xf32>
    %10 = vector.broadcast %9 : vector<1x128xf32> to vector<16x128xf32>
    %11 = arith.addf %8, %10 : vector<16x128xf32>
    %cst_12 = arith.constant dense<0.000000e+00> : vector<128xf32>
    %12 = vector.multi_reduction <add>, %11, %cst_12 [0] : vector<16x128xf32> to vector<128xf32>
    %13 = vector.shape_cast %12 : vector<128xf32> to vector<1x128xf32>
    %c0_13 = arith.constant 0 : index
    %c0_14 = arith.constant 0 : index
    %14 = vector.load %arg8[%c0_13, %c0_14] : memref<128x16xf32, #tpu.memory_space<vmem>>, vector<128x16xf32>
    %cst_15 = arith.constant dense<0.000000e+00> : vector<1x16xf32>
    %15 = tpu.matmul %13, %14, %cst_15 {dimension_numbers = #tpu.dot_dimension_numbers<[1], [0], [0], [1], [0, 0, 1, 1], [], []>} : vector<1x128xf32>, vector<128x16xf32>, vector<1x16xf32> -> vector<1x16xf32>
    %16 = arith.mulf %11, %11 : vector<16x128xf32>
    %cst_16 = arith.constant dense<0.000000e+00> : vector<128xf32>
    %17 = vector.multi_reduction <add>, %16, %cst_16 [0] : vector<16x128xf32> to vector<128xf32>
    %18 = vector.shape_cast %17 : vector<128xf32> to vector<1x128xf32>
    %c0_17 = arith.constant 0 : index
    %c0_18 = arith.constant 0 : index
    %19 = vector.load %arg8[%c0_17, %c0_18] : memref<128x16xf32, #tpu.memory_space<vmem>>, vector<128x16xf32>
    %cst_19 = arith.constant dense<0.000000e+00> : vector<1x16xf32>
    %20 = tpu.matmul %18, %19, %cst_19 {dimension_numbers = #tpu.dot_dimension_numbers<[1], [0], [0], [1], [0, 0, 1, 1], [], []>} : vector<1x128xf32>, vector<128x16xf32>, vector<1x16xf32> -> vector<1x16xf32>
    %cst_20 = arith.constant 7.812500e-03 : f32
    %21 = vector.broadcast %cst_20 : f32 to vector<1x16xf32>
    %22 = arith.mulf %15, %21 : vector<1x16xf32>
    %cst_21 = arith.constant 7.812500e-03 : f32
    %23 = vector.broadcast %cst_21 : f32 to vector<1x16xf32>
    %24 = arith.mulf %20, %23 : vector<1x16xf32>
    %25 = arith.mulf %22, %22 : vector<1x16xf32>
    %26 = arith.subf %24, %25 : vector<1x16xf32>
    %c0_22 = arith.constant 0 : index
    %c0_23 = arith.constant 0 : index
    %27 = vector.load %arg6[%c0_22, %c0_23] : memref<1x16xf32, #tpu.memory_space<vmem>>, vector<1x16xf32>
    %cst_24 = arith.constant 9.99999974E-6 : f32
    %28 = vector.broadcast %cst_24 : f32 to vector<1x16xf32>
    %29 = arith.addf %26, %28 : vector<1x16xf32>
    %30 = math.rsqrt %29 : vector<1x16xf32>
    %31 = arith.mulf %27, %30 : vector<1x16xf32>
    %c0_25 = arith.constant 0 : index
    %c0_26 = arith.constant 0 : index
    %32 = vector.load %arg7[%c0_25, %c0_26] : memref<1x16xf32, #tpu.memory_space<vmem>>, vector<1x16xf32>
    %33 = arith.mulf %22, %31 : vector<1x16xf32>
    %34 = arith.subf %32, %33 : vector<1x16xf32>
    %c0_27 = arith.constant 0 : index
    %c0_28 = arith.constant 0 : index
    %35 = vector.load %arg9[%c0_27, %c0_28] : memref<16x128xf32, #tpu.memory_space<vmem>>, vector<16x128xf32>
    %cst_29 = arith.constant dense<0.000000e+00> : vector<1x128xf32>
    %36 = tpu.matmul %31, %35, %cst_29 {dimension_numbers = #tpu.dot_dimension_numbers<[1], [0], [0], [1], [0, 0, 1, 1], [], []>} : vector<1x16xf32>, vector<16x128xf32>, vector<1x128xf32> -> vector<1x128xf32>
    %c0_30 = arith.constant 0 : index
    %c0_31 = arith.constant 0 : index
    %37 = vector.load %arg9[%c0_30, %c0_31] : memref<16x128xf32, #tpu.memory_space<vmem>>, vector<16x128xf32>
    %cst_32 = arith.constant dense<0.000000e+00> : vector<1x128xf32>
    %38 = tpu.matmul %34, %37, %cst_32 {dimension_numbers = #tpu.dot_dimension_numbers<[1], [0], [0], [1], [0, 0, 1, 1], [], []>} : vector<1x16xf32>, vector<16x128xf32>, vector<1x128xf32> -> vector<1x128xf32>
    %39 = vector.broadcast %36 : vector<1x128xf32> to vector<16x128xf32>
    %40 = arith.mulf %11, %39 : vector<16x128xf32>
    %41 = vector.broadcast %38 : vector<1x128xf32> to vector<16x128xf32>
    %42 = arith.addf %40, %41 : vector<16x128xf32>
    %c0_33 = arith.constant 0 : index
    %c0_34 = arith.constant 0 : index
    %43 = vector.load %arg2[%c0_33, %c0_34] : memref<16x128xf32, #tpu.memory_space<vmem>>, vector<16x128xf32>
    %44 = arith.truncf %42 : vector<16x128xf32> to vector<16x128xbf16>
    %cst_35 = arith.constant dense<0.000000e+00> : vector<16x128xf32>
    %45 = tpu.matmul %0, %44, %cst_35 {dimension_numbers = #tpu.dot_dimension_numbers<[1], [0], [0], [1], [0, 0, 1, 1], [], []>} : vector<16x16xbf16>, vector<16x128xbf16>, vector<16x128xf32> -> vector<16x128xf32>
    %46 = arith.truncf %45 : vector<16x128xf32> to vector<16x128xbf16>
    %cst_36 = arith.constant dense<0.000000e+00> : vector<16x128xf32>
    %47 = tpu.matmul %1, %44, %cst_36 {dimension_numbers = #tpu.dot_dimension_numbers<[1], [0], [0], [1], [0, 0, 1, 1], [], []>} : vector<16x16xbf16>, vector<16x128xbf16>, vector<16x128xf32> -> vector<16x128xf32>
    %48 = arith.truncf %47 : vector<16x128xf32> to vector<16x128xbf16>
    %c0_37 = arith.constant 0 : index
    %c0_38 = arith.constant 0 : index
    %49 = vector.load %arg12[%c0_37, %c0_38] : memref<128x128xbf16, #tpu.memory_space<vmem>>, vector<128x128xbf16>
    %cst_39 = arith.constant dense<0.000000e+00> : vector<16x128xf32>
    %50 = tpu.matmul %46, %49, %cst_39 {dimension_numbers = #tpu.dot_dimension_numbers<[1], [0], [0], [1], [0, 0, 1, 1], [], []>} : vector<16x128xbf16>, vector<128x128xbf16>, vector<16x128xf32> -> vector<16x128xf32>
    %c0_40 = arith.constant 0 : index
    %c0_41 = arith.constant 0 : index
    %51 = vector.load %arg13[%c0_40, %c0_41] : memref<128x128xbf16, #tpu.memory_space<vmem>>, vector<128x128xbf16>
    %cst_42 = arith.constant dense<0.000000e+00> : vector<16x128xf32>
    %52 = tpu.matmul %44, %51, %cst_42 {dimension_numbers = #tpu.dot_dimension_numbers<[1], [0], [0], [1], [0, 0, 1, 1], [], []>} : vector<16x128xbf16>, vector<128x128xbf16>, vector<16x128xf32> -> vector<16x128xf32>
    %53 = arith.addf %50, %52 : vector<16x128xf32>
    %c0_43 = arith.constant 0 : index
    %c0_44 = arith.constant 0 : index
    %54 = vector.load %arg14[%c0_43, %c0_44] : memref<128x128xbf16, #tpu.memory_space<vmem>>, vector<128x128xbf16>
    %cst_45 = arith.constant dense<0.000000e+00> : vector<16x128xf32>
    %55 = tpu.matmul %48, %54, %cst_45 {dimension_numbers = #tpu.dot_dimension_numbers<[1], [0], [0], [1], [0, 0, 1, 1], [], []>} : vector<16x128xbf16>, vector<128x128xbf16>, vector<16x128xf32> -> vector<16x128xf32>
    %56 = arith.addf %53, %55 : vector<16x128xf32>
    %57 = arith.truncf %43 : vector<16x128xf32> to vector<16x128xbf16>
    %cst_46 = arith.constant dense<0.000000e+00> : vector<16x128xf32>
    %58 = tpu.matmul %0, %57, %cst_46 {dimension_numbers = #tpu.dot_dimension_numbers<[1], [0], [0], [1], [0, 0, 1, 1], [], []>} : vector<16x16xbf16>, vector<16x128xbf16>, vector<16x128xf32> -> vector<16x128xf32>
    %59 = arith.truncf %58 : vector<16x128xf32> to vector<16x128xbf16>
    %cst_47 = arith.constant dense<0.000000e+00> : vector<16x128xf32>
    %60 = tpu.matmul %1, %57, %cst_47 {dimension_numbers = #tpu.dot_dimension_numbers<[1], [0], [0], [1], [0, 0, 1, 1], [], []>} : vector<16x16xbf16>, vector<16x128xbf16>, vector<16x128xf32> -> vector<16x128xf32>
    %61 = arith.truncf %60 : vector<16x128xf32> to vector<16x128xbf16>
    %c0_48 = arith.constant 0 : index
    %c0_49 = arith.constant 0 : index
    %62 = vector.load %arg15[%c0_48, %c0_49] : memref<128x128xbf16, #tpu.memory_space<vmem>>, vector<128x128xbf16>
    %cst_50 = arith.constant dense<0.000000e+00> : vector<16x128xf32>
    %63 = tpu.matmul %59, %62, %cst_50 {dimension_numbers = #tpu.dot_dimension_numbers<[1], [0], [0], [1], [0, 0, 1, 1], [], []>} : vector<16x128xbf16>, vector<128x128xbf16>, vector<16x128xf32> -> vector<16x128xf32>
    %c0_51 = arith.constant 0 : index
    %c0_52 = arith.constant 0 : index
    %64 = vector.load %arg16[%c0_51, %c0_52] : memref<128x128xbf16, #tpu.memory_space<vmem>>, vector<128x128xbf16>
    %cst_53 = arith.constant dense<0.000000e+00> : vector<16x128xf32>
    %65 = tpu.matmul %57, %64, %cst_53 {dimension_numbers = #tpu.dot_dimension_numbers<[1], [0], [0], [1], [0, 0, 1, 1], [], []>} : vector<16x128xbf16>, vector<128x128xbf16>, vector<16x128xf32> -> vector<16x128xf32>
    %66 = arith.addf %63, %65 : vector<16x128xf32>
    %c0_54 = arith.constant 0 : index
    %c0_55 = arith.constant 0 : index
    %67 = vector.load %arg17[%c0_54, %c0_55] : memref<128x128xbf16, #tpu.memory_space<vmem>>, vector<128x128xbf16>
    %cst_56 = arith.constant dense<0.000000e+00> : vector<16x128xf32>
    %68 = tpu.matmul %61, %67, %cst_56 {dimension_numbers = #tpu.dot_dimension_numbers<[1], [0], [0], [1], [0, 0, 1, 1], [], []>} : vector<16x128xbf16>, vector<128x128xbf16>, vector<16x128xf32> -> vector<16x128xf32>
    %69 = arith.addf %66, %68 : vector<16x128xf32>
    %70 = arith.addf %56, %69 : vector<16x128xf32>
    %c0_57 = arith.constant 0 : index
    %c0_58 = arith.constant 0 : index
    %71 = vector.load %arg18[%c0_57, %c0_58] : memref<1x128xf32, #tpu.memory_space<vmem>>, vector<1x128xf32>
    %72 = vector.broadcast %71 : vector<1x128xf32> to vector<16x128xf32>
    %73 = arith.addf %70, %72 : vector<16x128xf32>
    %cst_59 = arith.constant 0.000000e+00 : f32
    %74 = vector.broadcast %cst_59 : f32 to vector<16x128xf32>
    %75 = arith.maximumf %73, %74 : vector<16x128xf32>
    %76 = arith.truncf %75 : vector<16x128xf32> to vector<16x128xbf16>
    %cst_60 = arith.constant dense<0.000000e+00> : vector<16x128xf32>
    %77 = tpu.matmul %0, %76, %cst_60 {dimension_numbers = #tpu.dot_dimension_numbers<[1], [0], [0], [1], [0, 0, 1, 1], [], []>} : vector<16x16xbf16>, vector<16x128xbf16>, vector<16x128xf32> -> vector<16x128xf32>
    %78 = arith.truncf %77 : vector<16x128xf32> to vector<16x128xbf16>
    %cst_61 = arith.constant dense<0.000000e+00> : vector<16x128xf32>
    %79 = tpu.matmul %1, %76, %cst_61 {dimension_numbers = #tpu.dot_dimension_numbers<[1], [0], [0], [1], [0, 0, 1, 1], [], []>} : vector<16x16xbf16>, vector<16x128xbf16>, vector<16x128xf32> -> vector<16x128xf32>
    %80 = arith.truncf %79 : vector<16x128xf32> to vector<16x128xbf16>
    %c0_62 = arith.constant 0 : index
    %c0_63 = arith.constant 0 : index
    %81 = vector.load %arg19[%c0_62, %c0_63] : memref<128x128xbf16, #tpu.memory_space<vmem>>, vector<128x128xbf16>
    %cst_64 = arith.constant dense<0.000000e+00> : vector<16x128xf32>
    %82 = tpu.matmul %78, %81, %cst_64 {dimension_numbers = #tpu.dot_dimension_numbers<[1], [0], [0], [1], [0, 0, 1, 1], [], []>} : vector<16x128xbf16>, vector<128x128xbf16>, vector<16x128xf32> -> vector<16x128xf32>
    %c0_65 = arith.constant 0 : index
    %c0_66 = arith.constant 0 : index
    %83 = vector.load %arg20[%c0_65, %c0_66] : memref<128x128xbf16, #tpu.memory_space<vmem>>, vector<128x128xbf16>
    %cst_67 = arith.constant dense<0.000000e+00> : vector<16x128xf32>
    %84 = tpu.matmul %76, %83, %cst_67 {dimension_numbers = #tpu.dot_dimension_numbers<[1], [0], [0], [1], [0, 0, 1, 1], [], []>} : vector<16x128xbf16>, vector<128x128xbf16>, vector<16x128xf32> -> vector<16x128xf32>
    %85 = arith.addf %82, %84 : vector<16x128xf32>
    %c0_68 = arith.constant 0 : index
    %c0_69 = arith.constant 0 : index
    %86 = vector.load %arg21[%c0_68, %c0_69] : memref<128x128xbf16, #tpu.memory_space<vmem>>, vector<128x128xbf16>
    %cst_70 = arith.constant dense<0.000000e+00> : vector<16x128xf32>
    %87 = tpu.matmul %80, %86, %cst_70 {dimension_numbers = #tpu.dot_dimension_numbers<[1], [0], [0], [1], [0, 0, 1, 1], [], []>} : vector<16x128xbf16>, vector<128x128xbf16>, vector<16x128xf32> -> vector<16x128xf32>
    %88 = arith.addf %85, %87 : vector<16x128xf32>
    %c0_71 = arith.constant 0 : index
    %c0_72 = arith.constant 0 : index
    %89 = vector.load %arg22[%c0_71, %c0_72] : memref<1x128xf32, #tpu.memory_space<vmem>>, vector<1x128xf32>
    %90 = vector.broadcast %89 : vector<1x128xf32> to vector<16x128xf32>
    %91 = arith.addf %88, %90 : vector<16x128xf32>
    %cst_73 = arith.constant 0.000000e+00 : f32
    %92 = vector.broadcast %cst_73 : f32 to vector<16x128xf32>
    %93 = arith.maximumf %91, %92 : vector<16x128xf32>
    %c0_74 = arith.constant 0 : index
    %c0_75 = arith.constant 0 : index
    %94 = vector.load %arg23[%c0_74, %c0_75] : memref<16x128xf32, #tpu.memory_space<vmem>>, vector<16x128xf32>
    tpu.vector_store %arg23[%c0_74, %c0_75], %93 {strides = array<i32>} : memref<16x128xf32, #tpu.memory_space<vmem>>, vector<16x128xf32>,
    return
  }
  func.func @transform_0(%arg0: i32) -> (i32, i32) {
    %c0_i32 = arith.constant 0 : i32
    %c0_i32_0 = arith.constant 0 : i32
    %c0_i32_1 = arith.constant 0 : i32
    return %c0_i32, %c0_i32_0 : i32, i32
  }
  func.func @transform_1(%arg0: i32) -> (i32, i32) {
    %c0_i32 = arith.constant 0 : i32
    %c0_i32_0 = arith.constant 0 : i32
    %c0_i32_1 = arith.constant 0 : i32
    return %c0_i32, %c0_i32_0 : i32, i32
  }
  func.func @transform_2(%arg0: i32) -> (i32, i32) {
    %c0_i32 = arith.constant 0 : i32
    %c0_i32_0 = arith.constant 0 : i32
    %c0_i32_1 = arith.constant 0 : i32
    return %c0_i32, %c0_i32_0 : i32, i32
  }
  func.func @transform_3(%arg0: i32) -> (i32, i32) {
    %c0_i32 = arith.constant 0 : i32
    %c0_i32_0 = arith.constant 0 : i32
    %c0_i32_1 = arith.constant 0 : i32
    return %c0_i32, %c0_i32_0 : i32, i32
  }
  func.func @transform_4(%arg0: i32) -> (i32, i32) {
    %c0_i32 = arith.constant 0 : i32
    %c0_i32_0 = arith.constant 0 : i32
    %c0_i32_1 = arith.constant 0 : i32
    return %c0_i32, %c0_i32_0 : i32, i32
  }
  func.func @transform_5(%arg0: i32) -> (i32, i32) {
    %c0_i32 = arith.constant 0 : i32
    %c0_i32_0 = arith.constant 0 : i32
    %c0_i32_1 = arith.constant 0 : i32
    return %c0_i32, %c0_i32_0 : i32, i32
  }
  func.func @transform_6(%arg0: i32) -> (i32, i32) {
    %c0_i32 = arith.constant 0 : i32
    %c0_i32_0 = arith.constant 0 : i32
    %c0_i32_1 = arith.constant 0 : i32
    return %c0_i32, %c0_i32_0 : i32, i32
  }
  func.func @transform_7(%arg0: i32) -> (i32, i32) {
    %c0_i32 = arith.constant 0 : i32
    %c0_i32_0 = arith.constant 0 : i32
    %c0_i32_1 = arith.constant 0 : i32
    return %c0_i32, %c0_i32_0 : i32, i32
  }
  func.func @transform_8(%arg0: i32) -> (i32, i32) {
    %c0_i32 = arith.constant 0 : i32
    %c0_i32_0 = arith.constant 0 : i32
    %c0_i32_1 = arith.constant 0 : i32
    return %c0_i32, %c0_i32_0 : i32, i32
  }
  func.func @transform_9(%arg0: i32) -> (i32, i32) {
    %c0_i32 = arith.constant 0 : i32
    %c0_i32_0 = arith.constant 0 : i32
    %c0_i32_1 = arith.constant 0 : i32
    return %c0_i32, %c0_i32_0 : i32, i32
  }
  func.func @transform_10(%arg0: i32) -> (i32, i32) {
    %c0_i32 = arith.constant 0 : i32
    %c0_i32_0 = arith.constant 0 : i32
    %c0_i32_1 = arith.constant 0 : i32
    return %c0_i32, %c0_i32_0 : i32, i32
  }
  func.func @transform_11(%arg0: i32) -> (i32, i32) {
    %c0_i32 = arith.constant 0 : i32
    %c0_i32_0 = arith.constant 0 : i32
    %c0_i32_1 = arith.constant 0 : i32
    return %c0_i32, %c0_i32_0 : i32, i32
  }
  func.func @transform_12(%arg0: i32) -> (i32, i32) {
    %c0_i32 = arith.constant 0 : i32
    %c0_i32_0 = arith.constant 0 : i32
    %c0_i32_1 = arith.constant 0 : i32
    return %c0_i32, %c0_i32_0 : i32, i32
  }
  func.func @transform_13(%arg0: i32) -> (i32, i32) {
    %c0_i32 = arith.constant 0 : i32
    %c0_i32_0 = arith.constant 0 : i32
    %c0_i32_1 = arith.constant 0 : i32
    return %c0_i32, %c0_i32_0 : i32, i32
  }
  func.func @transform_14(%arg0: i32) -> (i32, i32) {
    %c0_i32 = arith.constant 0 : i32
    %c0_i32_0 = arith.constant 0 : i32
    %c0_i32_1 = arith.constant 0 : i32
    return %c0_i32, %c0_i32_0 : i32, i32
  }
  func.func @transform_15(%arg0: i32) -> (i32, i32) {
    %c0_i32 = arith.constant 0 : i32
    %c0_i32_0 = arith.constant 0 : i32
    %c0_i32_1 = arith.constant 0 : i32
    return %c0_i32, %c0_i32_0 : i32, i32
  }
  func.func @transform_16(%arg0: i32) -> (i32, i32) {
    %c0_i32 = arith.constant 0 : i32
    %c0_i32_0 = arith.constant 0 : i32
    %c0_i32_1 = arith.constant 0 : i32
    return %c0_i32, %c0_i32_0 : i32, i32
  }
  func.func @transform_17(%arg0: i32) -> (i32, i32) {
    %c0_i32 = arith.constant 0 : i32
    %c0_i32_0 = arith.constant 0 : i32
    %c0_i32_1 = arith.constant 0 : i32
    return %c0_i32, %c0_i32_0 : i32, i32
  }
  func.func @transform_18(%arg0: i32) -> (i32, i32) {
    %c0_i32 = arith.constant 0 : i32
    %c0_i32_0 = arith.constant 0 : i32
    %c0_i32_1 = arith.constant 0 : i32
    return %c0_i32, %c0_i32_0 : i32, i32
  }
  func.func @transform_19(%arg0: i32) -> (i32, i32) {
    %c0_i32 = arith.constant 0 : i32
    %c0_i32_0 = arith.constant 0 : i32
    %c0_i32_1 = arith.constant 0 : i32
    return %c0_i32, %c0_i32_0 : i32, i32
  }
  func.func @transform_20(%arg0: i32) -> (i32, i32) {
    %c0_i32 = arith.constant 0 : i32
    %c0_i32_0 = arith.constant 0 : i32
    %c0_i32_1 = arith.constant 0 : i32
    return %c0_i32, %c0_i32_0 : i32, i32
  }
  func.func @transform_21(%arg0: i32) -> (i32, i32) {
    %c0_i32 = arith.constant 0 : i32
    %c0_i32_0 = arith.constant 0 : i32
    %c0_i32_1 = arith.constant 0 : i32
    return %c0_i32, %c0_i32_0 : i32, i32
  }
  func.func @transform_22(%arg0: i32) -> (i32, i32) {
    %c0_i32 = arith.constant 0 : i32
    %c0_i32_0 = arith.constant 0 : i32
    %c0_i32_1 = arith.constant 0 : i32
    return %c0_i32, %c0_i32_0 : i32, i32
  }
}

module attributes {stable_mosaic.version = 11 : i64} {
  func.func @_decoder_stage_kernel(%arg0: i32, %arg1: memref<16x128xf32, #tpu.memory_space<vmem>>, %arg2: memref<32x128xf32, #tpu.memory_space<vmem>>, %arg3: memref<32x16xbf16, #tpu.memory_space<vmem>>, %arg4: memref<128x128xbf16, #tpu.memory_space<vmem>>, %arg5: memref<1x128xf32, #tpu.memory_space<vmem>>, %arg6: memref<1x8xf32, #tpu.memory_space<vmem>>, %arg7: memref<1x8xf32, #tpu.memory_space<vmem>>, %arg8: memref<128x8xf32, #tpu.memory_space<vmem>>, %arg9: memref<8x128xf32, #tpu.memory_space<vmem>>, %arg10: memref<32x32xbf16, #tpu.memory_space<vmem>>, %arg11: memref<32x32xbf16, #tpu.memory_space<vmem>>, %arg12: memref<128x128xbf16, #tpu.memory_space<vmem>>, %arg13: memref<128x128xbf16, #tpu.memory_space<vmem>>, %arg14: memref<128x128xbf16, #tpu.memory_space<vmem>>, %arg15: memref<128x128xbf16, #tpu.memory_space<vmem>>, %arg16: memref<128x128xbf16, #tpu.memory_space<vmem>>, %arg17: memref<128x128xbf16, #tpu.memory_space<vmem>>, %arg18: memref<1x128xf32, #tpu.memory_space<vmem>>, %arg19: memref<128x128xbf16, #tpu.memory_space<vmem>>, %arg20: memref<128x128xbf16, #tpu.memory_space<vmem>>, %arg21: memref<128x128xbf16, #tpu.memory_space<vmem>>, %arg22: memref<1x128xf32, #tpu.memory_space<vmem>>, %arg23: memref<128x48xbf16, #tpu.memory_space<vmem>>, %arg24: memref<1x48xf32, #tpu.memory_space<vmem>>, %arg25: memref<32x48xf32, #tpu.memory_space<vmem>>, %arg26: memref<32x48xf32, #tpu.memory_space<vmem>>) attributes {dimension_semantics = [#tpu.dimension_semantics<arbitrary>], iteration_bounds = array<i64: 1>, scalar_prefetch = 0 : i64, scratch_operands = 0 : i64, tpu.core_type = #tpu.core_type<tc>, window_params = [{pipeline_mode = #tpu.pipeline_mode<synchronous>, transform_indices = @transform_0, window_bounds = array<i64: 16, 128>}, {pipeline_mode = #tpu.pipeline_mode<synchronous>, transform_indices = @transform_1, window_bounds = array<i64: 32, 128>}, {pipeline_mode = #tpu.pipeline_mode<synchronous>, transform_indices = @transform_2, window_bounds = array<i64: 32, 16>}, {pipeline_mode = #tpu.pipeline_mode<synchronous>, transform_indices = @transform_3, window_bounds = array<i64: 128, 128>}, {pipeline_mode = #tpu.pipeline_mode<synchronous>, transform_indices = @transform_4, window_bounds = array<i64: 1, 128>}, {pipeline_mode = #tpu.pipeline_mode<synchronous>, transform_indices = @transform_5, window_bounds = array<i64: 1, 8>}, {pipeline_mode = #tpu.pipeline_mode<synchronous>, transform_indices = @transform_6, window_bounds = array<i64: 1, 8>}, {pipeline_mode = #tpu.pipeline_mode<synchronous>, transform_indices = @transform_7, window_bounds = array<i64: 128, 8>}, {pipeline_mode = #tpu.pipeline_mode<synchronous>, transform_indices = @transform_8, window_bounds = array<i64: 8, 128>}, {pipeline_mode = #tpu.pipeline_mode<synchronous>, transform_indices = @transform_9, window_bounds = array<i64: 32, 32>}, {pipeline_mode = #tpu.pipeline_mode<synchronous>, transform_indices = @transform_10, window_bounds = array<i64: 32, 32>}, {pipeline_mode = #tpu.pipeline_mode<synchronous>, transform_indices = @transform_11, window_bounds = array<i64: 128, 128>}, {pipeline_mode = #tpu.pipeline_mode<synchronous>, transform_indices = @transform_12, window_bounds = array<i64: 128, 128>}, {pipeline_mode = #tpu.pipeline_mode<synchronous>, transform_indices = @transform_13, window_bounds = array<i64: 128, 128>}, {pipeline_mode = #tpu.pipeline_mode<synchronous>, transform_indices = @transform_14, window_bounds = array<i64: 128, 128>}, {pipeline_mode = #tpu.pipeline_mode<synchronous>, transform_indices = @transform_15, window_bounds = array<i64: 128, 128>}, {pipeline_mode = #tpu.pipeline_mode<synchronous>, transform_indices = @transform_16, window_bounds = array<i64: 128, 128>}, {pipeline_mode = #tpu.pipeline_mode<synchronous>, transform_indices = @transform_17, window_bounds = array<i64: 1, 128>}, {pipeline_mode = #tpu.pipeline_mode<synchronous>, transform_indices = @transform_18, window_bounds = array<i64: 128, 128>}, {pipeline_mode = #tpu.pipeline_mode<synchronous>, transform_indices = @transform_19, window_bounds = array<i64: 128, 128>}, {pipeline_mode = #tpu.pipeline_mode<synchronous>, transform_indices = @transform_20, window_bounds = array<i64: 128, 128>}, {pipeline_mode = #tpu.pipeline_mode<synchronous>, transform_indices = @transform_21, window_bounds = array<i64: 1, 128>}, {pipeline_mode = #tpu.pipeline_mode<synchronous>, transform_indices = @transform_22, window_bounds = array<i64: 128, 48>}, {pipeline_mode = #tpu.pipeline_mode<synchronous>, transform_indices = @transform_23, window_bounds = array<i64: 1, 48>}, {pipeline_mode = #tpu.pipeline_mode<synchronous>, transform_indices = @transform_24, window_bounds = array<i64: 32, 48>}, {pipeline_mode = #tpu.pipeline_mode<synchronous>, transform_indices = @transform_25, window_bounds = array<i64: 32, 48>}]} {
    %c0 = arith.constant 0 : index
    %c0_0 = arith.constant 0 : index
    %0 = vector.load %arg10[%c0, %c0_0] : memref<32x32xbf16, #tpu.memory_space<vmem>>, vector<32x32xbf16>
    %c0_1 = arith.constant 0 : index
    %c0_2 = arith.constant 0 : index
    %1 = vector.load %arg11[%c0_1, %c0_2] : memref<32x32xbf16, #tpu.memory_space<vmem>>, vector<32x32xbf16>
    %c0_3 = arith.constant 0 : index
    %c0_4 = arith.constant 0 : index
    %2 = vector.load %arg1[%c0_3, %c0_4] : memref<16x128xf32, #tpu.memory_space<vmem>>, vector<16x128xf32>
    %3 = arith.truncf %2 : vector<16x128xf32> to vector<16x128xbf16>
    %c0_5 = arith.constant 0 : index
    %c0_6 = arith.constant 0 : index
    %4 = vector.load %arg3[%c0_5, %c0_6] : memref<32x16xbf16, #tpu.memory_space<vmem>>, vector<32x16xbf16>
    %cst = arith.constant dense<0.000000e+00> : vector<32x128xf32>
    %5 = tpu.matmul %4, %3, %cst {dimension_numbers = #tpu.dot_dimension_numbers<[1], [0], [0], [1], [0, 0, 1, 1], [], []>} : vector<32x16xbf16>, vector<16x128xbf16>, vector<32x128xf32> -> vector<32x128xf32>
    %6 = arith.truncf %5 : vector<32x128xf32> to vector<32x128xbf16>
    %c0_7 = arith.constant 0 : index
    %c0_8 = arith.constant 0 : index
    %7 = vector.load %arg4[%c0_7, %c0_8] : memref<128x128xbf16, #tpu.memory_space<vmem>>, vector<128x128xbf16>
    %cst_9 = arith.constant dense<0.000000e+00> : vector<32x128xf32>
    %8 = tpu.matmul %6, %7, %cst_9 {dimension_numbers = #tpu.dot_dimension_numbers<[1], [0], [0], [1], [0, 0, 1, 1], [], []>} : vector<32x128xbf16>, vector<128x128xbf16>, vector<32x128xf32> -> vector<32x128xf32>
    %c0_10 = arith.constant 0 : index
    %c0_11 = arith.constant 0 : index
    %9 = vector.load %arg5[%c0_10, %c0_11] : memref<1x128xf32, #tpu.memory_space<vmem>>, vector<1x128xf32>
    %10 = vector.broadcast %9 : vector<1x128xf32> to vector<32x128xf32>
    %11 = arith.addf %8, %10 : vector<32x128xf32>
    %cst_12 = arith.constant dense<0.000000e+00> : vector<128xf32>
    %12 = vector.multi_reduction <add>, %11, %cst_12 [0] : vector<32x128xf32> to vector<128xf32>
    %13 = vector.shape_cast %12 : vector<128xf32> to vector<1x128xf32>
    %c0_13 = arith.constant 0 : index
    %c0_14 = arith.constant 0 : index
    %14 = vector.load %arg8[%c0_13, %c0_14] : memref<128x8xf32, #tpu.memory_space<vmem>>, vector<128x8xf32>
    %cst_15 = arith.constant dense<0.000000e+00> : vector<1x8xf32>
    %15 = tpu.matmul %13, %14, %cst_15 {dimension_numbers = #tpu.dot_dimension_numbers<[1], [0], [0], [1], [0, 0, 1, 1], [], []>} : vector<1x128xf32>, vector<128x8xf32>, vector<1x8xf32> -> vector<1x8xf32>
    %16 = arith.mulf %11, %11 : vector<32x128xf32>
    %cst_16 = arith.constant dense<0.000000e+00> : vector<128xf32>
    %17 = vector.multi_reduction <add>, %16, %cst_16 [0] : vector<32x128xf32> to vector<128xf32>
    %18 = vector.shape_cast %17 : vector<128xf32> to vector<1x128xf32>
    %c0_17 = arith.constant 0 : index
    %c0_18 = arith.constant 0 : index
    %19 = vector.load %arg8[%c0_17, %c0_18] : memref<128x8xf32, #tpu.memory_space<vmem>>, vector<128x8xf32>
    %cst_19 = arith.constant dense<0.000000e+00> : vector<1x8xf32>
    %20 = tpu.matmul %18, %19, %cst_19 {dimension_numbers = #tpu.dot_dimension_numbers<[1], [0], [0], [1], [0, 0, 1, 1], [], []>} : vector<1x128xf32>, vector<128x8xf32>, vector<1x8xf32> -> vector<1x8xf32>
    %cst_20 = arith.constant 0.001953125 : f32
    %21 = vector.broadcast %cst_20 : f32 to vector<1x8xf32>
    %22 = arith.mulf %15, %21 : vector<1x8xf32>
    %cst_21 = arith.constant 0.001953125 : f32
    %23 = vector.broadcast %cst_21 : f32 to vector<1x8xf32>
    %24 = arith.mulf %20, %23 : vector<1x8xf32>
    %25 = arith.mulf %22, %22 : vector<1x8xf32>
    %26 = arith.subf %24, %25 : vector<1x8xf32>
    %c0_22 = arith.constant 0 : index
    %c0_23 = arith.constant 0 : index
    %27 = vector.load %arg6[%c0_22, %c0_23] : memref<1x8xf32, #tpu.memory_space<vmem>>, vector<1x8xf32>
    %cst_24 = arith.constant 9.99999974E-6 : f32
    %28 = vector.broadcast %cst_24 : f32 to vector<1x8xf32>
    %29 = arith.addf %26, %28 : vector<1x8xf32>
    %30 = math.rsqrt %29 : vector<1x8xf32>
    %31 = arith.mulf %27, %30 : vector<1x8xf32>
    %c0_25 = arith.constant 0 : index
    %c0_26 = arith.constant 0 : index
    %32 = vector.load %arg7[%c0_25, %c0_26] : memref<1x8xf32, #tpu.memory_space<vmem>>, vector<1x8xf32>
    %33 = arith.mulf %22, %31 : vector<1x8xf32>
    %34 = arith.subf %32, %33 : vector<1x8xf32>
    %c0_27 = arith.constant 0 : index
    %c0_28 = arith.constant 0 : index
    %35 = vector.load %arg9[%c0_27, %c0_28] : memref<8x128xf32, #tpu.memory_space<vmem>>, vector<8x128xf32>
    %cst_29 = arith.constant dense<0.000000e+00> : vector<1x128xf32>
    %36 = tpu.matmul %31, %35, %cst_29 {dimension_numbers = #tpu.dot_dimension_numbers<[1], [0], [0], [1], [0, 0, 1, 1], [], []>} : vector<1x8xf32>, vector<8x128xf32>, vector<1x128xf32> -> vector<1x128xf32>
    %c0_30 = arith.constant 0 : index
    %c0_31 = arith.constant 0 : index
    %37 = vector.load %arg9[%c0_30, %c0_31] : memref<8x128xf32, #tpu.memory_space<vmem>>, vector<8x128xf32>
    %cst_32 = arith.constant dense<0.000000e+00> : vector<1x128xf32>
    %38 = tpu.matmul %34, %37, %cst_32 {dimension_numbers = #tpu.dot_dimension_numbers<[1], [0], [0], [1], [0, 0, 1, 1], [], []>} : vector<1x8xf32>, vector<8x128xf32>, vector<1x128xf32> -> vector<1x128xf32>
    %39 = vector.broadcast %36 : vector<1x128xf32> to vector<32x128xf32>
    %40 = arith.mulf %11, %39 : vector<32x128xf32>
    %41 = vector.broadcast %38 : vector<1x128xf32> to vector<32x128xf32>
    %42 = arith.addf %40, %41 : vector<32x128xf32>
    %c0_33 = arith.constant 0 : index
    %c0_34 = arith.constant 0 : index
    %43 = vector.load %arg2[%c0_33, %c0_34] : memref<32x128xf32, #tpu.memory_space<vmem>>, vector<32x128xf32>
    %44 = arith.truncf %42 : vector<32x128xf32> to vector<32x128xbf16>
    %cst_35 = arith.constant dense<0.000000e+00> : vector<32x128xf32>
    %45 = tpu.matmul %0, %44, %cst_35 {dimension_numbers = #tpu.dot_dimension_numbers<[1], [0], [0], [1], [0, 0, 1, 1], [], []>} : vector<32x32xbf16>, vector<32x128xbf16>, vector<32x128xf32> -> vector<32x128xf32>
    %46 = arith.truncf %45 : vector<32x128xf32> to vector<32x128xbf16>
    %cst_36 = arith.constant dense<0.000000e+00> : vector<32x128xf32>
    %47 = tpu.matmul %1, %44, %cst_36 {dimension_numbers = #tpu.dot_dimension_numbers<[1], [0], [0], [1], [0, 0, 1, 1], [], []>} : vector<32x32xbf16>, vector<32x128xbf16>, vector<32x128xf32> -> vector<32x128xf32>
    %48 = arith.truncf %47 : vector<32x128xf32> to vector<32x128xbf16>
    %c0_37 = arith.constant 0 : index
    %c0_38 = arith.constant 0 : index
    %49 = vector.load %arg12[%c0_37, %c0_38] : memref<128x128xbf16, #tpu.memory_space<vmem>>, vector<128x128xbf16>
    %cst_39 = arith.constant dense<0.000000e+00> : vector<32x128xf32>
    %50 = tpu.matmul %46, %49, %cst_39 {dimension_numbers = #tpu.dot_dimension_numbers<[1], [0], [0], [1], [0, 0, 1, 1], [], []>} : vector<32x128xbf16>, vector<128x128xbf16>, vector<32x128xf32> -> vector<32x128xf32>
    %c0_40 = arith.constant 0 : index
    %c0_41 = arith.constant 0 : index
    %51 = vector.load %arg13[%c0_40, %c0_41] : memref<128x128xbf16, #tpu.memory_space<vmem>>, vector<128x128xbf16>
    %cst_42 = arith.constant dense<0.000000e+00> : vector<32x128xf32>
    %52 = tpu.matmul %44, %51, %cst_42 {dimension_numbers = #tpu.dot_dimension_numbers<[1], [0], [0], [1], [0, 0, 1, 1], [], []>} : vector<32x128xbf16>, vector<128x128xbf16>, vector<32x128xf32> -> vector<32x128xf32>
    %53 = arith.addf %50, %52 : vector<32x128xf32>
    %c0_43 = arith.constant 0 : index
    %c0_44 = arith.constant 0 : index
    %54 = vector.load %arg14[%c0_43, %c0_44] : memref<128x128xbf16, #tpu.memory_space<vmem>>, vector<128x128xbf16>
    %cst_45 = arith.constant dense<0.000000e+00> : vector<32x128xf32>
    %55 = tpu.matmul %48, %54, %cst_45 {dimension_numbers = #tpu.dot_dimension_numbers<[1], [0], [0], [1], [0, 0, 1, 1], [], []>} : vector<32x128xbf16>, vector<128x128xbf16>, vector<32x128xf32> -> vector<32x128xf32>
    %56 = arith.addf %53, %55 : vector<32x128xf32>
    %57 = arith.truncf %43 : vector<32x128xf32> to vector<32x128xbf16>
    %cst_46 = arith.constant dense<0.000000e+00> : vector<32x128xf32>
    %58 = tpu.matmul %0, %57, %cst_46 {dimension_numbers = #tpu.dot_dimension_numbers<[1], [0], [0], [1], [0, 0, 1, 1], [], []>} : vector<32x32xbf16>, vector<32x128xbf16>, vector<32x128xf32> -> vector<32x128xf32>
    %59 = arith.truncf %58 : vector<32x128xf32> to vector<32x128xbf16>
    %cst_47 = arith.constant dense<0.000000e+00> : vector<32x128xf32>
    %60 = tpu.matmul %1, %57, %cst_47 {dimension_numbers = #tpu.dot_dimension_numbers<[1], [0], [0], [1], [0, 0, 1, 1], [], []>} : vector<32x32xbf16>, vector<32x128xbf16>, vector<32x128xf32> -> vector<32x128xf32>
    %61 = arith.truncf %60 : vector<32x128xf32> to vector<32x128xbf16>
    %c0_48 = arith.constant 0 : index
    %c0_49 = arith.constant 0 : index
    %62 = vector.load %arg15[%c0_48, %c0_49] : memref<128x128xbf16, #tpu.memory_space<vmem>>, vector<128x128xbf16>
    %cst_50 = arith.constant dense<0.000000e+00> : vector<32x128xf32>
    %63 = tpu.matmul %59, %62, %cst_50 {dimension_numbers = #tpu.dot_dimension_numbers<[1], [0], [0], [1], [0, 0, 1, 1], [], []>} : vector<32x128xbf16>, vector<128x128xbf16>, vector<32x128xf32> -> vector<32x128xf32>
    %c0_51 = arith.constant 0 : index
    %c0_52 = arith.constant 0 : index
    %64 = vector.load %arg16[%c0_51, %c0_52] : memref<128x128xbf16, #tpu.memory_space<vmem>>, vector<128x128xbf16>
    %cst_53 = arith.constant dense<0.000000e+00> : vector<32x128xf32>
    %65 = tpu.matmul %57, %64, %cst_53 {dimension_numbers = #tpu.dot_dimension_numbers<[1], [0], [0], [1], [0, 0, 1, 1], [], []>} : vector<32x128xbf16>, vector<128x128xbf16>, vector<32x128xf32> -> vector<32x128xf32>
    %66 = arith.addf %63, %65 : vector<32x128xf32>
    %c0_54 = arith.constant 0 : index
    %c0_55 = arith.constant 0 : index
    %67 = vector.load %arg17[%c0_54, %c0_55] : memref<128x128xbf16, #tpu.memory_space<vmem>>, vector<128x128xbf16>
    %cst_56 = arith.constant dense<0.000000e+00> : vector<32x128xf32>
    %68 = tpu.matmul %61, %67, %cst_56 {dimension_numbers = #tpu.dot_dimension_numbers<[1], [0], [0], [1], [0, 0, 1, 1], [], []>} : vector<32x128xbf16>, vector<128x128xbf16>, vector<32x128xf32> -> vector<32x128xf32>
    %69 = arith.addf %66, %68 : vector<32x128xf32>
    %70 = arith.addf %56, %69 : vector<32x128xf32>
    %c0_57 = arith.constant 0 : index
    %c0_58 = arith.constant 0 : index
    %71 = vector.load %arg18[%c0_57, %c0_58] : memref<1x128xf32, #tpu.memory_space<vmem>>, vector<1x128xf32>
    %72 = vector.broadcast %71 : vector<1x128xf32> to vector<32x128xf32>
    %73 = arith.addf %70, %72 : vector<32x128xf32>
    %cst_59 = arith.constant 0.000000e+00 : f32
    %74 = vector.broadcast %cst_59 : f32 to vector<32x128xf32>
    %75 = arith.maximumf %73, %74 : vector<32x128xf32>
    %76 = arith.truncf %75 : vector<32x128xf32> to vector<32x128xbf16>
    %cst_60 = arith.constant dense<0.000000e+00> : vector<32x128xf32>
    %77 = tpu.matmul %0, %76, %cst_60 {dimension_numbers = #tpu.dot_dimension_numbers<[1], [0], [0], [1], [0, 0, 1, 1], [], []>} : vector<32x32xbf16>, vector<32x128xbf16>, vector<32x128xf32> -> vector<32x128xf32>
    %78 = arith.truncf %77 : vector<32x128xf32> to vector<32x128xbf16>
    %cst_61 = arith.constant dense<0.000000e+00> : vector<32x128xf32>
    %79 = tpu.matmul %1, %76, %cst_61 {dimension_numbers = #tpu.dot_dimension_numbers<[1], [0], [0], [1], [0, 0, 1, 1], [], []>} : vector<32x32xbf16>, vector<32x128xbf16>, vector<32x128xf32> -> vector<32x128xf32>
    %80 = arith.truncf %79 : vector<32x128xf32> to vector<32x128xbf16>
    %c0_62 = arith.constant 0 : index
    %c0_63 = arith.constant 0 : index
    %81 = vector.load %arg19[%c0_62, %c0_63] : memref<128x128xbf16, #tpu.memory_space<vmem>>, vector<128x128xbf16>
    %cst_64 = arith.constant dense<0.000000e+00> : vector<32x128xf32>
    %82 = tpu.matmul %78, %81, %cst_64 {dimension_numbers = #tpu.dot_dimension_numbers<[1], [0], [0], [1], [0, 0, 1, 1], [], []>} : vector<32x128xbf16>, vector<128x128xbf16>, vector<32x128xf32> -> vector<32x128xf32>
    %c0_65 = arith.constant 0 : index
    %c0_66 = arith.constant 0 : index
    %83 = vector.load %arg20[%c0_65, %c0_66] : memref<128x128xbf16, #tpu.memory_space<vmem>>, vector<128x128xbf16>
    %cst_67 = arith.constant dense<0.000000e+00> : vector<32x128xf32>
    %84 = tpu.matmul %76, %83, %cst_67 {dimension_numbers = #tpu.dot_dimension_numbers<[1], [0], [0], [1], [0, 0, 1, 1], [], []>} : vector<32x128xbf16>, vector<128x128xbf16>, vector<32x128xf32> -> vector<32x128xf32>
    %85 = arith.addf %82, %84 : vector<32x128xf32>
    %c0_68 = arith.constant 0 : index
    %c0_69 = arith.constant 0 : index
    %86 = vector.load %arg21[%c0_68, %c0_69] : memref<128x128xbf16, #tpu.memory_space<vmem>>, vector<128x128xbf16>
    %cst_70 = arith.constant dense<0.000000e+00> : vector<32x128xf32>
    %87 = tpu.matmul %80, %86, %cst_70 {dimension_numbers = #tpu.dot_dimension_numbers<[1], [0], [0], [1], [0, 0, 1, 1], [], []>} : vector<32x128xbf16>, vector<128x128xbf16>, vector<32x128xf32> -> vector<32x128xf32>
    %88 = arith.addf %85, %87 : vector<32x128xf32>
    %c0_71 = arith.constant 0 : index
    %c0_72 = arith.constant 0 : index
    %89 = vector.load %arg22[%c0_71, %c0_72] : memref<1x128xf32, #tpu.memory_space<vmem>>, vector<1x128xf32>
    %90 = vector.broadcast %89 : vector<1x128xf32> to vector<32x128xf32>
    %91 = arith.addf %88, %90 : vector<32x128xf32>
    %cst_73 = arith.constant 0.000000e+00 : f32
    %92 = vector.broadcast %cst_73 : f32 to vector<32x128xf32>
    %93 = arith.maximumf %91, %92 : vector<32x128xf32>
    %94 = arith.truncf %93 : vector<32x128xf32> to vector<32x128xbf16>
    %c0_74 = arith.constant 0 : index
    %c0_75 = arith.constant 0 : index
    %95 = vector.load %arg23[%c0_74, %c0_75] : memref<128x48xbf16, #tpu.memory_space<vmem>>, vector<128x48xbf16>
    %cst_76 = arith.constant dense<0.000000e+00> : vector<32x48xf32>
    %96 = tpu.matmul %94, %95, %cst_76 {dimension_numbers = #tpu.dot_dimension_numbers<[1], [0], [0], [1], [0, 0, 1, 1], [], []>} : vector<32x128xbf16>, vector<128x48xbf16>, vector<32x48xf32> -> vector<32x48xf32>
    %c0_77 = arith.constant 0 : index
    %c0_78 = arith.constant 0 : index
    %97 = vector.load %arg24[%c0_77, %c0_78] : memref<1x48xf32, #tpu.memory_space<vmem>>, vector<1x48xf32>
    %98 = vector.broadcast %97 : vector<1x48xf32> to vector<32x48xf32>
    %99 = arith.addf %96, %98 : vector<32x48xf32>
    %c0_79 = arith.constant 0 : index
    %c0_80 = arith.constant 0 : index
    %100 = vector.load %arg25[%c0_79, %c0_80] : memref<32x48xf32, #tpu.memory_space<vmem>>, vector<32x48xf32>
    tpu.vector_store %arg25[%c0_79, %c0_80], %99 {strides = array<i32>} : memref<32x48xf32, #tpu.memory_space<vmem>>, vector<32x48xf32>,
    %cst_81 = arith.constant 0.000000e+00 : f32
    %101 = vector.broadcast %cst_81 : f32 to vector<32x48xf32>
    %102 = arith.maximumf %99, %101 : vector<32x48xf32>
    %c0_82 = arith.constant 0 : index
    %c0_83 = arith.constant 0 : index
    %103 = vector.load %arg26[%c0_82, %c0_83] : memref<32x48xf32, #tpu.memory_space<vmem>>, vector<32x48xf32>
    tpu.vector_store %arg26[%c0_82, %c0_83], %102 {strides = array<i32>} : memref<32x48xf32, #tpu.memory_space<vmem>>, vector<32x48xf32>,
    return
  }
  func.func @transform_0(%arg0: i32) -> (i32, i32) {
    %c0_i32 = arith.constant 0 : i32
    %c0_i32_0 = arith.constant 0 : i32
    %c0_i32_1 = arith.constant 0 : i32
    return %c0_i32, %c0_i32_0 : i32, i32
  }
  func.func @transform_1(%arg0: i32) -> (i32, i32) {
    %c0_i32 = arith.constant 0 : i32
    %c0_i32_0 = arith.constant 0 : i32
    %c0_i32_1 = arith.constant 0 : i32
    return %c0_i32, %c0_i32_0 : i32, i32
  }
  func.func @transform_2(%arg0: i32) -> (i32, i32) {
    %c0_i32 = arith.constant 0 : i32
    %c0_i32_0 = arith.constant 0 : i32
    %c0_i32_1 = arith.constant 0 : i32
    return %c0_i32, %c0_i32_0 : i32, i32
  }
  func.func @transform_3(%arg0: i32) -> (i32, i32) {
    %c0_i32 = arith.constant 0 : i32
    %c0_i32_0 = arith.constant 0 : i32
    %c0_i32_1 = arith.constant 0 : i32
    return %c0_i32, %c0_i32_0 : i32, i32
  }
  func.func @transform_4(%arg0: i32) -> (i32, i32) {
    %c0_i32 = arith.constant 0 : i32
    %c0_i32_0 = arith.constant 0 : i32
    %c0_i32_1 = arith.constant 0 : i32
    return %c0_i32, %c0_i32_0 : i32, i32
  }
  func.func @transform_5(%arg0: i32) -> (i32, i32) {
    %c0_i32 = arith.constant 0 : i32
    %c0_i32_0 = arith.constant 0 : i32
    %c0_i32_1 = arith.constant 0 : i32
    return %c0_i32, %c0_i32_0 : i32, i32
  }
  func.func @transform_6(%arg0: i32) -> (i32, i32) {
    %c0_i32 = arith.constant 0 : i32
    %c0_i32_0 = arith.constant 0 : i32
    %c0_i32_1 = arith.constant 0 : i32
    return %c0_i32, %c0_i32_0 : i32, i32
  }
  func.func @transform_7(%arg0: i32) -> (i32, i32) {
    %c0_i32 = arith.constant 0 : i32
    %c0_i32_0 = arith.constant 0 : i32
    %c0_i32_1 = arith.constant 0 : i32
    return %c0_i32, %c0_i32_0 : i32, i32
  }
  func.func @transform_8(%arg0: i32) -> (i32, i32) {
    %c0_i32 = arith.constant 0 : i32
    %c0_i32_0 = arith.constant 0 : i32
    %c0_i32_1 = arith.constant 0 : i32
    return %c0_i32, %c0_i32_0 : i32, i32
  }
  func.func @transform_9(%arg0: i32) -> (i32, i32) {
    %c0_i32 = arith.constant 0 : i32
    %c0_i32_0 = arith.constant 0 : i32
    %c0_i32_1 = arith.constant 0 : i32
    return %c0_i32, %c0_i32_0 : i32, i32
  }
  func.func @transform_10(%arg0: i32) -> (i32, i32) {
    %c0_i32 = arith.constant 0 : i32
    %c0_i32_0 = arith.constant 0 : i32
    %c0_i32_1 = arith.constant 0 : i32
    return %c0_i32, %c0_i32_0 : i32, i32
  }
  func.func @transform_11(%arg0: i32) -> (i32, i32) {
    %c0_i32 = arith.constant 0 : i32
    %c0_i32_0 = arith.constant 0 : i32
    %c0_i32_1 = arith.constant 0 : i32
    return %c0_i32, %c0_i32_0 : i32, i32
  }
  func.func @transform_12(%arg0: i32) -> (i32, i32) {
    %c0_i32 = arith.constant 0 : i32
    %c0_i32_0 = arith.constant 0 : i32
    %c0_i32_1 = arith.constant 0 : i32
    return %c0_i32, %c0_i32_0 : i32, i32
  }
  func.func @transform_13(%arg0: i32) -> (i32, i32) {
    %c0_i32 = arith.constant 0 : i32
    %c0_i32_0 = arith.constant 0 : i32
    %c0_i32_1 = arith.constant 0 : i32
    return %c0_i32, %c0_i32_0 : i32, i32
  }
  func.func @transform_14(%arg0: i32) -> (i32, i32) {
    %c0_i32 = arith.constant 0 : i32
    %c0_i32_0 = arith.constant 0 : i32
    %c0_i32_1 = arith.constant 0 : i32
    return %c0_i32, %c0_i32_0 : i32, i32
  }
  func.func @transform_15(%arg0: i32) -> (i32, i32) {
    %c0_i32 = arith.constant 0 : i32
    %c0_i32_0 = arith.constant 0 : i32
    %c0_i32_1 = arith.constant 0 : i32
    return %c0_i32, %c0_i32_0 : i32, i32
  }
  func.func @transform_16(%arg0: i32) -> (i32, i32) {
    %c0_i32 = arith.constant 0 : i32
    %c0_i32_0 = arith.constant 0 : i32
    %c0_i32_1 = arith.constant 0 : i32
    return %c0_i32, %c0_i32_0 : i32, i32
  }
  func.func @transform_17(%arg0: i32) -> (i32, i32) {
    %c0_i32 = arith.constant 0 : i32
    %c0_i32_0 = arith.constant 0 : i32
    %c0_i32_1 = arith.constant 0 : i32
    return %c0_i32, %c0_i32_0 : i32, i32
  }
  func.func @transform_18(%arg0: i32) -> (i32, i32) {
    %c0_i32 = arith.constant 0 : i32
    %c0_i32_0 = arith.constant 0 : i32
    %c0_i32_1 = arith.constant 0 : i32
    return %c0_i32, %c0_i32_0 : i32, i32
  }
  func.func @transform_19(%arg0: i32) -> (i32, i32) {
    %c0_i32 = arith.constant 0 : i32
    %c0_i32_0 = arith.constant 0 : i32
    %c0_i32_1 = arith.constant 0 : i32
    return %c0_i32, %c0_i32_0 : i32, i32
  }
  func.func @transform_20(%arg0: i32) -> (i32, i32) {
    %c0_i32 = arith.constant 0 : i32
    %c0_i32_0 = arith.constant 0 : i32
    %c0_i32_1 = arith.constant 0 : i32
    return %c0_i32, %c0_i32_0 : i32, i32
  }
  func.func @transform_21(%arg0: i32) -> (i32, i32) {
    %c0_i32 = arith.constant 0 : i32
    %c0_i32_0 = arith.constant 0 : i32
    %c0_i32_1 = arith.constant 0 : i32
    return %c0_i32, %c0_i32_0 : i32, i32
  }
  func.func @transform_22(%arg0: i32) -> (i32, i32) {
    %c0_i32 = arith.constant 0 : i32
    %c0_i32_0 = arith.constant 0 : i32
    %c0_i32_1 = arith.constant 0 : i32
    return %c0_i32, %c0_i32_0 : i32, i32
  }
  func.func @transform_23(%arg0: i32) -> (i32, i32) {
    %c0_i32 = arith.constant 0 : i32
    %c0_i32_0 = arith.constant 0 : i32
    %c0_i32_1 = arith.constant 0 : i32
    return %c0_i32, %c0_i32_0 : i32, i32
  }
  func.func @transform_24(%arg0: i32) -> (i32, i32) {
    %c0_i32 = arith.constant 0 : i32
    %c0_i32_0 = arith.constant 0 : i32
    %c0_i32_1 = arith.constant 0 : i32
    return %c0_i32, %c0_i32_0 : i32, i32
  }
  func.func @transform_25(%arg0: i32) -> (i32, i32) {
    %c0_i32 = arith.constant 0 : i32
    %c0_i32_0 = arith.constant 0 : i32
    %c0_i32_1 = arith.constant 0 : i32
    return %c0_i32, %c0_i32_0 : i32, i32
  }
}

</mosaic_0001>

<bundles_post_ra>
// kernel: tile.68
= control target key start
LH: loop header
LB: loop body
LE: loop exit
PB: predicated region body
PF: predicated region fallthrough
CT: control target
= control target key end

     0   :  { %s28_s0 = inlined_call_operand.vmem [shape: f32[8], index: 0, kind: input, shape index: {}]   ;;  %s29_s1 = inlined_call_operand.vmem [shape: f32[16,8], index: 1, kind: output, shape index: {}]  }
   0x1   :  { %v4_v0 = vld [vmem:[%s28_s0] ss:$0 sm:$0xff] }
   0x2   :  { %5 = vst [vmem:[%s29_s1] sm:$0xff] %v4_v0 }
   0x3   :  { %8 = vst [vmem:[%s29_s1 + $0x8] sm:$0xff] %v4_v0 }

// kernel: tile.69
= control target key start
LH: loop header
LB: loop body
LE: loop exit
PB: predicated region body
PF: predicated region fallthrough
CT: control target
= control target key end

     0   :  { %s131_s10 = smov 120   ;;  %s132_s11 = smov 104   ;;  %vm3_vm0 = vcmask 64512   ;;  %vm9_vm1 = vcmask 1048512   ;;  %vm15_vm2 = vcmask 982912   ;;  %vm21_vm3 = vcmask 917312   ;;  %s207_s0 = inlined_call_operand.vmem [shape: f32[16,8], index: 0, kind: input, shape index: {}]   ;;  %s208_s1 = inlined_call_operand.vmem [shape: f32[1,128], index: 1, kind: output, shape index: {}]  }
   0x1   :  { %v101_v0 = vld [vmem:[%s207_s0 + $0xf] sm:$0x1]   ;;  %v103_v1 = vld [vmem:[%s207_s0 + $0xd] sm:$0x1]   ;;  %v105_v2 = vld [vmem:[%s207_s0 + $0xb] sm:$0x1]  }
   0x2   :  { %7 = vrot.lane.b32.xlu0 %v101_v0, %s131_s10  ;;  %19 = vrot.lane.b32.xlu1 %v103_v1, %s132_s11  ;;  %s133_s14 = smov 88   ;;  %v102_v3 = vld [vmem:[%s207_s0 + $0xe] sm:$0x1]   ;;  %v104_v4 = vld [vmem:[%s207_s0 + $0xc] sm:$0x1]   ;;  %s134_s19 = smov 112  }
   0x3   :  { %31 = vrot.lane.b32.xlu2 %v105_v2, %s133_s14  ;;  %s135_s20 = smov 96   ;;  %v106_v5 = vld [vmem:[%s207_s0 + $0xa] sm:$0x1]   ;;  %s136_s23 = smov 80   ;;  %v107_v6 = vld [vmem:[%s207_s0 + $0x9] sm:$0x1]  }
   0x4   :  { %v108_v7 = vld [vmem:[%s207_s0 + $0x8] sm:$0x1]   ;;  %s137_s28 = smov 72   ;;  %s138_s29 = smov 64   ;;  %v109_v8 = vld [vmem:[%s207_s0 + $0x7] sm:$0x1]  }
   0x5   :  { %s139_s3 = smov 56   ;;  %v110_v9 = vld [vmem:[%s207_s0 + $0x6] sm:$0x1]   ;;  %v111_v10 = vld [vmem:[%s207_s0 + $0x5] sm:$0x1]   ;;  %s140_s8 = smov 48  }
   0x6   :  { %s141_s9 = smov 40   ;;  %v112_v11 = vld [vmem:[%s207_s0 + $0x4] sm:$0x1]   ;;  %s142_s12 = smov 32   ;;  %v113_v12 = vld [vmem:[%s207_s0 + $0x3] sm:$0x1]  }
   0x7   :  { %v114_v13 = vld [vmem:[%s207_s0 + $0x2] sm:$0x1]   ;;  %s143_s17 = smov 24   ;;  %s144_s18 = smov 16   ;;  %v115_v14 = vld [vmem:[%s207_s0 + $0x1] sm:$0x1]  }
   0x8   :  { %s145_s21 = smov 8   ;;  %v2_v15 = vld [vmem:[%s207_s0] sm:$0x1]   ;;  %vm27_vm4 = vcmask 851712   ;;  %vm33_vm5 = vcmask 786112   ;;  %vm39_vm6 = vcmask 720512  }
   0x9   :  { %4 = vst.msk [vmem:[#allocation0] sm:$0x1] %vm3_vm0, %v2_v15   ;;  %vm45_vm7 = vcmask 654912   ;;  %vm51_vm8 = vcmask 589312   ;;  %vm57_vm9 = vcmask 523712   ;;  %vm63_vm10 = vcmask 458112  }
   0xa   :  { %13 = vrot.lane.b32.xlu0 %v102_v3, %s134_s19  ;;  %25 = vrot.lane.b32.xlu1 %v104_v4, %s135_s20  ;;  %vm69_vm11 = vcmask 392512   ;;  %vm75_vm12 = vcmask 326912   ;;  %vm81_vm13 = vcmask 261312   ;;  %vm87_vm14 = vcmask 195712  }
   0xb   :  { %37 = vrot.lane.b32.xlu2 %v106_v5, %s136_s23  ;;  %vm93_vm15 = vcmask 130112  }
  0x12   :  { %43 = vrot.lane.b32.xlu0 %v107_v6, %s137_s28  ;;  %49 = vrot.lane.b32.xlu1 %v108_v7, %s138_s29 }
  0x13   :  { %55 = vrot.lane.b32.xlu2 %v109_v8, %s139_s3 }
  0x1a   :  { %61 = vrot.lane.b32.xlu0 %v110_v9, %s140_s8  ;;  %67 = vrot.lane.b32.xlu1 %v111_v10, %s141_s9 }
  0x1b   :  { %73 = vrot.lane.b32.xlu2 %v112_v11, %s142_s12 }
  0x22   :  { %79 = vrot.lane.b32.xlu0 %v113_v12, %s143_s17  ;;  %85 = vrot.lane.b32.xlu1 %v114_v13, %s144_s18 }
  0x23   :  { %91 = vrot.lane.b32.xlu2 %v115_v14, %s145_s21 }
  0x5d   :  { %v32_v16 = vpop.permute.xlu2 %31  }
  0x65   :  { %v38_v17 = vpop.permute.xlu2 %37  }
  0x6d   :  { %v56_v18 = vpop.permute.xlu2 %55  }
  0x74   :  { %v8_v19 = vpop.permute.xlu0 %7   ;;  %v20_v20 = vpop.permute.xlu1 %19  }
  0x75   :  { %10 = vst.msk [vmem:[#allocation0] sm:$0x1] %vm9_vm1, %v8_v19   ;;  %v74_v21 = vpop.permute.xlu2 %73  }
  0x7c   :  { %v14_v22 = vpop.permute.xlu0 %13   ;;  %v26_v23 = vpop.permute.xlu1 %25  }
  0x7d   :  { %16 = vst.msk [vmem:[#allocation0] sm:$0x1] %vm15_vm2, %v14_v22   ;;  %v92_v24 = vpop.permute.xlu2 %91  }
  0x7e   :  { %22 = vst.msk [vmem:[#allocation0] sm:$0x1] %vm21_vm3, %v20_v20  }
  0x7f   :  { %28 = vst.msk [vmem:[#allocation0] sm:$0x1] %vm27_vm4, %v26_v23  }
  0x80   :  { %34 = vst.msk [vmem:[#allocation0] sm:$0x1] %vm33_vm5, %v32_v16  }
  0x81   :  { %40 = vst.msk [vmem:[#allocation0] sm:$0x1] %vm39_vm6, %v38_v17  }
  0x84   :  { %v44_v25 = vpop.permute.xlu0 %43   ;;  %v50_v26 = vpop.permute.xlu1 %49  }
  0x85   :  { %46 = vst.msk [vmem:[#allocation0] sm:$0x1] %vm45_vm7, %v44_v25  }
  0x86   :  { %52 = vst.msk [vmem:[#allocation0] sm:$0x1] %vm51_vm8, %v50_v26  }
  0x87   :  { %58 = vst.msk [vmem:[#allocation0] sm:$0x1] %vm57_vm9, %v56_v18  }
  0x8c   :  { %v62_v27 = vpop.permute.xlu0 %61   ;;  %v68_v28 = vpop.permute.xlu1 %67  }
  0x8d   :  { %64 = vst.msk [vmem:[#allocation0] sm:$0x1] %vm63_vm10, %v62_v27  }
  0x8e   :  { %70 = vst.msk [vmem:[#allocation0] sm:$0x1] %vm69_vm11, %v68_v28  }
  0x8f   :  { %76 = vst.msk [vmem:[#allocation0] sm:$0x1] %vm75_vm12, %v74_v21  }
  0x94   :  { %v80_v29 = vpop.permute.xlu0 %79   ;;  %v86_v30 = vpop.permute.xlu1 %85  }
  0x95   :  { %82 = vst.msk [vmem:[#allocation0] sm:$0x1] %vm81_vm13, %v80_v29  }
  0x96   :  { %88 = vst.msk [vmem:[#allocation0] sm:$0x1] %vm87_vm14, %v86_v30  }
  0x97   :  { %94 = vst.msk [vmem:[#allocation0] sm:$0x1] %vm93_vm15, %v92_v24  }
  0x9e   :  { %v97_v31 = vld [vmem:[#allocation0] sm:$0x1] }
  0x9f   :  { %100 = vst [vmem:[%s208_s1] sm:$0x1] %v97_v31 }

// kernel: forward.6
= control target key start
LH: loop header
LB: loop body
LE: loop exit
PB: predicated region body
PF: predicated region fallthrough
CT: control target
= control target key end

     0   :  { %vm89_vm0 = vcmask 261120   ;;  %vm184_vm1 = vcmask 392192   ;;  %vm726_vm5 = vcmask 64512   ;;  %vm1011_vm6 = vcmask 523264   ;;  %s1742_s0 = inlined_call_operand.vmem [shape: f32[32,48], index: 0, kind: input, shape index: {}]   ;;  %s1743_s4 = inlined_call_operand.vmem [shape: bf16[48,128], index: 4, kind: input, shape index: {}]   ;;  %s1744_s1 = inlined_call_operand.vmem [shape: bf16[32,32], index: 1, kind: input, shape index: {}]   ;;  %s1745_s2 = inlined_call_operand.vmem [shape: bf16[32,32], index: 2, kind: input, shape index: {}]   ;;  %s1746_s3 = inlined_call_operand.vmem [shape: bf16[48,128], index: 3, kind: input, shape index: {}]   ;;  %s1747_s5 = inlined_call_operand.vmem [shape: bf16[48,128], index: 5, kind: input, shape index: {}]   ;;  %s1748_s8 = inlined_call_operand.vmem [shape: bf16[128,128], index: 8, kind: input, shape index: {}]   ;;  %s1749_s6 = inlined_call_operand.vmem [shape: f32[1,128], index: 6, kind: input, shape index: {}]   ;;  %s1750_s7 = inlined_call_operand.vmem [shape: bf16[128,128], index: 7, kind: input, shape index: {}]   ;;  %s1751_s9 = inlined_call_operand.vmem [shape: bf16[128,128], index: 9, kind: input, shape index: {}]   ;;  %s1752_s10 = inlined_call_operand.vmem [shape: f32[1,128], index: 10, kind: input, shape index: {}]   ;;  %s1753_s13 = inlined_call_operand.vmem [shape: f32[128,8], index: 13, kind: input, shape index: {}]   ;;  %s1754_s14 = inlined_call_operand.vmem [shape: f32[8,128], index: 14, kind: input, shape index: {}]   ;;  %s1755_s15 = inlined_call_operand.vmem [shape: bf16[128,64], index: 15, kind: input, shape index: {}]   ;;  %s1756_s16 = inlined_call_operand.vmem [shape: bf16[128,64], index: 16, kind: input, shape index: {}]   ;;  %s1757_s11 = inlined_call_operand.vmem [shape: f32[1,8], index: 11, kind: input, shape index: {}]   ;;  %s1758_s12 = inlined_call_operand.vmem [shape: f32[1,8], index: 12, kind: input, shape index: {}]   ;;  %s1759_s19 = inlined_call_operand.vmem [shape: f32[32,128], index: 19, kind: output, shape index: {0}]   ;;  %s1760_s17 = inlined_call_operand.vmem [shape: bf16[16,32], index: 17, kind: input, shape index: {}]   ;;  %s1761_s18 = inlined_call_operand.vmem [shape: bf16[16,32], index: 18, kind: input, shape index: {}]   ;;  %s1762_s20 = inlined_call_operand.vmem [shape: f32[16,64], index: 20, kind: output, shape index: {1}]  }
   0x1   :  { %1768 = sst [smem:[#allocation2_spill]] %s1742_s0  ;;  %v1272_v14 = vld [vmem:[%s1747_s5 + $0x10] sm:$0xff]  ;;  %v1271_v16 = vld [vmem:[%s1747_s5 + $0x8] sm:$0xff]  ;;  %v1270_v18 = vld [vmem:[%s1747_s5] sm:$0xff] }
   0x2   :  { %1769 = sst [smem:[#allocation3_spill]] %s1743_s4  ;;  %v1288_v19 = vld [vmem:[%s1748_s8 + $0x38] sm:$0xff]  ;;  %v1287_v32 = vld [vmem:[%s1748_s8 + $0x30] sm:$0xff]  ;;  %v1286_v33 = vld [vmem:[%s1748_s8 + $0x28] sm:$0xff] }
   0x3   :  { %1770 = sst [smem:[#allocation4_spill]] %s1744_s1  ;;  %v1285_v34 = vld [vmem:[%s1748_s8 + $0x20] sm:$0xff]  ;;  %v1284_v35 = vld [vmem:[%s1748_s8 + $0x18] sm:$0xff]  ;;  %v1283_v36 = vld [vmem:[%s1748_s8 + $0x10] sm:$0xff] }
   0x4   :  { %1771 = sst [smem:[#allocation5_spill]] %s1745_s2  ;;  %v1282_v37 = vld [vmem:[%s1748_s8 + $0x8] sm:$0xff]  ;;  %v1281_v38 = vld [vmem:[%s1748_s8] sm:$0xff] }
   0x5   :  { %1772 = sst [smem:[#allocation6_spill]] %s1746_s3  ;;  %v1319_v46 = vld [vmem:[%s1749_s6] ss:$0 sm:$0xff] }
   0x6   :  { %s1773_s23 = sld [smem:[#allocation2_spill]] }
   0x7   :  { %s1774_s29 = sld [smem:[#allocation3_spill]] }
   0x8   :  { %s1775_s21 = sld [smem:[#allocation4_spill]] }
   0x9   :  { %s1776_s24 = sld [smem:[#allocation5_spill]] }
   0xc   :  { %v75_v0 = vld [vmem:[%s1773_s23 + $0x10] sm:$0xff]  ;;  %v76_v1 = vld [vmem:[%s1773_s23 + $0x18] sm:$0xff]  ;;  %v73_v2 = vld [vmem:[%s1773_s23] sm:$0xff] }
   0xd   :  { %v78_v3 = vpack.c.bf16 %v76_v1, %v75_v0  ;;  %v74_v4 = vld [vmem:[%s1773_s23 + $0x8] sm:$0xff]  ;;  %v1269_v6 = vld [vmem:[%s1774_s29 + $0x10] sm:$0xff]  ;;  %v1267_v12 = vld [vmem:[%s1774_s29] sm:$0xff] }
   0xe   :  { %v77_v5 = vpack.c.bf16 %v74_v4, %v73_v2  ;;  %v1446_v7 = vld [vmem:[%s1775_s21] sm:$0xff]  ;;  %v1456_v9 = vld [vmem:[%s1775_s21 + $0x8] sm:$0xff]  ;;  %s1777_s21 = sld [smem:[#allocation6_spill]]  ;;  %v1280_v0 = vld [vmem:[%s1750_s7 + $0x38] sm:$0xff] }
   0xf   :  { %102 = vmatpush.bf16.msra.mxu0 %v78_v3  ;;  %139 = vmatpush.bf16.msra.mxu1 %v78_v3  ;;  %v1451_v8 = vld [vmem:[%s1776_s24] sm:$0xff]  ;;  %v1461_v10 = vld [vmem:[%s1776_s24 + $0x8] sm:$0xff] }
  0x10   :  { %1315 = vmatpush.bf16.msra.mxu2 %v78_v3  ;;  %1317 = vmatpush.bf16.msra.mxu3 %v78_v3  ;;  %v1268_v11 = vld [vmem:[%s1774_s29 + $0x8] sm:$0xff] }
  0x13   :  { %103 = vmatpush.bf16.msra.mxu0 %v77_v5  ;;  %140 = vmatpush.bf16.msra.mxu1 %v77_v5 }
  0x14   :  { %1316 = vmatpush.bf16.msra.mxu2 %v77_v5  ;;  %1318 = vmatpush.bf16.msra.mxu3 %v77_v5  ;;  %v1266_v13 = vld [vmem:[%s1777_s21 + $0x10] sm:$0xff]  ;;  %v1265_v15 = vld [vmem:[%s1777_s21 + $0x8] sm:$0xff]  ;;  %v1264_v17 = vld [vmem:[%s1777_s21] sm:$0xff] }
  0x16   :  { %1030 = vmatmul.msk.bf16.vlgmr.msra.gmra.mxu0 %vm89_vm0, %v1446_v7  ;;  %1040 = vmatmul.msk.bf16.vlgmr.msra.gmra.mxu1 %vm89_vm0, %v1451_v8 }
  0x17   :  { %1031 = vmatmul.msk.bf16.vlgmr.msra.gmra.mxu2 %vm89_vm0, %v1456_v9  ;;  %1041 = vmatmul.msk.bf16.vlgmr.msra.gmra.mxu3 %vm89_vm0, %v1461_v10 }
  0x18   :  { %196 = vmatpush.bf16.msrb.mxu2 %v1269_v6  ;;  %239 = vmatpush.bf16.msrb.mxu3 %v1266_v13  ;;  %v1276_v13 = vld [vmem:[%s1750_s7 + $0x18] sm:$0xff] }
  0x19   :  { %288 = vmatpush.bf16.msrb.mxu0 %v1272_v14  ;;  %v1293_v14 = vld [vmem:[%s1751_s9 + $0x20] sm:$0xff] }
  0x1c   :  { %197 = vmatpush.bf16.msrb.mxu2 %v1268_v11  ;;  %240 = vmatpush.bf16.msrb.mxu3 %v1265_v15  ;;  %v1279_v11 = vld [vmem:[%s1750_s7 + $0x30] sm:$0xff] }
  0x1d   :  { %289 = vmatpush.bf16.msrb.mxu0 %v1271_v16  ;;  %v1275_v15 = vld [vmem:[%s1750_s7 + $0x10] sm:$0xff]  ;;  %v1292_v16 = vld [vmem:[%s1751_s9 + $0x18] sm:$0xff] }
  0x20   :  { %198 = vmatpush.bf16.msrb.mxu2 %v1267_v12  ;;  %241 = vmatpush.bf16.msrb.mxu3 %v1264_v17  ;;  %v1296_v12 = vld [vmem:[%s1751_s9 + $0x38] sm:$0xff]  ;;  %v1274_v17 = vld [vmem:[%s1750_s7 + $0x8] sm:$0xff] }
  0x21   :  { %290 = vmatpush.bf16.msrb.mxu0 %v1270_v18  ;;  %v1291_v18 = vld [vmem:[%s1751_s9 + $0x10] sm:$0xff] }
  0x24   :  { %442 = vmatpush.bf16.msra.mxu3 %v1288_v19  ;;  %v1273_v19 = vld [vmem:[%s1750_s7] sm:$0xff] }
  0x25   :  { %509 = vmatpush.bf16.msra.mxu0 %v1280_v0 }
  0x27   :  { %1054 = vmatmul.msk.bf16.vlgmr.msrb.gmra.mxu2 %vm184_vm1, %v77_v5 }
  0x28   :  { %443 = vmatpush.bf16.msra.mxu3 %v1287_v32 }
  0x29   :  { %510 = vmatpush.bf16.msra.mxu0 %v1279_v11 }
  0x2c   :  { %444 = vmatpush.bf16.msra.mxu3 %v1286_v33 }
  0x30   :  { %445 = vmatpush.bf16.msra.mxu3 %v1285_v34  ;;  %v651_v34 = vld [vmem:[%s1753_s13 + $0x78] sm:$0xff] }
  0x34   :  { %446 = vmatpush.bf16.msra.mxu3 %v1284_v35  ;;  %v650_v35 = vld [vmem:[%s1753_s13 + $0x70] sm:$0xff] }
  0x37   :  { %1055 = vmatmul.msk.bf16.gmra.mxu2 %vm184_vm1, %v78_v3 }
  0x38   :  { %447 = vmatpush.bf16.msra.mxu3 %v1283_v36  ;;  %v649_v36 = vld [vmem:[%s1753_s13 + $0x68] sm:$0xff] }
  0x3c   :  { %448 = vmatpush.bf16.msra.mxu3 %v1282_v37  ;;  %v648_v37 = vld [vmem:[%s1753_s13 + $0x60] sm:$0xff] }
  0x40   :  { %449 = vmatpush.bf16.msra.mxu3 %v1281_v38  ;;  %v647_v38 = vld [vmem:[%s1753_s13 + $0x58] sm:$0xff] }
  0x93   :  { %v105_v20 = vpop.f32.mrf.mxu0  ;;  %v142_v21 = vpop.f32.mrf.mxu1 }
  0x9a   :  { %v147_v26 = vpop.f32.mrf.mxu3  ;;  %v110_v27 = vpop.f32.mrf.mxu2 }
  0x9b   :  { %v107_v22 = vpop.f32.mrf.mxu0  ;;  %v144_v23 = vpop.f32.mrf.mxu1 }
  0x9c   :  { %v115_v24 = vpack.c.bf16 %v107_v22, %v105_v20  ;;  %v152_v25 = vpack.c.bf16 %v144_v23, %v142_v21  ;;  %v1290_v20 = vld [vmem:[%s1751_s9 + $0x8] sm:$0xff]  ;;  %v1289_v21 = vld [vmem:[%s1751_s9] sm:$0xff] }
  0x9e   :  { %1068 = vmatmul.msk.bf16.vlgmr.msrb.gmra.mxu3 %vm184_vm1, %v115_v24  ;;  %1082 = vmatmul.msk.bf16.vlgmr.msrb.gmra.mxu0 %vm184_vm1, %v152_v25 }
  0x9f   :  { %685 = vmatpush.msrb.mxu3 %v651_v34 }
  0xa1   :  { %686 = vmatpush.msrb.mxu3 %v650_v35 }
  0xa2   :  { %v149_v28 = vpop.f32.mrf.mxu3  ;;  %v112_v29 = vpop.f32.mrf.mxu2 }
  0xa3   :  { %v153_v30 = vpack.c.bf16 %v149_v28, %v147_v26  ;;  %v116_v31 = vpack.c.bf16 %v112_v29, %v110_v27  ;;  %687 = vmatpush.msrb.mxu3 %v649_v36 }
  0xa5   :  { %688 = vmatpush.msrb.mxu3 %v648_v37 }
  0xa7   :  { %689 = vmatpush.msrb.mxu3 %v647_v38 }
  0xaa   :  { %v200_v39 = vpop.f32.mrf.mxu2 }
  0xae   :  { %1069 = vmatmul.msk.bf16.gmra.mxu3 %vm184_vm1, %v116_v31  ;;  %1083 = vmatmul.msk.bf16.gmra.mxu0 %vm184_vm1, %v153_v30 }
  0xb2   :  { %v202_v43 = vpop.f32.mrf.mxu2 }
  0xba   :  { %v205_v52 = vpop.f32.mrf.mxu2 }
  0xc2   :  { %v207_v60 = vpop.f32.mrf.mxu2 }
 0x11b   :  { %v292_v40 = vpop.f32.mrf.mxu0 }
 0x121   :  { %v243_v41 = vpop.f32.mrf.mxu3 }
 0x122   :  { %v244_v42 = vadd.f32 %v243_v41, %v200_v39 }
 0x123   :  { %v294_v44 = vpop.f32.mrf.mxu0 }
 0x124   :  { %v302_v45 = vadd.f32 %v292_v40, %v244_v42  ;;  %v646_v40 = vld [vmem:[%s1753_s13 + $0x50] sm:$0xff]  ;;  %v645_v42 = vld [vmem:[%s1753_s13 + $0x48] sm:$0xff] }
 0x125   :  { %690 = vmatpush.msrb.mxu3 %v646_v40 }
 0x126   :  { %v310_v49 = vadd.f32 %v1319_v46, %v302_v45 }
 0x127   :  { %691 = vmatpush.msrb.mxu3 %v645_v42 }
 0x128   :  { %v314_v53 = vmax.f32 %v310_v49, 0.0  ;;  %v641_v49 = vld [vmem:[%s1753_s13 + $0x28] sm:$0xff] }
 0x129   :  { %v245_v47 = vpop.f32.mrf.mxu3 }
 0x12a   :  { %v246_v48 = vadd.f32 %v245_v47, %v202_v43  ;;  %v644_v43 = vld [vmem:[%s1753_s13 + $0x40] sm:$0xff] }
 0x12b   :  { %v297_v55 = vpop.f32.mrf.mxu0  ;;  %692 = vmatpush.msrb.mxu3 %v644_v43 }
 0x12c   :  { %v303_v50 = vadd.f32 %v294_v44, %v246_v48  ;;  %v643_v44 = vld [vmem:[%s1753_s13 + $0x38] sm:$0xff] }
 0x12d   :  { %693 = vmatpush.msrb.mxu3 %v643_v44 }
 0x12e   :  { %v311_v51 = vadd.f32 %v1319_v46, %v303_v50  ;;  %v640_v50 = vld [vmem:[%s1753_s13 + $0x20] sm:$0xff] }
 0x130   :  { %v315_v54 = vmax.f32 %v311_v51, 0.0  ;;  %v639_v51 = vld [vmem:[%s1753_s13 + $0x18] sm:$0xff] }
 0x131   :  { %v248_v56 = vpop.f32.mrf.mxu3 }
 0x132   :  { %v318_v57 = vpack.c.bf16 %v315_v54, %v314_v53  ;;  %v249_v58 = vadd.f32 %v248_v56, %v205_v52  ;;  %v638_v52 = vld [vmem:[%s1753_s13 + $0x10] sm:$0xff]  ;;  %v637_v54 = vld [vmem:[%s1753_s13 + $0x8] sm:$0xff]  ;;  %v636_v56 = vld [vmem:[%s1753_s13] sm:$0xff] }
 0x133   :  { %v299_v63 = vpop.f32.mrf.mxu0 }
 0x134   :  { %450 = vmatmul.bf16.vlgmr.msra.gmra.mxu3 %v318_v57  ;;  %v304_v59 = vadd.f32 %v297_v55, %v249_v58 }
 0x136   :  { %v312_v1 = vadd.f32 %v1319_v46, %v304_v59 }
 0x138   :  { %v316_v4 = vmax.f32 %v312_v1, 0.0 }
 0x139   :  { %v250_v61 = vpop.f32.mrf.mxu3 }
 0x13a   :  { %v251_v62 = vadd.f32 %v250_v61, %v207_v60 }
 0x13c   :  { %v305_v2 = vadd.f32 %v299_v63, %v251_v62  ;;  %v1320_v62 = vld [vmem:[%s1752_s10] ss:$0 sm:$0xff] }
 0x13e   :  { %v313_v3 = vadd.f32 %v1319_v46, %v305_v2  ;;  %v642_v46 = vld [vmem:[%s1753_s13 + $0x30] sm:$0xff] }
 0x13f   :  { %694 = vmatpush.msrb.mxu3 %v642_v46 }
 0x140   :  { %v317_v5 = vmax.f32 %v313_v3, 0.0 }
 0x141   :  { %695 = vmatpush.msrb.mxu3 %v641_v49 }
 0x142   :  { %v319_v6 = vpack.c.bf16 %v317_v5, %v316_v4 }
 0x143   :  { %696 = vmatpush.msrb.mxu3 %v640_v50 }
 0x144   :  { %326 = vmatpush.bf16.msrb.mxu1 %v319_v6  ;;  %347 = vmatpush.bf16.msra.mxu2 %v319_v6 }
 0x145   :  { %455 = vmatmul.bf16.gmra.mxu3 %v319_v6 }
 0x146   :  { %697 = vmatpush.msrb.mxu3 %v639_v51 }
 0x148   :  { %327 = vmatpush.bf16.msrb.mxu1 %v318_v57  ;;  %348 = vmatpush.bf16.msra.mxu2 %v318_v57 }
 0x149   :  { %698 = vmatpush.msrb.mxu3 %v638_v52 }
 0x14b   :  { %1084 = vmatmul.msk.bf16.vlgmr.msrb.gmra.mxu1 %vm89_vm0, %v1446_v7  ;;  %1086 = vmatmul.msk.bf16.vlgmr.msra.gmra.mxu2 %vm89_vm0, %v1451_v8  ;;  %v1278_v7 = vld [vmem:[%s1750_s7 + $0x28] sm:$0xff]  ;;  %v1295_v8 = vld [vmem:[%s1751_s9 + $0x30] sm:$0xff] }
 0x14c   :  { %592 = vmatpush.bf16.msra.mxu1 %v1296_v12  ;;  %511 = vmatpush.bf16.msra.mxu0 %v1278_v7 }
 0x14d   :  { %652 = vmatpush.msrb.mxu2 %v651_v34  ;;  %699 = vmatpush.msrb.mxu3 %v637_v54 }
 0x14f   :  { %653 = vmatpush.msrb.mxu2 %v650_v35  ;;  %700 = vmatpush.msrb.mxu3 %v636_v56 }
 0x150   :  { %593 = vmatpush.bf16.msra.mxu1 %v1295_v8 }
 0x151   :  { %654 = vmatpush.msrb.mxu2 %v649_v36 }
 0x153   :  { %655 = vmatpush.msrb.mxu2 %v648_v37  ;;  %v725_v37 = vld [vmem:[%s1754_s14] sm:$0xff] }
 0x154   :  { %768 = vmatpush.msra.mxu3 %v725_v37 }
 0x155   :  { %656 = vmatpush.msrb.mxu2 %v647_v38 }
 0x157   :  { %657 = vmatpush.msrb.mxu2 %v646_v40  ;;  %v1304_v40 = vld [vmem:[%s1755_s15 + $0x38] sm:$0xff] }
 0x159   :  { %658 = vmatpush.msrb.mxu2 %v645_v42 }
 0x15b   :  { %1085 = vmatmul.msk.bf16.gmra.mxu1 %vm89_vm0, %v1456_v9  ;;  %1087 = vmatmul.msk.bf16.gmra.mxu2 %vm89_vm0, %v1461_v10  ;;  %v1277_v9 = vld [vmem:[%s1750_s7 + $0x20] sm:$0xff]  ;;  %v1294_v10 = vld [vmem:[%s1751_s9 + $0x28] sm:$0xff] }
 0x15c   :  { %512 = vmatpush.bf16.msra.mxu0 %v1277_v9  ;;  %594 = vmatpush.bf16.msra.mxu1 %v1294_v10 }
 0x15d   :  { %659 = vmatpush.msrb.mxu2 %v644_v43 }
 0x15f   :  { %660 = vmatpush.msrb.mxu2 %v643_v44 }
 0x160   :  { %513 = vmatpush.bf16.msra.mxu0 %v1276_v13  ;;  %595 = vmatpush.bf16.msra.mxu1 %v1293_v14 }
 0x161   :  { %661 = vmatpush.msrb.mxu2 %v642_v46  ;;  %v1311_v46 = vld [vmem:[%s1756_s16 + $0x30] sm:$0xff] }
 0x163   :  { %662 = vmatpush.msrb.mxu2 %v641_v49  ;;  %v1302_v49 = vld [vmem:[%s1755_s15 + $0x28] sm:$0xff] }
 0x164   :  { %514 = vmatpush.bf16.msra.mxu0 %v1275_v15  ;;  %596 = vmatpush.bf16.msra.mxu1 %v1292_v16 }
 0x165   :  { %663 = vmatpush.msrb.mxu2 %v640_v50  ;;  %v1310_v50 = vld [vmem:[%s1756_s16 + $0x28] sm:$0xff] }
 0x167   :  { %664 = vmatpush.msrb.mxu2 %v639_v51  ;;  %v1301_v51 = vld [vmem:[%s1755_s15 + $0x20] sm:$0xff] }
 0x168   :  { %515 = vmatpush.bf16.msra.mxu0 %v1274_v17  ;;  %597 = vmatpush.bf16.msra.mxu1 %v1291_v18 }
 0x169   :  { %665 = vmatpush.msrb.mxu2 %v638_v52  ;;  %v1309_v52 = vld [vmem:[%s1756_s16 + $0x20] sm:$0xff] }
 0x16b   :  { %666 = vmatpush.msrb.mxu2 %v637_v54  ;;  %v1300_v54 = vld [vmem:[%s1755_s15 + $0x18] sm:$0xff] }
 0x16c   :  { %516 = vmatpush.bf16.msra.mxu0 %v1273_v19  ;;  %598 = vmatpush.bf16.msra.mxu1 %v1290_v20 }
 0x16d   :  { %667 = vmatpush.msrb.mxu2 %v636_v56 }
 0x16f   :  { %745 = vmatpush.msra.mxu2 %v725_v37  ;;  %v1313_v37 = vld [vmem:[%s1760_s17] sm:$0xff] }
 0x170   :  { %599 = vmatpush.bf16.msra.mxu1 %v1289_v21  ;;  %853 = vmatpush.bf16.msrb.mxu0 %v1304_v40 }
 0x1b7   :  { %v451_v39 = vpop.f32.mrf.mxu3 }
 0x1bf   :  { %v453_v47 = vpop.f32.mrf.mxu3 }
 0x1c8   :  { %v329_v22 = vpop.f32.mrf.mxu1  ;;  %v456_v58 = vpop.f32.mrf.mxu3 }
 0x1ce   :  { %v350_v23 = vpop.f32.mrf.mxu2 }
 0x1d0   :  { %v331_v24 = vpop.f32.mrf.mxu1  ;;  %v458_v11 = vpop.f32.mrf.mxu3 }
 0x1d1   :  { %v339_v25 = vpack.c.bf16 %v331_v24, %v329_v22 }
 0x1d3   :  { %517 = vmatmul.bf16.vlgmr.msra.gmra.mxu0 %v339_v25 }
 0x1d6   :  { %v352_v26 = vpop.f32.mrf.mxu2 }
 0x1d7   :  { %v360_v27 = vpack.c.bf16 %v352_v26, %v350_v23 }
 0x1d8   :  { %v334_v28 = vpop.f32.mrf.mxu1 }
 0x1d9   :  { %600 = vmatmul.bf16.vlgmr.msra.gmra.mxu1 %v360_v27 }
 0x1de   :  { %v355_v29 = vpop.f32.mrf.mxu2 }
 0x1e0   :  { %v336_v30 = vpop.f32.mrf.mxu1 }
 0x1e1   :  { %v340_v31 = vpack.c.bf16 %v336_v30, %v334_v28 }
 0x1e3   :  { %522 = vmatmul.bf16.gmra.mxu0 %v340_v31 }
 0x1e6   :  { %v357_v32 = vpop.f32.mrf.mxu2 }
 0x1e7   :  { %v361_v33 = vpack.c.bf16 %v357_v32, %v355_v29 }
 0x1e9   :  { %605 = vmatmul.bf16.gmra.mxu1 %v361_v33 }
 0x250   :  { %v518_v41 = vpop.f32.mrf.mxu0 }
 0x251   :  { %v519_v59 = vadd.f32 %v518_v41, %v451_v39  ;;  %v1312_v41 = vld [vmem:[%s1756_s16 + $0x38] sm:$0xff] }
 0x252   :  { %936 = vmatpush.bf16.msrb.mxu1 %v1312_v41 }
 0x256   :  { %v601_v45 = vpop.f32.mrf.mxu1  ;;  %937 = vmatpush.bf16.msrb.mxu1 %v1311_v46 }
 0x257   :  { %v611_v61 = vadd.f32 %v601_v45, %v519_v59  ;;  %v1303_v45 = vld [vmem:[%s1755_s15 + $0x30] sm:$0xff] }
 0x258   :  { %v520_v48 = vpop.f32.mrf.mxu0  ;;  %854 = vmatpush.bf16.msrb.mxu0 %v1303_v45 }
 0x259   :  { %v521_v57 = vadd.f32 %v520_v48, %v453_v47  ;;  %v619_v3 = vadd.f32 %v1320_v62, %v611_v61 }
 0x25a   :  { %938 = vmatpush.bf16.msrb.mxu1 %v1310_v50 }
 0x25b   :  { %v1637_v12 = vmax.f32 %v619_v3, 0.0  ;;  %v1299_v3 = vld [vmem:[%s1755_s15 + $0x10] sm:$0xff] }
 0x25c   :  { %855 = vmatpush.bf16.msrb.mxu0 %v1302_v49 }
 0x25d   :  { %v672_v14 = vmul.f32 %v1637_v12, %v1637_v12 }
 0x25e   :  { %v603_v53 = vpop.f32.mrf.mxu1  ;;  %939 = vmatpush.bf16.msrb.mxu1 %v1309_v52 }
 0x25f   :  { %v612_v60 = vadd.f32 %v603_v53, %v521_v57 }
 0x260   :  { %v523_v55 = vpop.f32.mrf.mxu0  ;;  %856 = vmatpush.bf16.msrb.mxu0 %v1301_v51 }
 0x261   :  { %v524_v63 = vadd.f32 %v523_v55, %v456_v58  ;;  %v620_v1 = vadd.f32 %v1320_v62, %v612_v60  ;;  %v1308_v55 = vld [vmem:[%s1756_s16 + $0x18] sm:$0xff]  ;;  %v709_v60 = vld [vmem:[%s1757_s11] sm:$0x1] }
 0x262   :  { %940 = vmatpush.bf16.msrb.mxu1 %v1308_v55 }
 0x263   :  { %v1635_v6 = vmax.f32 %v620_v1, 0.0 }
 0x264   :  { %857 = vmatpush.bf16.msrb.mxu0 %v1300_v54 }
 0x265   :  { %v673_v10 = vmul.f32 %v1635_v6, %v1635_v6  ;;  %v627_v15 = vadd.f32 %v1635_v6, %v1637_v12 }
 0x266   :  { %v606_v0 = vpop.f32.mrf.mxu1 }
 0x267   :  { %v613_v2 = vadd.f32 %v606_v0, %v524_v63  ;;  %v676_v18 = vadd.f32 %v673_v10, %v672_v14  ;;  %v722_v0 = vld [vmem:[%s1758_s12] sm:$0x1] }
 0x268   :  { %v525_v5 = vpop.f32.mrf.mxu0  ;;  %858 = vmatpush.bf16.msrb.mxu0 %v1299_v3 }
 0x269   :  { %v621_v4 = vadd.f32 %v1320_v62, %v613_v2  ;;  %v526_v8 = vadd.f32 %v525_v5, %v458_v11  ;;  %v1298_v5 = vld [vmem:[%s1755_s15 + $0x8] sm:$0xff] }
 0x26a   :  { %v1306_v11 = vld [vmem:[%s1756_s16 + $0x8] sm:$0xff] }
 0x26b   :  { %v1639_v7 = vmax.f32 %v621_v4, 0.0  ;;  %v1307_v4 = vld [vmem:[%s1756_s16 + $0x10] sm:$0xff] }
 0x26c   :  { %941 = vmatpush.bf16.msrb.mxu1 %v1307_v4  ;;  %859 = vmatpush.bf16.msrb.mxu0 %v1298_v5 }
 0x26d   :  { %v674_v16 = vmul.f32 %v1639_v7, %v1639_v7  ;;  %v628_v19 = vadd.f32 %v627_v15, %v1639_v7 }
 0x26e   :  { %v608_v9 = vpop.f32.mrf.mxu1 }
 0x26f   :  { %v614_v13 = vadd.f32 %v608_v9, %v526_v8  ;;  %v677_v21 = vadd.f32 %v676_v18, %v674_v16  ;;  %v1297_v8 = vld [vmem:[%s1755_s15] sm:$0xff] }
 0x270   :  { %942 = vmatpush.bf16.msrb.mxu1 %v1306_v11  ;;  %v1305_v9 = vld [vmem:[%s1756_s16] sm:$0xff]  ;;  %860 = vmatpush.bf16.msrb.mxu0 %v1297_v8 }
 0x271   :  { %v622_v17 = vadd.f32 %v1320_v62, %v614_v13 }
 0x273   :  { %v1650_v20 = vmax.f32 %v622_v17, 0.0 }
 0x274   :  { %943 = vmatpush.bf16.msrb.mxu1 %v1305_v9 }
 0x275   :  { %v629_v22 = vadd.f32 %v628_v19, %v1650_v20  ;;  %v675_v23 = vmul.f32 %v1650_v20, %v1650_v20 }
 0x277   :  { %v630_v24 = vrot.slane %v629_v22, 4  ;;  %v678_v25 = vadd.f32 %v677_v21, %v675_v23 }
 0x279   :  { %v631_v26 = vadd.f32 %v630_v24, %v629_v22  ;;  %v679_v27 = vrot.slane %v678_v25, 4 }
 0x27b   :  { %v632_v28 = vrot.slane %v631_v26, 2  ;;  %v680_v29 = vadd.f32 %v679_v27, %v678_v25 }
 0x27d   :  { %v633_v30 = vadd.f32 %v632_v28, %v631_v26  ;;  %v681_v31 = vrot.slane %v680_v29, 2 }
 0x27f   :  { %v634_v32 = vrot.slane %v633_v30, 1  ;;  %v682_v33 = vadd.f32 %v681_v31, %v680_v29 }
 0x281   :  { %v635_v34 = vadd.f32 %v634_v32, %v633_v30  ;;  %v683_v35 = vrot.slane %v682_v33, 1 }
 0x283   :  { %668 = vmatmul.f32.vlgmr.msrb.gmra.mxu2 %v635_v34  ;;  %v684_v36 = vadd.f32 %v683_v35, %v682_v33 }
 0x285   :  { %701 = vmatmul.f32.vlgmr.msrb.gmra.mxu3 %v684_v36 }
 0x306   :  { %v669_v38 = vpop.f32.mrf.mxu2 }
 0x307   :  { %v705_v39 = vmul.f32 0.001953125, %v669_v38  ;;  %v1314_v38 = vld [vmem:[%s1761_s18] sm:$0xff] }
 0x308   :  { %v702_v42 = vpop.f32.mrf.mxu3 }
 0x309   :  { %v707_v43 = vmul.f32 %v705_v39, %v705_v39  ;;  %v706_v44 = vmul.f32 0.001953125, %v702_v42 }
 0x30b   :  { %v708_v47 = vsub.f32 %v706_v44, %v707_v43 }
 0x30d   :  { %v710_v48 = vadd.f32 1e-05, %v708_v47 }
 0x30f   :  { %1321 = vrsqrt.f32 %v710_v48  ;;  %vm717_vm3 = vweird.f32 %v710_v48 }
 0x315   :  { %v1322_v53 = vpop.eup %1321 }
 0x316   :  { %v712_v56 = vmul.f32 %v1322_v53, %v710_v48  ;;  %vm718_vm2 = vweird.f32 %v1322_v53 }
 0x317   :  { %vm719_vm4 = vmor %vm717_vm3, %vm718_vm2 }
 0x318   :  { %v713_v57 = vmul.f32 %v1322_v53, %v712_v56 }
 0x31a   :  { %v714_v58 = vmul.f32 0.5, %v713_v57 }
 0x31c   :  { %v715_v59 = vsub.f32 1.5, %v714_v58 }
 0x31e   :  { %v716_v61 = vmul.f32 %v1322_v53, %v715_v59 }
 0x320   :  { %v720_v62 = vsel %vm719_vm4, %v1322_v53, %v716_v61 }
 0x321   :  { %v721_v63 = vmul.f32 %v720_v62, %v709_v60 }
 0x323   :  { %v723_v1 = vmul.f32 %v721_v63, %v705_v39  ;;  %1184 = vmatmul.msk.f32.vlgmr.msra.gmra.mxu2 %vm726_vm5, %v721_v63 }
 0x325   :  { %v724_v2 = vsub.f32 %v722_v0, %v723_v1 }
 0x327   :  { %1185 = vmatmul.msk.f32.vlgmr.msra.gmra.mxu3 %vm726_vm5, %v724_v2 }
 0x3a6   :  { %v747_v10 = vpop.f32.mrf.mxu2 }
 0x3a7   :  { %v773_v13 = vperm.slane %v747_v10, 0 }
 0x3a9   :  { %v774_v15 = vmul.f32 %v773_v13, %v1637_v12  ;;  %v775_v16 = vmul.f32 %v773_v13, %v1635_v6  ;;  %v776_v18 = vmul.f32 %v773_v13, %v1639_v7  ;;  %v777_v19 = vmul.f32 %v773_v13, %v1650_v20 }
 0x3aa   :  { %v770_v14 = vpop.f32.mrf.mxu3 }
 0x3ab   :  { %v778_v17 = vperm.slane %v770_v14, 0 }
 0x3ad   :  { %v779_v21 = vadd.f32 %v778_v17, %v774_v15  ;;  %v780_v22 = vadd.f32 %v778_v17, %v775_v16  ;;  %v781_v23 = vadd.f32 %v778_v17, %v776_v18  ;;  %v782_v24 = vadd.f32 %v778_v17, %v777_v19 }
 0x3af   :  { %v787_v25 = vpack.c.bf16 %v780_v22, %v779_v21  ;;  %783 = vst [vmem:[%s1759_s19] sm:$0xff] %v779_v21  ;;  %v788_v6 = vpack.c.bf16 %v782_v24, %v781_v23 }
 0x3b0   :  { %784 = vst [vmem:[%s1759_s19 + $0x8] sm:$0xff] %v780_v22 }
 0x3b1   :  { %861 = vmatmul.bf16.vlgmr.msrb.gmra.mxu0 %v787_v25  ;;  %944 = vmatmul.bf16.vlgmr.msrb.gmra.mxu1 %v787_v25  ;;  %785 = vst [vmem:[%s1759_s19 + $0x10] sm:$0xff] %v781_v23 }
 0x3b2   :  { %786 = vst [vmem:[%s1759_s19 + $0x18] sm:$0xff] %v782_v24 }
 0x3c1   :  { %866 = vmatmul.bf16.gmra.mxu0 %v788_v6  ;;  %949 = vmatmul.bf16.gmra.mxu1 %v788_v6 }
 0x42e   :  { %v862_v12 = vpop.f32.mrf.mxu0  ;;  %v945_v7 = vpop.f32.mrf.mxu1 }
 0x42f   :  { %v955_v35 = vmax.f32 %v862_v12, %v945_v7 }
 0x436   :  { %v864_v20 = vpop.f32.mrf.mxu0  ;;  %v947_v26 = vpop.f32.mrf.mxu1 }
 0x437   :  { %v956_v33 = vmax.f32 %v864_v20, %v947_v26 }
 0x439   :  { %v959_v36 = vpack.c.bf16 %v956_v33, %v955_v35 }
 0x43e   :  { %v867_v27 = vpop.f32.mrf.mxu0  ;;  %v950_v28 = vpop.f32.mrf.mxu1 }
 0x43f   :  { %v957_v31 = vmax.f32 %v867_v27, %v950_v28 }
 0x446   :  { %v869_v29 = vpop.f32.mrf.mxu0  ;;  %v952_v30 = vpop.f32.mrf.mxu1 }
 0x447   :  { %v958_v32 = vmax.f32 %v869_v29, %v952_v30 }
 0x449   :  { %v960_v34 = vpack.c.bf16 %v958_v32, %v957_v31 }
 0x44b   :  { %977 = vmatpush.bf16.msrb.mxu2 %v960_v34  ;;  %1001 = vmatpush.bf16.msrb.mxu3 %v960_v34 }
 0x44f   :  { %978 = vmatpush.bf16.msrb.mxu2 %v959_v36  ;;  %1002 = vmatpush.bf16.msrb.mxu3 %v959_v36 }
 0x452   :  { %1254 = vmatmul.msk.bf16.vlgmr.msrb.gmra.mxu2 %vm89_vm0, %v1313_v37  ;;  %1259 = vmatmul.msk.bf16.vlgmr.msrb.gmra.mxu3 %vm89_vm0, %v1314_v38 }
 0x4d5   :  { %v980_v39 = vpop.f32.mrf.mxu2  ;;  %v1004_v40 = vpop.f32.mrf.mxu3 }
 0x4d6   :  { %v1009_v41 = vmax.f32 %v980_v39, %v1004_v40 }
 0x4d8   :  { %1012 = vst.msk [vmem:[%s1762_s20] sm:$0xff] %vm1011_vm6, %v1009_v41 }
 0x4dd   :  { %v982_v42 = vpop.f32.mrf.mxu2  ;;  %v1006_v43 = vpop.f32.mrf.mxu3 }
 0x4de   :  { %v1010_v44 = vmax.f32 %v982_v42, %v1006_v43 }
 0x4e0   :  { %1013 = vst.msk [vmem:[%s1762_s20 + $0x8] sm:$0xff] %vm1011_vm6, %v1010_v44 }

// kernel: tile.78
= control target key start
LH: loop header
LB: loop body
LE: loop exit
PB: predicated region body
PF: predicated region fallthrough
CT: control target
= control target key end

     0   :  { %s22_s0 = inlined_call_operand.vmem [shape: f32[16], index: 0, kind: input, shape index: {}]   ;;  %s23_s1 = inlined_call_operand.vmem [shape: f32[8,16], index: 1, kind: output, shape index: {}]  }
   0x1   :  { %v4_v0 = vld [vmem:[%s22_s0] ss:$0 sm:$0xff] }
   0x2   :  { %5 = vst [vmem:[%s23_s1] sm:$0xff] %v4_v0 }

// kernel: tile.79
= control target key start
LH: loop header
LB: loop body
LE: loop exit
PB: predicated region body
PF: predicated region fallthrough
CT: control target
= control target key end

     0   :  { %s67_s10 = smov 112   ;;  %s68_s11 = smov 80   ;;  %vm3_vm0 = vcmask 130048   ;;  %vm9_vm1 = vcmask 1048448   ;;  %vm15_vm2 = vcmask 917248   ;;  %vm21_vm3 = vcmask 786048   ;;  %s111_s0 = inlined_call_operand.vmem [shape: f32[8,16], index: 0, kind: input, shape index: {}]   ;;  %s112_s1 = inlined_call_operand.vmem [shape: f32[1,128], index: 1, kind: output, shape index: {}]  }
   0x1   :  { %v53_v0 = vld [vmem:[%s111_s0 + $0x7] sm:$0x1]   ;;  %v55_v1 = vld [vmem:[%s111_s0 + $0x5] sm:$0x1]   ;;  %v57_v2 = vld [vmem:[%s111_s0 + $0x3] sm:$0x1]  }
   0x2   :  { %7 = vrot.lane.b32.xlu0 %v53_v0, %s67_s10  ;;  %19 = vrot.lane.b32.xlu1 %v55_v1, %s68_s11  ;;  %s69_s14 = smov 48   ;;  %v54_v3 = vld [vmem:[%s111_s0 + $0x6] sm:$0x1]   ;;  %v56_v4 = vld [vmem:[%s111_s0 + $0x4] sm:$0x1]   ;;  %s70_s21 = smov 96  }
   0x3   :  { %31 = vrot.lane.b32.xlu2 %v57_v2, %s69_s14  ;;  %v58_v5 = vld [vmem:[%s111_s0 + $0x2] sm:$0x1]   ;;  %s71_s22 = smov 64   ;;  %s72_s23 = smov 32   ;;  %v59_v6 = vld [vmem:[%s111_s0 + $0x1] sm:$0x1]  }
   0x4   :  { %s73_s26 = smov 16   ;;  %v2_v7 = vld [vmem:[%s111_s0] sm:$0x1]   ;;  %vm27_vm4 = vcmask 654848   ;;  %vm33_vm5 = vcmask 523648   ;;  %vm39_vm6 = vcmask 392448  }
   0x5   :  { %4 = vst.msk [vmem:[#allocation0] sm:$0x1] %vm3_vm0, %v2_v7   ;;  %vm45_vm7 = vcmask 261248  }
   0xa   :  { %13 = vrot.lane.b32.xlu0 %v54_v3, %s70_s21  ;;  %25 = vrot.lane.b32.xlu1 %v56_v4, %s71_s22 }
   0xb   :  { %37 = vrot.lane.b32.xlu2 %v58_v5, %s72_s23 }
  0x12   :  { %43 = vrot.lane.b32.xlu0 %v59_v6, %s73_s26 }
  0x5d   :  { %v32_v8 = vpop.permute.xlu2 %31  }
  0x65   :  { %v38_v9 = vpop.permute.xlu2 %37  }
  0x74   :  { %v8_v10 = vpop.permute.xlu0 %7   ;;  %v20_v11 = vpop.permute.xlu1 %19  }
  0x75   :  { %10 = vst.msk [vmem:[#allocation0] sm:$0x1] %vm9_vm1, %v8_v10  }
  0x7c   :  { %v14_v12 = vpop.permute.xlu0 %13   ;;  %v26_v13 = vpop.permute.xlu1 %25  }
  0x7d   :  { %16 = vst.msk [vmem:[#allocation0] sm:$0x1] %vm15_vm2, %v14_v12  }
  0x7e   :  { %22 = vst.msk [vmem:[#allocation0] sm:$0x1] %vm21_vm3, %v20_v11  }
  0x7f   :  { %28 = vst.msk [vmem:[#allocation0] sm:$0x1] %vm27_vm4, %v26_v13  }
  0x80   :  { %34 = vst.msk [vmem:[#allocation0] sm:$0x1] %vm33_vm5, %v32_v8  }
  0x81   :  { %40 = vst.msk [vmem:[#allocation0] sm:$0x1] %vm39_vm6, %v38_v9  }
  0x84   :  { %v44_v14 = vpop.permute.xlu0 %43  }
  0x85   :  { %46 = vst.msk [vmem:[#allocation0] sm:$0x1] %vm45_vm7, %v44_v14  }
  0x8c   :  { %v49_v15 = vld [vmem:[#allocation0] sm:$0x1] }
  0x8d   :  { %52 = vst [vmem:[%s112_s1] sm:$0x1] %v49_v15 }

// kernel: tile.88
= control target key start
LH: loop header
LB: loop body
LE: loop exit
PB: predicated region body
PF: predicated region fallthrough
CT: control target
= control target key end

     0   :  { %s22_s0 = inlined_call_operand.vmem [shape: f32[32], index: 0, kind: input, shape index: {}]   ;;  %s23_s1 = inlined_call_operand.vmem [shape: f32[4,32], index: 1, kind: output, shape index: {}]  }
   0x1   :  { %v4_v0 = vld [vmem:[%s22_s0] ss:$0 sm:$0xff] }
   0x2   :  { %5 = vst [vmem:[%s23_s1] sm:$0xf] %v4_v0 }

// kernel: tile.89
= control target key start
LH: loop header
LB: loop body
LE: loop exit
PB: predicated region body
PF: predicated region fallthrough
CT: control target
= control target key end

     0   :  { %s37_s8 = smov 32   ;;  %s38_s9 = smov 64   ;;  %vm7_vm0 = vcmask 261120   ;;  %vm13_vm1 = vcmask 1048320   ;;  %vm19_vm2 = vcmask 785920   ;;  %vm25_vm3 = vcmask 523520   ;;  %s55_s0 = inlined_call_operand.vmem [shape: f32[4,32], index: 0, kind: input, shape index: {}]   ;;  %s56_s1 = inlined_call_operand.vmem [shape: f32[1,128], index: 1, kind: output, shape index: {}]  }
   0x1   :  { %v4_v0 = vld [vmem:[%s55_s0] sm:$0xf]  ;;  %s36_s0 = smov 96  }
   0x2   :  { %5 = vst [vmem:[#allocation1] sm:$0xf] %v4_v0 }
   0x9   :  { %v10_v1 = vld [vmem:[#allocation1 + $0x3] sm:$0x1]   ;;  %v22_v2 = vld [vmem:[#allocation1 + $0x1] sm:$0x1]   ;;  %v16_v3 = vld [vmem:[#allocation1 + $0x2] sm:$0x1]  }
   0xa   :  { %11 = vrot.lane.b32.xlu0 %v10_v1, %s36_s0  ;;  %23 = vrot.lane.b32.xlu1 %v22_v2, %s37_s8  ;;  %v6_v4 = vld [vmem:[#allocation1] sm:$0x1]  }
   0xb   :  { %8 = vst.msk [vmem:[#allocation0] sm:$0x1] %vm7_vm0, %v6_v4  }
  0x12   :  { %17 = vrot.lane.b32.xlu0 %v16_v3, %s38_s9 }
  0x7c   :  { %v12_v5 = vpop.permute.xlu0 %11   ;;  %v24_v6 = vpop.permute.xlu1 %23  }
  0x7d   :  { %14 = vst.msk [vmem:[#allocation0] sm:$0x1] %vm13_vm1, %v12_v5  }
  0x84   :  { %v18_v7 = vpop.permute.xlu0 %17  }
  0x85   :  { %20 = vst.msk [vmem:[#allocation0] sm:$0x1] %vm19_vm2, %v18_v7  }
  0x86   :  { %26 = vst.msk [vmem:[#allocation0] sm:$0x1] %vm25_vm3, %v24_v6  }
  0x8d   :  { %v29_v8 = vld [vmem:[#allocation0] sm:$0x1] }
  0x8e   :  { %32 = vst [vmem:[%s56_s1] sm:$0x1] %v29_v8 }

// kernel: forward.7
= control target key start
LH: loop header
LB: loop body
LE: loop exit
PB: predicated region body
PF: predicated region fallthrough
CT: control target
= control target key end

     0   :  { %vm77_vm0 = vcmask 130048   ;;  %vm159_vm1 = vcmask 523264   ;;  %s1575_s0 = inlined_call_operand.vmem [shape: f32[16,64], index: 0, kind: input, shape index: {}]   ;;  %s1576_s1 = inlined_call_operand.vmem [shape: bf16[16,16], index: 1, kind: input, shape index: {}]   ;;  %s1577_s2 = inlined_call_operand.vmem [shape: bf16[16,16], index: 2, kind: input, shape index: {}]   ;;  %s1578_s4 = inlined_call_operand.vmem [shape: bf16[64,128], index: 4, kind: input, shape index: {}]   ;;  %s1579_s3 = inlined_call_operand.vmem [shape: bf16[64,128], index: 3, kind: input, shape index: {}]   ;;  %s1580_s5 = inlined_call_operand.vmem [shape: bf16[64,128], index: 5, kind: input, shape index: {}]   ;;  %s1581_s8 = inlined_call_operand.vmem [shape: bf16[128,128], index: 8, kind: input, shape index: {}]   ;;  %s1582_s6 = inlined_call_operand.vmem [shape: f32[1,128], index: 6, kind: input, shape index: {}]   ;;  %s1583_s7 = inlined_call_operand.vmem [shape: bf16[128,128], index: 7, kind: input, shape index: {}]   ;;  %s1584_s9 = inlined_call_operand.vmem [shape: bf16[128,128], index: 9, kind: input, shape index: {}]   ;;  %s1585_s10 = inlined_call_operand.vmem [shape: f32[1,128], index: 10, kind: input, shape index: {}]   ;;  %s1586_s13 = inlined_call_operand.vmem [shape: f32[128,16], index: 13, kind: input, shape index: {}]   ;;  %s1587_s14 = inlined_call_operand.vmem [shape: f32[16,128], index: 14, kind: input, shape index: {}]   ;;  %s1588_s15 = inlined_call_operand.vmem [shape: bf16[128,64], index: 15, kind: input, shape index: {}]   ;;  %s1589_s16 = inlined_call_operand.vmem [shape: bf16[128,64], index: 16, kind: input, shape index: {}]   ;;  %s1590_s11 = inlined_call_operand.vmem [shape: f32[1,16], index: 11, kind: input, shape index: {}]   ;;  %s1591_s12 = inlined_call_operand.vmem [shape: f32[1,16], index: 12, kind: input, shape index: {}]   ;;  %s1592_s19 = inlined_call_operand.vmem [shape: f32[16,128], index: 19, kind: output, shape index: {0}]   ;;  %s1593_s18 = inlined_call_operand.vmem [shape: bf16[8,16], index: 18, kind: input, shape index: {}]   ;;  %s1594_s17 = inlined_call_operand.vmem [shape: bf16[8,16], index: 17, kind: input, shape index: {}]   ;;  %s1595_s20 = inlined_call_operand.vmem [shape: f32[8,64], index: 20, kind: output, shape index: {1}]  }
   0x1   :  { %1599 = sst [smem:[#allocation2_spill]] %s1575_s0  ;;  %v1144_v7 = vld [vmem:[%s1580_s5 + $0x18] sm:$0xff]  ;;  %v1143_v12 = vld [vmem:[%s1580_s5 + $0x10] sm:$0xff]  ;;  %v1142_v14 = vld [vmem:[%s1580_s5 + $0x8] sm:$0xff] }
   0x2   :  { %1600 = sst [smem:[#allocation3_spill]] %s1576_s1  ;;  %v1141_v16 = vld [vmem:[%s1580_s5] sm:$0xff]  ;;  %v1160_v17 = vld [vmem:[%s1581_s8 + $0x38] sm:$0xff]  ;;  %v1159_v24 = vld [vmem:[%s1581_s8 + $0x30] sm:$0xff] }
   0x3   :  { %1601 = sst [smem:[#allocation4_spill]] %s1577_s2  ;;  %v1158_v25 = vld [vmem:[%s1581_s8 + $0x28] sm:$0xff]  ;;  %v1157_v26 = vld [vmem:[%s1581_s8 + $0x20] sm:$0xff]  ;;  %v1156_v27 = vld [vmem:[%s1581_s8 + $0x18] sm:$0xff] }
   0x4   :  { %1602 = sst [smem:[#allocation5_spill]] %s1578_s4  ;;  %v1155_v28 = vld [vmem:[%s1581_s8 + $0x10] sm:$0xff]  ;;  %v1154_v29 = vld [vmem:[%s1581_s8 + $0x8] sm:$0xff]  ;;  %v1153_v30 = vld [vmem:[%s1581_s8] sm:$0xff] }
   0x5   :  { %1603 = sst [smem:[#allocation6_spill]] %s1579_s3  ;;  %v1152_v31 = vld [vmem:[%s1583_s7 + $0x38] sm:$0xff]  ;;  %v1151_v32 = vld [vmem:[%s1583_s7 + $0x30] sm:$0xff]  ;;  %v1150_v33 = vld [vmem:[%s1583_s7 + $0x28] sm:$0xff] }
   0x6   :  { %s1604_s23 = sld [smem:[#allocation2_spill]]  ;;  %v1149_v37 = vld [vmem:[%s1583_s7 + $0x20] sm:$0xff]  ;;  %v1148_v39 = vld [vmem:[%s1583_s7 + $0x18] sm:$0xff]  ;;  %v1167_v53 = vld [vmem:[%s1584_s9 + $0x30] sm:$0xff] }
   0x7   :  { %s1605_s26 = sld [smem:[#allocation3_spill]]  ;;  %v1185_v41 = vld [vmem:[%s1582_s6] ss:$0 sm:$0xff]  ;;  %v1168_v51 = vld [vmem:[%s1584_s9 + $0x38] sm:$0xff]  ;;  %v1166_v54 = vld [vmem:[%s1584_s9 + $0x28] sm:$0xff] }
   0x8   :  { %s1606_s3 = sld [smem:[#allocation5_spill]]  ;;  %v1165_v55 = vld [vmem:[%s1584_s9 + $0x20] sm:$0xff]  ;;  %v1147_v56 = vld [vmem:[%s1583_s7 + $0x10] sm:$0xff]  ;;  %v1164_v57 = vld [vmem:[%s1584_s9 + $0x18] sm:$0xff] }
   0x9   :  { %s1607_s0 = sld [smem:[#allocation4_spill]]  ;;  %v1146_v58 = vld [vmem:[%s1583_s7 + $0x8] sm:$0xff]  ;;  %v1163_v59 = vld [vmem:[%s1584_s9 + $0x10] sm:$0xff]  ;;  %v1145_v60 = vld [vmem:[%s1583_s7] sm:$0xff] }
   0xa   :  { %s1608_s22 = sld [smem:[#allocation6_spill]]  ;;  %v1162_v61 = vld [vmem:[%s1584_s9 + $0x8] sm:$0xff]  ;;  %v1161_v62 = vld [vmem:[%s1584_s9] sm:$0xff] }
   0xc   :  { %v69_v0 = vld [vmem:[%s1604_s23] sm:$0xff]  ;;  %v70_v1 = vld [vmem:[%s1604_s23 + $0x8] sm:$0xff] }
   0xd   :  { %v71_v2 = vpack.c.bf16 %v70_v1, %v69_v0  ;;  %v1303_v3 = vld [vmem:[%s1605_s26] sm:$0xff] }
   0xe   :  { %v1140_v4 = vld [vmem:[%s1606_s3 + $0x18] sm:$0xff]  ;;  %v1139_v8 = vld [vmem:[%s1606_s3 + $0x10] sm:$0xff]  ;;  %v1138_v9 = vld [vmem:[%s1606_s3 + $0x8] sm:$0xff] }
   0xf   :  { %v1311_v5 = vld [vmem:[%s1607_s0] sm:$0xff]  ;;  %88 = vmatpush.bf16.msra.mxu0 %v71_v2  ;;  %111 = vmatpush.bf16.msra.mxu1 %v71_v2 }
  0x10   :  { %v1136_v6 = vld [vmem:[%s1608_s22 + $0x18] sm:$0xff]  ;;  %167 = vmatpush.bf16.msra.mxu2 %v1140_v4  ;;  %v1137_v10 = vld [vmem:[%s1606_s3] sm:$0xff]  ;;  %v1135_v11 = vld [vmem:[%s1608_s22 + $0x10] sm:$0xff] }
  0x11   :  { %208 = vmatpush.bf16.msra.mxu3 %v1136_v6  ;;  %v1134_v13 = vld [vmem:[%s1608_s22 + $0x8] sm:$0xff]  ;;  %v1133_v15 = vld [vmem:[%s1608_s22] sm:$0xff]  ;;  %v573_v6 = vld [vmem:[%s1586_s13 + $0x70] sm:$0xff] }
  0x12   :  { %908 = vmatmul.msk.bf16.vlgmr.msra.gmra.mxu0 %vm77_vm0, %v1303_v3  ;;  %913 = vmatmul.msk.bf16.vlgmr.msra.gmra.mxu1 %vm77_vm0, %v1311_v5 }
  0x13   :  { %257 = vmatpush.bf16.msrb.mxu0 %v1144_v7  ;;  %v572_v7 = vld [vmem:[%s1586_s13 + $0x68] sm:$0xff] }
  0x14   :  { %168 = vmatpush.bf16.msra.mxu2 %v1139_v8  ;;  %v571_v8 = vld [vmem:[%s1586_s13 + $0x60] sm:$0xff] }
  0x15   :  { %209 = vmatpush.bf16.msra.mxu3 %v1135_v11  ;;  %v568_v11 = vld [vmem:[%s1586_s13 + $0x48] sm:$0xff] }
  0x17   :  { %258 = vmatpush.bf16.msrb.mxu0 %v1143_v12  ;;  %v567_v12 = vld [vmem:[%s1586_s13 + $0x40] sm:$0xff] }
  0x18   :  { %169 = vmatpush.bf16.msra.mxu2 %v1138_v9  ;;  %v570_v9 = vld [vmem:[%s1586_s13 + $0x58] sm:$0xff] }
  0x19   :  { %210 = vmatpush.bf16.msra.mxu3 %v1134_v13  ;;  %v566_v13 = vld [vmem:[%s1586_s13 + $0x38] sm:$0xff] }
  0x1b   :  { %259 = vmatpush.bf16.msrb.mxu0 %v1142_v14  ;;  %v565_v14 = vld [vmem:[%s1586_s13 + $0x30] sm:$0xff] }
  0x1c   :  { %170 = vmatpush.bf16.msra.mxu2 %v1137_v10  ;;  %v569_v10 = vld [vmem:[%s1586_s13 + $0x50] sm:$0xff] }
  0x1d   :  { %211 = vmatpush.bf16.msra.mxu3 %v1133_v15  ;;  %v564_v15 = vld [vmem:[%s1586_s13 + $0x28] sm:$0xff] }
  0x1f   :  { %930 = vmatmul.msk.bf16.vlgmr.msra.gmra.mxu2 %vm159_vm1, %v71_v2  ;;  %260 = vmatpush.bf16.msrb.mxu0 %v1141_v16  ;;  %v563_v16 = vld [vmem:[%s1586_s13 + $0x20] sm:$0xff] }
  0x21   :  { %388 = vmatpush.bf16.msrb.mxu3 %v1160_v17  ;;  %v562_v17 = vld [vmem:[%s1586_s13 + $0x18] sm:$0xff] }
  0x23   :  { %450 = vmatpush.bf16.msra.mxu0 %v1152_v31 }
  0x25   :  { %389 = vmatpush.bf16.msrb.mxu3 %v1159_v24 }
  0x27   :  { %451 = vmatpush.bf16.msra.mxu0 %v1151_v32 }
  0x29   :  { %390 = vmatpush.bf16.msrb.mxu3 %v1158_v25 }
  0x2b   :  { %452 = vmatpush.bf16.msra.mxu0 %v1150_v33 }
  0x2d   :  { %391 = vmatpush.bf16.msrb.mxu3 %v1157_v26  ;;  %v1186_v26 = vld [vmem:[%s1585_s10] ss:$0 sm:$0xff] }
  0x2f   :  { %453 = vmatpush.bf16.msra.mxu0 %v1149_v37 }
  0x31   :  { %392 = vmatpush.bf16.msrb.mxu3 %v1156_v27 }
  0x33   :  { %454 = vmatpush.bf16.msra.mxu0 %v1148_v39 }
  0x35   :  { %393 = vmatpush.bf16.msrb.mxu3 %v1155_v28 }
  0x37   :  { %455 = vmatpush.bf16.msra.mxu0 %v1147_v56 }
  0x39   :  { %394 = vmatpush.bf16.msrb.mxu3 %v1154_v29 }
  0x3b   :  { %456 = vmatpush.bf16.msra.mxu0 %v1146_v58 }
  0x3d   :  { %395 = vmatpush.bf16.msrb.mxu3 %v1153_v30 }
  0x3f   :  { %457 = vmatpush.bf16.msra.mxu0 %v1145_v60  ;;  %v1176_v60 = vld [vmem:[%s1588_s15 + $0x38] sm:$0xff] }
  0x8f   :  { %v90_v18 = vpop.f32.mrf.mxu0  ;;  %v113_v19 = vpop.f32.mrf.mxu1 }
  0x97   :  { %v92_v20 = vpop.f32.mrf.mxu0  ;;  %v115_v21 = vpop.f32.mrf.mxu1 }
  0x98   :  { %v95_v22 = vpack.c.bf16 %v92_v20, %v90_v18  ;;  %v118_v23 = vpack.c.bf16 %v115_v21, %v113_v19  ;;  %v561_v18 = vld [vmem:[%s1586_s13 + $0x10] sm:$0xff]  ;;  %v560_v19 = vld [vmem:[%s1586_s13 + $0x8] sm:$0xff]  ;;  %v559_v21 = vld [vmem:[%s1586_s13] sm:$0xff] }
  0x9a   :  { %947 = vmatmul.msk.bf16.vlgmr.msra.gmra.mxu3 %vm159_vm1, %v95_v22  ;;  %964 = vmatmul.msk.bf16.vlgmr.msrb.gmra.mxu0 %vm159_vm1, %v118_v23 }
  0xa2   :  { %v172_v34 = vpop.f32.mrf.mxu2 }
  0xaa   :  { %v174_v42 = vpop.f32.mrf.mxu2 }
 0x117   :  { %v262_v35 = vpop.f32.mrf.mxu0 }
 0x11d   :  { %v213_v36 = vpop.f32.mrf.mxu3 }
 0x11e   :  { %v214_v38 = vadd.f32 %v213_v36, %v172_v34 }
 0x11f   :  { %v264_v45 = vpop.f32.mrf.mxu0 }
 0x120   :  { %v267_v40 = vadd.f32 %v262_v35, %v214_v38 }
 0x122   :  { %v273_v46 = vadd.f32 %v1185_v41, %v267_v40 }
 0x124   :  { %v275_v49 = vmax.f32 %v273_v46, 0.0 }
 0x125   :  { %v215_v43 = vpop.f32.mrf.mxu3 }
 0x126   :  { %v216_v44 = vadd.f32 %v215_v43, %v174_v42 }
 0x128   :  { %v268_v47 = vadd.f32 %v264_v45, %v216_v44 }
 0x12a   :  { %v274_v48 = vadd.f32 %v1185_v41, %v268_v47 }
 0x12c   :  { %v276_v50 = vmax.f32 %v274_v48, 0.0 }
 0x12e   :  { %v277_v52 = vpack.c.bf16 %v276_v50, %v275_v49 }
 0x130   :  { %285 = vmatpush.bf16.msrb.mxu1 %v277_v52  ;;  %300 = vmatpush.bf16.msrb.mxu2 %v277_v52 }
 0x131   :  { %396 = vmatmul.bf16.vlgmr.msrb.gmra.mxu3 %v277_v52  ;;  %v645_v52 = vld [vmem:[%s1587_s14 + $0x8] sm:$0xff] }
 0x133   :  { %965 = vmatmul.msk.bf16.vlgmr.msrb.gmra.mxu1 %vm77_vm0, %v1303_v3  ;;  %966 = vmatmul.msk.bf16.vlgmr.msrb.gmra.mxu2 %vm77_vm0, %v1311_v5  ;;  %v574_v5 = vld [vmem:[%s1586_s13 + $0x78] sm:$0xff] }
 0x134   :  { %528 = vmatpush.bf16.msra.mxu1 %v1168_v51  ;;  %575 = vmatpush.msra.mxu2 %v574_v5 }
 0x135   :  { %604 = vmatpush.msra.mxu3 %v574_v5  ;;  %v1181_v5 = vld [vmem:[%s1589_s16 + $0x20] sm:$0xff] }
 0x136   :  { %576 = vmatpush.msra.mxu2 %v573_v6 }
 0x137   :  { %605 = vmatpush.msra.mxu3 %v573_v6 }
 0x138   :  { %529 = vmatpush.bf16.msra.mxu1 %v1167_v53  ;;  %577 = vmatpush.msra.mxu2 %v572_v7  ;;  %v644_v53 = vld [vmem:[%s1587_s14] sm:$0xff] }
 0x139   :  { %606 = vmatpush.msra.mxu3 %v572_v7 }
 0x13a   :  { %578 = vmatpush.msra.mxu2 %v571_v8 }
 0x13b   :  { %607 = vmatpush.msra.mxu3 %v571_v8 }
 0x13c   :  { %530 = vmatpush.bf16.msra.mxu1 %v1166_v54  ;;  %579 = vmatpush.msra.mxu2 %v570_v9 }
 0x13d   :  { %608 = vmatpush.msra.mxu3 %v570_v9 }
 0x13e   :  { %580 = vmatpush.msra.mxu2 %v569_v10 }
 0x13f   :  { %609 = vmatpush.msra.mxu3 %v569_v10  ;;  %v628_v10 = vld [vmem:[%s1590_s11] sm:$0x1] }
 0x140   :  { %531 = vmatpush.bf16.msra.mxu1 %v1165_v55  ;;  %581 = vmatpush.msra.mxu2 %v568_v11 }
 0x141   :  { %610 = vmatpush.msra.mxu3 %v568_v11 }
 0x142   :  { %582 = vmatpush.msra.mxu2 %v567_v12 }
 0x143   :  { %611 = vmatpush.msra.mxu3 %v567_v12 }
 0x144   :  { %532 = vmatpush.bf16.msra.mxu1 %v1164_v57  ;;  %583 = vmatpush.msra.mxu2 %v566_v13 }
 0x145   :  { %612 = vmatpush.msra.mxu3 %v566_v13 }
 0x146   :  { %584 = vmatpush.msra.mxu2 %v565_v14 }
 0x147   :  { %613 = vmatpush.msra.mxu3 %v565_v14 }
 0x148   :  { %533 = vmatpush.bf16.msra.mxu1 %v1163_v59  ;;  %585 = vmatpush.msra.mxu2 %v564_v15 }
 0x149   :  { %614 = vmatpush.msra.mxu3 %v564_v15  ;;  %v641_v15 = vld [vmem:[%s1591_s12] sm:$0x1] }
 0x14a   :  { %586 = vmatpush.msra.mxu2 %v563_v16 }
 0x14b   :  { %615 = vmatpush.msra.mxu3 %v563_v16 }
 0x14c   :  { %534 = vmatpush.bf16.msra.mxu1 %v1162_v61  ;;  %587 = vmatpush.msra.mxu2 %v562_v17  ;;  %v1184_v61 = vld [vmem:[%s1589_s16 + $0x38] sm:$0xff] }
 0x14d   :  { %616 = vmatpush.msra.mxu3 %v562_v17  ;;  %843 = vmatpush.bf16.msrb.mxu0 %v1184_v61  ;;  %v1172_v17 = vld [vmem:[%s1588_s15 + $0x18] sm:$0xff] }
 0x14e   :  { %588 = vmatpush.msra.mxu2 %v561_v18 }
 0x14f   :  { %617 = vmatpush.msra.mxu3 %v561_v18  ;;  %v1180_v18 = vld [vmem:[%s1589_s16 + $0x18] sm:$0xff] }
 0x150   :  { %535 = vmatpush.bf16.msra.mxu1 %v1161_v62  ;;  %589 = vmatpush.msra.mxu2 %v560_v19 }
 0x151   :  { %618 = vmatpush.msra.mxu3 %v560_v19  ;;  %v1171_v19 = vld [vmem:[%s1588_s15 + $0x10] sm:$0xff] }
 0x152   :  { %590 = vmatpush.msra.mxu2 %v559_v21 }
 0x153   :  { %619 = vmatpush.msra.mxu3 %v559_v21  ;;  %v1170_v21 = vld [vmem:[%s1588_s15 + $0x8] sm:$0xff] }
 0x154   :  { %663 = vmatpush.msrb.mxu1 %v645_v52  ;;  %765 = vmatpush.bf16.msrb.mxu2 %v1176_v60 }
 0x156   :  { %664 = vmatpush.msrb.mxu1 %v644_v53 }
 0x1b0   :  { %v287_v63 = vpop.f32.mrf.mxu1 }
 0x1b4   :  { %v397_v22 = vpop.f32.mrf.mxu3 }
 0x1b6   :  { %v302_v0 = vpop.f32.mrf.mxu2 }
 0x1b8   :  { %v289_v1 = vpop.f32.mrf.mxu1 }
 0x1b9   :  { %v292_v2 = vpack.c.bf16 %v289_v1, %v287_v63  ;;  %v1175_v63 = vld [vmem:[%s1588_s15 + $0x30] sm:$0xff]  ;;  %v1174_v1 = vld [vmem:[%s1588_s15 + $0x28] sm:$0xff] }
 0x1ba   :  { %766 = vmatpush.bf16.msrb.mxu2 %v1175_v63 }
 0x1bb   :  { %458 = vmatmul.bf16.vlgmr.msra.gmra.mxu0 %v292_v2  ;;  %v1182_v2 = vld [vmem:[%s1589_s16 + $0x28] sm:$0xff] }
 0x1bc   :  { %v399_v28 = vpop.f32.mrf.mxu3 }
 0x1be   :  { %v304_v3 = vpop.f32.mrf.mxu2  ;;  %767 = vmatpush.bf16.msrb.mxu2 %v1174_v1 }
 0x1bf   :  { %v307_v4 = vpack.c.bf16 %v304_v3, %v302_v0  ;;  %v1183_v0 = vld [vmem:[%s1589_s16 + $0x30] sm:$0xff] }
 0x1c0   :  { %844 = vmatpush.bf16.msrb.mxu0 %v1183_v0 }
 0x1c1   :  { %536 = vmatmul.bf16.vlgmr.msra.gmra.mxu1 %v307_v4  ;;  %v1173_v4 = vld [vmem:[%s1588_s15 + $0x20] sm:$0xff] }
 0x1c2   :  { %686 = vmatpush.msra.mxu1 %v645_v52  ;;  %768 = vmatpush.bf16.msrb.mxu2 %v1173_v4 }
 0x1c4   :  { %687 = vmatpush.msra.mxu1 %v644_v53  ;;  %845 = vmatpush.bf16.msrb.mxu0 %v1182_v2 }
 0x1c6   :  { %769 = vmatpush.bf16.msrb.mxu2 %v1172_v17 }
 0x1c8   :  { %846 = vmatpush.bf16.msrb.mxu0 %v1181_v5 }
 0x1ca   :  { %770 = vmatpush.bf16.msrb.mxu2 %v1171_v19 }
 0x1cc   :  { %847 = vmatpush.bf16.msrb.mxu0 %v1180_v18 }
 0x1ce   :  { %771 = vmatpush.bf16.msrb.mxu2 %v1170_v21 }
 0x238   :  { %v459_v20 = vpop.f32.mrf.mxu0 }
 0x239   :  { %v460_v24 = vadd.f32 %v459_v20, %v397_v22  ;;  %v1179_v20 = vld [vmem:[%s1589_s16 + $0x10] sm:$0xff]  ;;  %v1178_v22 = vld [vmem:[%s1589_s16 + $0x8] sm:$0xff] }
 0x23a   :  { %848 = vmatpush.bf16.msrb.mxu0 %v1179_v20 }
 0x23e   :  { %v537_v23 = vpop.f32.mrf.mxu1  ;;  %849 = vmatpush.bf16.msrb.mxu0 %v1178_v22 }
 0x23f   :  { %v542_v25 = vadd.f32 %v537_v23, %v460_v24  ;;  %v1169_v23 = vld [vmem:[%s1588_s15] sm:$0xff] }
 0x240   :  { %v461_v27 = vpop.f32.mrf.mxu0  ;;  %v1177_v24 = vld [vmem:[%s1589_s16] sm:$0xff]  ;;  %772 = vmatpush.bf16.msrb.mxu2 %v1169_v23 }
 0x241   :  { %v548_v29 = vadd.f32 %v1186_v26, %v542_v25  ;;  %v462_v30 = vadd.f32 %v461_v27, %v399_v28 }
 0x242   :  { %850 = vmatpush.bf16.msrb.mxu0 %v1177_v24 }
 0x243   :  { %v1483_v33 = vmax.f32 %v548_v29, 0.0 }
 0x245   :  { %v595_v36 = vmul.f32 %v1483_v33, %v1483_v33 }
 0x246   :  { %v539_v31 = vpop.f32.mrf.mxu1 }
 0x247   :  { %v543_v32 = vadd.f32 %v539_v31, %v462_v30 }
 0x249   :  { %v549_v34 = vadd.f32 %v1186_v26, %v543_v32 }
 0x24b   :  { %v1485_v35 = vmax.f32 %v549_v34, 0.0 }
 0x24d   :  { %v552_v37 = vadd.f32 %v1485_v35, %v1483_v33  ;;  %v596_v38 = vmul.f32 %v1485_v35, %v1485_v35 }
 0x24f   :  { %v553_v39 = vrot.slane %v552_v37, 4  ;;  %v597_v40 = vadd.f32 %v596_v38, %v595_v36 }
 0x251   :  { %v554_v41 = vadd.f32 %v553_v39, %v552_v37  ;;  %v598_v42 = vrot.slane %v597_v40, 4 }
 0x253   :  { %v555_v43 = vrot.slane %v554_v41, 2  ;;  %v599_v44 = vadd.f32 %v598_v42, %v597_v40  ;;  %v860_v42 = vld [vmem:[%s1594_s17] sm:$0xf] }
 0x255   :  { %v556_v45 = vadd.f32 %v555_v43, %v554_v41  ;;  %v600_v46 = vrot.slane %v599_v44, 2  ;;  %v877_v41 = vld [vmem:[%s1593_s18] sm:$0xf] }
 0x257   :  { %v557_v47 = vrot.slane %v556_v45, 1  ;;  %v601_v48 = vadd.f32 %v600_v46, %v599_v44 }
 0x259   :  { %v558_v49 = vadd.f32 %v557_v47, %v556_v45  ;;  %v602_v50 = vrot.slane %v601_v48, 1 }
 0x25b   :  { %591 = vmatmul.f32.vlgmr.msra.gmra.mxu2 %v558_v49  ;;  %v603_v51 = vadd.f32 %v602_v50, %v601_v48 }
 0x25d   :  { %620 = vmatmul.f32.vlgmr.msra.gmra.mxu3 %v603_v51 }
 0x2de   :  { %v592_v54 = vpop.f32.mrf.mxu2 }
 0x2df   :  { %v624_v55 = vmul.f32 0.0078125, %v592_v54 }
 0x2e0   :  { %v621_v56 = vpop.f32.mrf.mxu3 }
 0x2e1   :  { %v626_v57 = vmul.f32 %v624_v55, %v624_v55  ;;  %v625_v58 = vmul.f32 0.0078125, %v621_v56 }
 0x2e3   :  { %v627_v59 = vsub.f32 %v625_v58, %v626_v57 }
 0x2e5   :  { %v629_v62 = vadd.f32 1e-05, %v627_v59 }
 0x2e7   :  { %1187 = vrsqrt.f32 %v629_v62  ;;  %vm636_vm3 = vweird.f32 %v629_v62 }
 0x2ed   :  { %v1188_v3 = vpop.eup %1187 }
 0x2ee   :  { %v631_v6 = vmul.f32 %v1188_v3, %v629_v62  ;;  %vm637_vm2 = vweird.f32 %v1188_v3 }
 0x2ef   :  { %vm638_vm4 = vmor %vm636_vm3, %vm637_vm2 }
 0x2f0   :  { %v632_v7 = vmul.f32 %v1188_v3, %v631_v6 }
 0x2f2   :  { %v633_v8 = vmul.f32 0.5, %v632_v7 }
 0x2f4   :  { %v634_v9 = vsub.f32 1.5, %v633_v8 }
 0x2f6   :  { %v635_v11 = vmul.f32 %v1188_v3, %v634_v9 }
 0x2f8   :  { %v639_v12 = vsel %vm638_vm4, %v1188_v3, %v635_v11 }
 0x2f9   :  { %v640_v13 = vmul.f32 %v639_v12, %v628_v10 }
 0x2fb   :  { %1063 = vmatmul.msk.f32.vlgmr.msrb.gmra.mxu1 %vm77_vm0, %v640_v13  ;;  %v642_v14 = vmul.f32 %v640_v13, %v624_v55 }
 0x2fd   :  { %v643_v16 = vsub.f32 %v641_v15, %v642_v14 }
 0x303   :  { %1064 = vmatmul.msk.f32.vlgmr.msra.gmra.mxu1 %vm77_vm0, %v643_v16 }
 0x378   :  { %v666_v25 = vpop.f32.mrf.mxu1 }
 0x379   :  { %v692_v26 = vperm.slane %v666_v25, 0 }
 0x37b   :  { %v693_v28 = vmul.f32 %v692_v26, %v1483_v33  ;;  %v694_v29 = vmul.f32 %v692_v26, %v1485_v35 }
 0x380   :  { %v689_v27 = vpop.f32.mrf.mxu1 }
 0x381   :  { %v695_v30 = vperm.slane %v689_v27, 0 }
 0x383   :  { %v696_v31 = vadd.f32 %v695_v30, %v693_v28  ;;  %v697_v32 = vadd.f32 %v695_v30, %v694_v29 }
 0x385   :  { %698 = vst [vmem:[%s1592_s19] sm:$0xff] %v696_v31  ;;  %v700_v34 = vpack.c.bf16 %v697_v32, %v696_v31 }
 0x386   :  { %699 = vst [vmem:[%s1592_s19 + $0x8] sm:$0xff] %v697_v32 }
 0x387   :  { %773 = vmatmul.bf16.vlgmr.msrb.gmra.mxu2 %v700_v34  ;;  %851 = vmatmul.bf16.vlgmr.msrb.gmra.mxu0 %v700_v34 }
 0x404   :  { %v852_v36 = vpop.f32.mrf.mxu0 }
 0x40a   :  { %v774_v37 = vpop.f32.mrf.mxu2 }
 0x40b   :  { %v857_v39 = vmax.f32 %v774_v37, %v852_v36 }
 0x40c   :  { %v854_v38 = vpop.f32.mrf.mxu0 }
 0x412   :  { %v776_v33 = vpop.f32.mrf.mxu2 }
 0x413   :  { %v858_v35 = vmax.f32 %v776_v33, %v854_v38 }
 0x415   :  { %v859_v40 = vpack.c.bf16 %v858_v35, %v857_v39 }
 0x417   :  { %871 = vmatpush.bf16.msrb.mxu1 %v859_v40  ;;  %888 = vmatpush.bf16.msrb.mxu3 %v859_v40 }
 0x41a   :  { %1130 = vmatmul.msk.bf16.vlgmr.msrb.gmra.mxu3 %vm77_vm0, %v877_v41  ;;  %1129 = vmatmul.msk.bf16.vlgmr.msrb.gmra.mxu1 %vm77_vm0, %v860_v42 }
 0x497   :  { %v873_v43 = vpop.f32.mrf.mxu1 }
 0x49d   :  { %v890_v44 = vpop.f32.mrf.mxu3 }
 0x49e   :  { %v894_v45 = vmax.f32 %v873_v43, %v890_v44 }
 0x49f   :  { %v875_v46 = vpop.f32.mrf.mxu1 }
 0x4a0   :  { %895 = vst.msk [vmem:[%s1595_s20] sm:$0xff] %vm159_vm1, %v894_v45 }
 0x4a5   :  { %v892_v47 = vpop.f32.mrf.mxu3 }

// kernel: forward.8
= control target key start
LH: loop header
LB: loop body
LE: loop exit
PB: predicated region body
PF: predicated region fallthrough
CT: control target
= control target key end

     0   :  { %vm47_vm0 = vcmask 1043456   ;;  %vm43_vm1 = vcmask 64512   ;;  %vm122_vm2 = vcmask 523264   ;;  %s900_s0 = inlined_call_operand.vmem [shape: f32[8,64], index: 0, kind: input, shape index: {}]   ;;  %s901_s4 = inlined_call_operand.vmem [shape: bf16[64,128], index: 4, kind: input, shape index: {}]   ;;  %s902_s3 = inlined_call_operand.vmem [shape: bf16[64,128], index: 3, kind: input, shape index: {}]   ;;  %s903_s5 = inlined_call_operand.vmem [shape: bf16[64,128], index: 5, kind: input, shape index: {}]   ;;  %s904_s1 = inlined_call_operand.vmem [shape: bf16[8,8], index: 1, kind: input, shape index: {}]   ;;  %s905_s2 = inlined_call_operand.vmem [shape: bf16[8,8], index: 2, kind: input, shape index: {}]   ;;  %s906_s8 = inlined_call_operand.vmem [shape: bf16[128,128], index: 8, kind: input, shape index: {}]   ;;  %s907_s6 = inlined_call_operand.vmem [shape: f32[1,128], index: 6, kind: input, shape index: {}]   ;;  %s908_s7 = inlined_call_operand.vmem [shape: bf16[128,128], index: 7, kind: input, shape index: {}]   ;;  %s909_s9 = inlined_call_operand.vmem [shape: bf16[128,128], index: 9, kind: input, shape index: {}]   ;;  %s910_s10 = inlined_call_operand.vmem [shape: f32[1,128], index: 10, kind: input, shape index: {}]   ;;  %s911_s11 = inlined_call_operand.vmem [shape: f32[8,128], index: 11, kind: output, shape index: {}]  }
   0x1   :  { %v41_v0 = vld [vmem:[%s900_s0] sm:$0xff]  ;;  %v666_v2 = vld [vmem:[%s901_s4 + $0x18] sm:$0xff]  ;;  %v665_v8 = vld [vmem:[%s901_s4 + $0x10] sm:$0xff] }
   0x2   :  { %v42_v1 = vpack.c.bf16 %v41_v0, %v41_v0  ;;  %v662_v3 = vld [vmem:[%s902_s3 + $0x18] sm:$0xff]  ;;  %v773_v6 = vld [vmem:[%s904_s1] sm:$0xf]  ;;  %v661_v9 = vld [vmem:[%s902_s3 + $0x10] sm:$0xff] }
   0x3   :  { %v670_v4 = vld [vmem:[%s903_s5 + $0x18] sm:$0xff]  ;;  %v778_v7 = vld [vmem:[%s905_s2] sm:$0xf]  ;;  %169 = vmatpush.bf16.msra.mxu3 %v662_v3  ;;  %v669_v10 = vld [vmem:[%s903_s5 + $0x10] sm:$0xff] }
   0x4   :  { %v49_v5 = vsel %vm47_vm0, %v42_v1, 0  ;;  %217 = vmatpush.bf16.msra.mxu0 %v670_v4  ;;  %v664_v11 = vld [vmem:[%s901_s4 + $0x8] sm:$0xff]  ;;  %v663_v14 = vld [vmem:[%s901_s4] sm:$0xff]  ;;  %v686_v17 = vld [vmem:[%s906_s8 + $0x38] sm:$0xff] }
   0x5   :  { %58 = vmatpush.bf16.msra.mxu2 %v49_v5  ;;  %75 = vmatpush.bf16.msra.mxu1 %v49_v5  ;;  %v660_v12 = vld [vmem:[%s902_s3 + $0x8] sm:$0xff]  ;;  %v659_v15 = vld [vmem:[%s902_s3] sm:$0xff]  ;;  %v685_v18 = vld [vmem:[%s906_s8 + $0x30] sm:$0xff] }
   0x6   :  { %v668_v13 = vld [vmem:[%s903_s5 + $0x8] sm:$0xff]  ;;  %v667_v16 = vld [vmem:[%s903_s5] sm:$0xff]  ;;  %v682_v29 = vld [vmem:[%s906_s8 + $0x18] sm:$0xff] }
   0x7   :  { %170 = vmatpush.bf16.msra.mxu3 %v661_v9  ;;  %v684_v19 = vld [vmem:[%s906_s8 + $0x28] sm:$0xff]  ;;  %v683_v20 = vld [vmem:[%s906_s8 + $0x20] sm:$0xff]  ;;  %v681_v30 = vld [vmem:[%s906_s8 + $0x10] sm:$0xff] }
   0x8   :  { %508 = vmatmul.msk.bf16.vlgmr.msra.gmra.mxu2 %vm43_vm1, %v773_v6  ;;  %509 = vmatmul.msk.bf16.vlgmr.msra.gmra.mxu1 %vm43_vm1, %v778_v7  ;;  %v680_v31 = vld [vmem:[%s906_s8 + $0x8] sm:$0xff]  ;;  %v679_v32 = vld [vmem:[%s906_s8] sm:$0xff]  ;;  %v678_v33 = vld [vmem:[%s908_s7 + $0x38] sm:$0xff] }
   0x9   :  { %129 = vmatpush.bf16.msrb.mxu2 %v666_v2  ;;  %218 = vmatpush.bf16.msra.mxu0 %v669_v10  ;;  %v677_v34 = vld [vmem:[%s908_s7 + $0x30] sm:$0xff]  ;;  %v676_v36 = vld [vmem:[%s908_s7 + $0x28] sm:$0xff]  ;;  %v675_v37 = vld [vmem:[%s908_s7 + $0x20] sm:$0xff] }
   0xa   :  { %v674_v39 = vld [vmem:[%s908_s7 + $0x18] sm:$0xff]  ;;  %v695_v42 = vld [vmem:[%s907_s6] ss:$0 sm:$0xff]  ;;  %v673_v43 = vld [vmem:[%s908_s7 + $0x10] sm:$0xff] }
   0xb   :  { %171 = vmatpush.bf16.msra.mxu3 %v660_v12  ;;  %v672_v46 = vld [vmem:[%s908_s7 + $0x8] sm:$0xff]  ;;  %v694_v50 = vld [vmem:[%s909_s9 + $0x38] sm:$0xff]  ;;  %v693_v52 = vld [vmem:[%s909_s9 + $0x30] sm:$0xff] }
   0xc   :  { %v692_v53 = vld [vmem:[%s909_s9 + $0x28] sm:$0xff]  ;;  %v691_v54 = vld [vmem:[%s909_s9 + $0x20] sm:$0xff]  ;;  %v690_v55 = vld [vmem:[%s909_s9 + $0x18] sm:$0xff] }
   0xd   :  { %130 = vmatpush.bf16.msrb.mxu2 %v665_v8  ;;  %219 = vmatpush.bf16.msra.mxu0 %v668_v13  ;;  %v689_v56 = vld [vmem:[%s909_s9 + $0x10] sm:$0xff]  ;;  %v671_v57 = vld [vmem:[%s908_s7] sm:$0xff]  ;;  %v688_v58 = vld [vmem:[%s909_s9 + $0x8] sm:$0xff] }
   0xe   :  { %v687_v59 = vld [vmem:[%s909_s9] sm:$0xff] }
   0xf   :  { %172 = vmatpush.bf16.msra.mxu3 %v659_v15 }
  0x11   :  { %131 = vmatpush.bf16.msrb.mxu2 %v664_v11  ;;  %220 = vmatpush.bf16.msra.mxu0 %v667_v16 }
  0x13   :  { %345 = vmatpush.bf16.msrb.mxu3 %v686_v17 }
  0x15   :  { %132 = vmatpush.bf16.msrb.mxu2 %v663_v14  ;;  %406 = vmatpush.bf16.msrb.mxu0 %v678_v33 }
  0x17   :  { %346 = vmatpush.bf16.msrb.mxu3 %v685_v18 }
  0x18   :  { %526 = vmatmul.msk.bf16.vlgmr.msrb.gmra.mxu2 %vm122_vm2, %v42_v1 }
  0x19   :  { %407 = vmatpush.bf16.msrb.mxu0 %v677_v34 }
  0x1b   :  { %347 = vmatpush.bf16.msrb.mxu3 %v684_v19 }
  0x1d   :  { %408 = vmatpush.bf16.msrb.mxu0 %v676_v36 }
  0x1f   :  { %348 = vmatpush.bf16.msrb.mxu3 %v683_v20 }
  0x21   :  { %409 = vmatpush.bf16.msrb.mxu0 %v675_v37 }
  0x23   :  { %349 = vmatpush.bf16.msrb.mxu3 %v682_v29 }
  0x25   :  { %410 = vmatpush.bf16.msrb.mxu0 %v674_v39 }
  0x27   :  { %350 = vmatpush.bf16.msrb.mxu3 %v681_v30 }
  0x29   :  { %411 = vmatpush.bf16.msrb.mxu0 %v673_v43 }
  0x2b   :  { %351 = vmatpush.bf16.msrb.mxu3 %v680_v31 }
  0x2d   :  { %412 = vmatpush.bf16.msrb.mxu0 %v672_v46 }
  0x2f   :  { %352 = vmatpush.bf16.msrb.mxu3 %v679_v32 }
  0x31   :  { %413 = vmatpush.bf16.msrb.mxu0 %v671_v57 }
  0x85   :  { %v77_v21 = vpop.f32.mrf.mxu1 }
  0x86   :  { %v81_v22 = vpack.c.bf16 %v77_v21, %v77_v21 }
  0x88   :  { %560 = vmatmul.msk.bf16.vlgmr.msra.gmra.mxu0 %vm122_vm2, %v81_v22 }
  0x8b   :  { %v60_v23 = vpop.f32.mrf.mxu2 }
  0x8c   :  { %v64_v24 = vpack.c.bf16 %v60_v23, %v60_v23 }
  0x8d   :  { %v79_v25 = vpop.f32.mrf.mxu1 }
  0x8e   :  { %543 = vmatmul.msk.bf16.vlgmr.msra.gmra.mxu3 %vm122_vm2, %v64_v24 }
  0x93   :  { %v62_v26 = vpop.f32.mrf.mxu2 }
  0x9b   :  { %v134_v27 = vpop.f32.mrf.mxu2 }
  0xa3   :  { %v136_v28 = vpop.f32.mrf.mxu2 }
 0x105   :  { %v222_v35 = vpop.f32.mrf.mxu0 }
 0x10d   :  { %v224_v38 = vpop.f32.mrf.mxu0 }
 0x111   :  { %v174_v40 = vpop.f32.mrf.mxu3 }
 0x112   :  { %v175_v41 = vadd.f32 %v174_v40, %v134_v27 }
 0x114   :  { %v226_v44 = vadd.f32 %v222_v35, %v175_v41 }
 0x116   :  { %v231_v45 = vadd.f32 %v695_v42, %v226_v44 }
 0x118   :  { %v232_v47 = vmax.f32 %v231_v45, 0.0 }
 0x119   :  { %v176_v48 = vpop.f32.mrf.mxu3 }
 0x11a   :  { %v233_v49 = vpack.c.bf16 %v232_v47, %v232_v47 }
 0x11c   :  { %353 = vmatmul.bf16.vlgmr.msrb.gmra.mxu3 %v233_v49  ;;  %v235_v51 = vsel %vm47_vm0, %v233_v49, 0 }
 0x11d   :  { %244 = vmatpush.bf16.msrb.mxu1 %v235_v51  ;;  %258 = vmatpush.bf16.msra.mxu2 %v235_v51 }
 0x120   :  { %561 = vmatmul.msk.bf16.vlgmr.msrb.gmra.mxu1 %vm43_vm1, %v773_v6  ;;  %562 = vmatmul.msk.bf16.vlgmr.msra.gmra.mxu2 %vm43_vm1, %v778_v7  ;;  %v696_v6 = vld [vmem:[%s910_s10] ss:$0 sm:$0xff] }
 0x121   :  { %483 = vmatpush.bf16.msra.mxu1 %v694_v50 }
 0x125   :  { %484 = vmatpush.bf16.msra.mxu1 %v693_v52 }
 0x129   :  { %485 = vmatpush.bf16.msra.mxu1 %v692_v53 }
 0x12d   :  { %486 = vmatpush.bf16.msra.mxu1 %v691_v54 }
 0x131   :  { %487 = vmatpush.bf16.msra.mxu1 %v690_v55 }
 0x135   :  { %488 = vmatpush.bf16.msra.mxu1 %v689_v56 }
 0x139   :  { %489 = vmatpush.bf16.msra.mxu1 %v688_v58 }
 0x13d   :  { %490 = vmatpush.bf16.msra.mxu1 %v687_v59 }
 0x19d   :  { %v246_v60 = vpop.f32.mrf.mxu1 }
 0x19e   :  { %v250_v61 = vpack.c.bf16 %v246_v60, %v246_v60 }
 0x19f   :  { %v354_v62 = vpop.f32.mrf.mxu3 }
 0x1a0   :  { %414 = vmatmul.bf16.vlgmr.msrb.gmra.mxu0 %v250_v61 }
 0x1a3   :  { %v260_v63 = vpop.f32.mrf.mxu2 }
 0x1a4   :  { %v264_v0 = vpack.c.bf16 %v260_v63, %v260_v63 }
 0x1a5   :  { %v248_v1 = vpop.f32.mrf.mxu1 }
 0x1a6   :  { %491 = vmatmul.bf16.vlgmr.msra.gmra.mxu1 %v264_v0 }
 0x1a7   :  { %v356_v2 = vpop.f32.mrf.mxu3 }
 0x1ab   :  { %v262_v3 = vpop.f32.mrf.mxu2 }
 0x21d   :  { %v415_v4 = vpop.f32.mrf.mxu0 }
 0x21e   :  { %v416_v5 = vadd.f32 %v415_v4, %v354_v62 }
 0x223   :  { %v492_v7 = vpop.f32.mrf.mxu1 }
 0x224   :  { %v496_v8 = vadd.f32 %v492_v7, %v416_v5 }
 0x225   :  { %v417_v9 = vpop.f32.mrf.mxu0 }
 0x226   :  { %v501_v10 = vadd.f32 %v696_v6, %v496_v8 }
 0x228   :  { %v502_v11 = vmax.f32 %v501_v10, 0.0 }
 0x22a   :  { %503 = vst [vmem:[%s911_s11] sm:$0xff] %v502_v11 }
 0x22b   :  { %v494_v12 = vpop.f32.mrf.mxu1 }

// kernel: forward.9
= control target key start
LH: loop header
LB: loop body
LE: loop exit
PB: predicated region body
PF: predicated region fallthrough
CT: control target
= control target key end

     0   :  { %vm712_vm0 = vcmask 130048   ;;  %vm779_vm1 = vcmask 1041408   ;;  %vm781_vm2 = vcmask 1045508   ;;  %vm783_vm3 = vcmask 1043456   ;;  %s1434_s2 = inlined_call_operand.vmem [shape: bf16[512,16], index: 2, kind: input, shape index: {}]   ;;  %s1435_s0 = inlined_call_operand.vmem [shape: f32[2,512], index: 0, kind: input, shape index: {}]   ;;  %s1436_s3 = inlined_call_operand.vmem [shape: f32[1,16], index: 3, kind: input, shape index: {}]   ;;  %s1437_s4 = inlined_call_operand.vmem [shape: bf16[512,16], index: 4, kind: input, shape index: {}]   ;;  %s1438_s5 = inlined_call_operand.vmem [shape: f32[1,16], index: 5, kind: input, shape index: {}]   ;;  %s1439_s6 = inlined_call_operand.vmem [shape: bf16[16,512], index: 6, kind: input, shape index: {}]   ;;  %s1440_s1 = inlined_call_operand.vmem [shape: f32[2,16], index: 1, kind: input, shape index: {}]   ;;  %s1441_s7 = inlined_call_operand.vmem [shape: f32[1,512], index: 7, kind: input, shape index: {}]   ;;  %s1442_s8 = inlined_call_operand.vmem [shape: f32[2,512], index: 8, kind: output, shape index: {}]  }
   0x1   :  { %v1074_v0 = vld [vmem:[%s1434_s2 + $0x38] sm:$0xff]  ;;  %v1073_v4 = vld [vmem:[%s1434_s2 + $0x30] sm:$0xff]  ;;  %v1072_v8 = vld [vmem:[%s1434_s2 + $0x28] sm:$0xff] }
   0x2   :  { %v1082_v1 = vld [vmem:[%s1434_s2 + $0x78] sm:$0xff]  ;;  %305 = vmatpush.bf16.msra.mxu0 %v1074_v0  ;;  %v1081_v5 = vld [vmem:[%s1434_s2 + $0x70] sm:$0xff]  ;;  %v1080_v9 = vld [vmem:[%s1434_s2 + $0x68] sm:$0xff] }
   0x3   :  { %v1090_v2 = vld [vmem:[%s1434_s2 + $0xb8] sm:$0xff]  ;;  %318 = vmatpush.bf16.msra.mxu1 %v1082_v1  ;;  %v1089_v6 = vld [vmem:[%s1434_s2 + $0xb0] sm:$0xff]  ;;  %v1088_v10 = vld [vmem:[%s1434_s2 + $0xa8] sm:$0xff] }
   0x4   :  { %v1098_v3 = vld [vmem:[%s1434_s2 + $0xf8] sm:$0xff]  ;;  %331 = vmatpush.bf16.msra.mxu2 %v1090_v2  ;;  %v1097_v7 = vld [vmem:[%s1434_s2 + $0xf0] sm:$0xff]  ;;  %v1096_v11 = vld [vmem:[%s1434_s2 + $0xe8] sm:$0xff] }
   0x5   :  { %344 = vmatpush.bf16.msra.mxu3 %v1098_v3  ;;  %v1071_v12 = vld [vmem:[%s1434_s2 + $0x20] sm:$0xff]  ;;  %v1070_v17 = vld [vmem:[%s1434_s2 + $0x18] sm:$0xff]  ;;  %v1069_v21 = vld [vmem:[%s1434_s2 + $0x10] sm:$0xff] }
   0x6   :  { %306 = vmatpush.bf16.msra.mxu0 %v1073_v4  ;;  %v1079_v13 = vld [vmem:[%s1434_s2 + $0x60] sm:$0xff]  ;;  %v1078_v18 = vld [vmem:[%s1434_s2 + $0x58] sm:$0xff]  ;;  %v1077_v22 = vld [vmem:[%s1434_s2 + $0x50] sm:$0xff] }
   0x7   :  { %319 = vmatpush.bf16.msra.mxu1 %v1081_v5  ;;  %v1087_v14 = vld [vmem:[%s1434_s2 + $0xa0] sm:$0xff]  ;;  %v1086_v19 = vld [vmem:[%s1434_s2 + $0x98] sm:$0xff]  ;;  %v1085_v23 = vld [vmem:[%s1434_s2 + $0x90] sm:$0xff] }
   0x8   :  { %332 = vmatpush.bf16.msra.mxu2 %v1089_v6  ;;  %v1095_v15 = vld [vmem:[%s1434_s2 + $0xe0] sm:$0xff]  ;;  %v1094_v20 = vld [vmem:[%s1434_s2 + $0xd8] sm:$0xff]  ;;  %v1093_v24 = vld [vmem:[%s1434_s2 + $0xd0] sm:$0xff] }
   0x9   :  { %345 = vmatpush.bf16.msra.mxu3 %v1097_v7  ;;  %v30_v16 = vld [vmem:[%s1435_s0] sm:$0xff]  ;;  %v1068_v25 = vld [vmem:[%s1434_s2 + $0x8] sm:$0xff]  ;;  %v1106_v33 = vld [vmem:[%s1437_s4 + $0x38] sm:$0xff] }
   0xa   :  { %307 = vmatpush.bf16.msra.mxu0 %v1072_v8  ;;  %32 = vst [vmem:[#allocation1] ss:$4 sm:$0xff] %v30_v16  ;;  %v1076_v26 = vld [vmem:[%s1434_s2 + $0x48] sm:$0xff]  ;;  %v1067_v29 = vld [vmem:[%s1434_s2] sm:$0xff]  ;;  %v1114_v34 = vld [vmem:[%s1437_s4 + $0x78] sm:$0xff] }
   0xb   :  { %320 = vmatpush.bf16.msra.mxu1 %v1080_v9  ;;  %v1084_v27 = vld [vmem:[%s1434_s2 + $0x88] sm:$0xff]  ;;  %v1075_v30 = vld [vmem:[%s1434_s2 + $0x40] sm:$0xff]  ;;  %v1122_v39 = vld [vmem:[%s1437_s4 + $0xb8] sm:$0xff] }
   0xc   :  { %333 = vmatpush.bf16.msra.mxu2 %v1088_v10  ;;  %v1092_v28 = vld [vmem:[%s1434_s2 + $0xc8] sm:$0xff]  ;;  %v1083_v31 = vld [vmem:[%s1434_s2 + $0x80] sm:$0xff]  ;;  %v1130_v40 = vld [vmem:[%s1437_s4 + $0xf8] sm:$0xff] }
   0xd   :  { %346 = vmatpush.bf16.msra.mxu3 %v1096_v11  ;;  %v1091_v32 = vld [vmem:[%s1434_s2 + $0xc0] sm:$0xff]  ;;  %v1105_v45 = vld [vmem:[%s1437_s4 + $0x30] sm:$0xff]  ;;  %v1104_v49 = vld [vmem:[%s1437_s4 + $0x28] sm:$0xff] }
   0xe   :  { %308 = vmatpush.bf16.msra.mxu0 %v1071_v12  ;;  %v1113_v46 = vld [vmem:[%s1437_s4 + $0x70] sm:$0xff]  ;;  %v1112_v50 = vld [vmem:[%s1437_s4 + $0x68] sm:$0xff]  ;;  %v1103_v53 = vld [vmem:[%s1437_s4 + $0x20] sm:$0xff] }
   0xf   :  { %321 = vmatpush.bf16.msra.mxu1 %v1079_v13  ;;  %v1121_v47 = vld [vmem:[%s1437_s4 + $0xb0] sm:$0xff]  ;;  %v1120_v51 = vld [vmem:[%s1437_s4 + $0xa8] sm:$0xff]  ;;  %v1111_v54 = vld [vmem:[%s1437_s4 + $0x60] sm:$0xff] }
  0x10   :  { %334 = vmatpush.bf16.msra.mxu2 %v1087_v14  ;;  %v1129_v48 = vld [vmem:[%s1437_s4 + $0xf0] sm:$0xff]  ;;  %v1128_v52 = vld [vmem:[%s1437_s4 + $0xe8] sm:$0xff]  ;;  %v1119_v55 = vld [vmem:[%s1437_s4 + $0xa0] sm:$0xff] }
  0x11   :  { %347 = vmatpush.bf16.msra.mxu3 %v1095_v15  ;;  %v35_v35 = vld.sshfl [vmem:[#allocation1 + $0x10] sm:$0xff pattern:$0x73625140]  ;;  %v33_v36 = vld.sshfl [vmem:[#allocation1] sm:$0xff pattern:$0x73625140] }
  0x12   :  { %309 = vmatpush.bf16.msra.mxu0 %v1070_v17  ;;  %v36_v37 = vld.sshfl [vmem:[#allocation1 + $0x18] sm:$0xff pattern:$0x73625140]  ;;  %v34_v38 = vld.sshfl [vmem:[#allocation1 + $0x8] sm:$0xff pattern:$0x73625140]  ;;  %v1295_v41 = vpack.c.bf16 %v35_v35, %v35_v35  ;;  %v1297_v42 = vpack.c.bf16 %v33_v36, %v33_v36 }
  0x13   :  { %322 = vmatpush.bf16.msra.mxu1 %v1078_v18  ;;  %v1299_v43 = vpack.c.bf16 %v36_v37, %v36_v37  ;;  %v1301_v44 = vpack.c.bf16 %v34_v38, %v34_v38  ;;  %v1127_v56 = vld [vmem:[%s1437_s4 + $0xe0] sm:$0xff]  ;;  %v1102_v57 = vld [vmem:[%s1437_s4 + $0x18] sm:$0xff]  ;;  %v1101_v61 = vld [vmem:[%s1437_s4 + $0x10] sm:$0xff] }
  0x14   :  { %335 = vmatpush.bf16.msra.mxu2 %v1086_v19  ;;  %v1110_v58 = vld [vmem:[%s1437_s4 + $0x58] sm:$0xff]  ;;  %v1109_v62 = vld [vmem:[%s1437_s4 + $0x50] sm:$0xff]  ;;  %v1100_v1 = vld [vmem:[%s1437_s4 + $0x8] sm:$0xff] }
  0x15   :  { %348 = vmatpush.bf16.msra.mxu3 %v1094_v20  ;;  %v1118_v59 = vld [vmem:[%s1437_s4 + $0x98] sm:$0xff]  ;;  %v1117_v63 = vld [vmem:[%s1437_s4 + $0x90] sm:$0xff]  ;;  %v1108_v2 = vld [vmem:[%s1437_s4 + $0x48] sm:$0xff] }
  0x16   :  { %310 = vmatpush.bf16.msra.mxu0 %v1069_v21  ;;  %v1126_v60 = vld [vmem:[%s1437_s4 + $0xd8] sm:$0xff]  ;;  %v1125_v0 = vld [vmem:[%s1437_s4 + $0xd0] sm:$0xff]  ;;  %v1116_v3 = vld [vmem:[%s1437_s4 + $0x88] sm:$0xff] }
  0x17   :  { %323 = vmatpush.bf16.msra.mxu1 %v1077_v22  ;;  %v1124_v4 = vld [vmem:[%s1437_s4 + $0xc8] sm:$0xff]  ;;  %v1099_v5 = vld [vmem:[%s1437_s4] sm:$0xff]  ;;  %v1134_v18 = vld [vmem:[%s1439_s6 + $0x14] sm:$0xf0] }
  0x18   :  { %336 = vmatpush.bf16.msra.mxu2 %v1085_v23  ;;  %v1107_v6 = vld [vmem:[%s1437_s4 + $0x40] sm:$0xff]  ;;  %v1057_v17 = vld [vmem:[%s1439_s6 + $0x8] sm:$0xf]  ;;  %v1132_v19 = vld [vmem:[%s1439_s6 + $0xc] sm:$0xf] }
  0x19   :  { %349 = vmatpush.bf16.msra.mxu3 %v1093_v24  ;;  %v1115_v7 = vld [vmem:[%s1437_s4 + $0x80] sm:$0xff]  ;;  %v1058_v20 = vor.u32 %v1134_v18, %v1057_v17  ;;  %v1059_v21 = vld [vmem:[%s1439_s6 + $0x18] sm:$0xf0]  ;;  %v1051_v23 = vld [vmem:[%s1439_s6 + $0x10] sm:$0xf0] }
  0x1a   :  { %311 = vmatpush.bf16.msra.mxu0 %v1068_v25  ;;  %v1123_v8 = vld [vmem:[%s1437_s4 + $0xc0] sm:$0xff]  ;;  %v1062_v25 = vor.u32 %v1132_v19, %v1059_v21 }
  0x1b   :  { %324 = vmatpush.bf16.msra.mxu1 %v1076_v26  ;;  %v1131_v22 = vld [vmem:[%s1439_s6 + $0x4] sm:$0xf]  ;;  %v1136_v24 = vld [vmem:[%s1438_s5] ss:$0 sm:$0xff] }
  0x1c   :  { %337 = vmatpush.bf16.msra.mxu2 %v1084_v27  ;;  %v1054_v26 = vor.u32 %v1131_v22, %v1051_v23  ;;  %v1049_v27 = vld [vmem:[%s1439_s6] sm:$0xf] }
  0x1d   :  { %350 = vmatpush.bf16.msra.mxu3 %v1092_v28  ;;  %v1133_v28 = vld [vmem:[%s1439_s6 + $0xc] sm:$0xf0] }
  0x1e   :  { %312 = vmatpush.bf16.msra.mxu0 %v1067_v29  ;;  %v1050_v29 = vor.u32 %v1133_v28, %v1049_v27 }
  0x1f   :  { %325 = vmatpush.bf16.msra.mxu1 %v1075_v30 }
  0x20   :  { %338 = vmatpush.bf16.msra.mxu2 %v1083_v31 }
  0x21   :  { %351 = vmatpush.bf16.msra.mxu3 %v1091_v32  ;;  %313 = vmatmul.bf16.vlgmr.msra.gmra.mxu0 %v1297_v42 }
  0x22   :  { %617 = vmatpush.bf16.msrb.mxu0 %v1106_v33  ;;  %326 = vmatmul.bf16.vlgmr.msra.gmra.mxu1 %v1301_v44 }
  0x23   :  { %630 = vmatpush.bf16.msrb.mxu1 %v1114_v34  ;;  %339 = vmatmul.bf16.vlgmr.msra.gmra.mxu2 %v1295_v41  ;;  %v1135_v34 = vld [vmem:[%s1436_s3] ss:$0 sm:$0xff] }
  0x24   :  { %643 = vmatpush.bf16.msrb.mxu2 %v1122_v39  ;;  %352 = vmatmul.bf16.vlgmr.msra.gmra.mxu3 %v1299_v43 }
  0x25   :  { %656 = vmatpush.bf16.msrb.mxu3 %v1130_v40 }
  0x26   :  { %618 = vmatpush.bf16.msrb.mxu0 %v1105_v45 }
  0x27   :  { %631 = vmatpush.bf16.msrb.mxu1 %v1113_v46 }
  0x28   :  { %644 = vmatpush.bf16.msrb.mxu2 %v1121_v47 }
  0x29   :  { %657 = vmatpush.bf16.msrb.mxu3 %v1129_v48  ;;  %v672_v48 = vld [vmem:[%s1440_s1] sm:$0x3] }
  0x2a   :  { %619 = vmatpush.bf16.msrb.mxu0 %v1104_v49 }
  0x2b   :  { %632 = vmatpush.bf16.msrb.mxu1 %v1112_v50 }
  0x2c   :  { %645 = vmatpush.bf16.msrb.mxu2 %v1120_v51 }
  0x2d   :  { %658 = vmatpush.bf16.msrb.mxu3 %v1128_v52 }
  0x2e   :  { %620 = vmatpush.bf16.msrb.mxu0 %v1103_v53 }
  0x2f   :  { %633 = vmatpush.bf16.msrb.mxu1 %v1111_v54 }
  0x30   :  { %646 = vmatpush.bf16.msrb.mxu2 %v1119_v55 }
  0x31   :  { %659 = vmatpush.bf16.msrb.mxu3 %v1127_v56  ;;  %v682_v56 = vld [vmem:[%s1441_s7] sm:$0xf] }
  0x32   :  { %621 = vmatpush.bf16.msrb.mxu0 %v1102_v57  ;;  %v685_v57 = vperm.slane %v682_v56, 1 }
  0x33   :  { %634 = vmatpush.bf16.msrb.mxu1 %v1110_v58 }
  0x34   :  { %647 = vmatpush.bf16.msrb.mxu2 %v1118_v59 }
  0x35   :  { %660 = vmatpush.bf16.msrb.mxu3 %v1126_v60 }
  0x36   :  { %622 = vmatpush.bf16.msrb.mxu0 %v1101_v61  ;;  %v684_v61 = vperm.slane %v682_v56, 0 }
  0x37   :  { %635 = vmatpush.bf16.msrb.mxu1 %v1109_v62  ;;  %v686_v62 = vperm.slane %v682_v56, 2 }
  0x38   :  { %648 = vmatpush.bf16.msrb.mxu2 %v1117_v63  ;;  %v687_v63 = vperm.slane %v682_v56, 3 }
  0x39   :  { %661 = vmatpush.bf16.msrb.mxu3 %v1125_v0 }
  0x3a   :  { %623 = vmatpush.bf16.msrb.mxu0 %v1100_v1 }
  0x3b   :  { %636 = vmatpush.bf16.msrb.mxu1 %v1108_v2 }
  0x3c   :  { %649 = vmatpush.bf16.msrb.mxu2 %v1116_v3 }
  0x3d   :  { %662 = vmatpush.bf16.msrb.mxu3 %v1124_v4 }
  0x3e   :  { %624 = vmatpush.bf16.msrb.mxu0 %v1099_v5 }
  0x3f   :  { %637 = vmatpush.bf16.msrb.mxu1 %v1107_v6 }
  0x40   :  { %650 = vmatpush.bf16.msrb.mxu2 %v1115_v7 }
  0x41   :  { %663 = vmatpush.bf16.msrb.mxu3 %v1123_v8  ;;  %625 = vmatmul.bf16.vlgmr.msrb.gmra.mxu0 %v1297_v42 }
  0x42   :  { %638 = vmatmul.bf16.vlgmr.msrb.gmra.mxu1 %v1301_v44  ;;  %723 = vmatpush.bf16.msra.mxu0 %v1050_v29 }
  0x43   :  { %651 = vmatmul.bf16.vlgmr.msrb.gmra.mxu2 %v1295_v41  ;;  %736 = vmatpush.bf16.msra.mxu1 %v1054_v26 }
  0x44   :  { %664 = vmatmul.bf16.vlgmr.msrb.gmra.mxu3 %v1299_v43  ;;  %749 = vmatpush.bf16.msra.mxu2 %v1058_v20 }
  0x45   :  { %762 = vmatpush.bf16.msra.mxu3 %v1062_v25 }
  0x9e   :  { %v314_v9 = vpop.f32.mrf.mxu0 }
  0x9f   :  { %v327_v10 = vpop.f32.mrf.mxu1  ;;  %v315_v41 = vadd.f32 %v1135_v34, %v314_v9 }
  0xa1   :  { %v328_v44 = vadd.f32 %v327_v10, %v315_v41 }
  0xa6   :  { %v340_v11 = vpop.f32.mrf.mxu2  ;;  %v316_v13 = vpop.f32.mrf.mxu0 }
  0xa7   :  { %v353_v12 = vpop.f32.mrf.mxu3  ;;  %v329_v14 = vpop.f32.mrf.mxu1  ;;  %v341_v47 = vadd.f32 %v340_v11, %v328_v44 }
  0xa9   :  { %v354_v50 = vadd.f32 %v353_v12, %v341_v47 }
  0xae   :  { %v342_v15 = vpop.f32.mrf.mxu2 }
  0xaf   :  { %v355_v16 = vpop.f32.mrf.mxu3 }
  0xbe   :  { %v626_v30 = vpop.f32.mrf.mxu0 }
  0xbf   :  { %v639_v31 = vpop.f32.mrf.mxu1  ;;  %v627_v32 = vadd.f32 %v1136_v24, %v626_v30 }
  0xc1   :  { %v640_v33 = vadd.f32 %v639_v31, %v627_v32 }
  0xc6   :  { %v652_v35 = vpop.f32.mrf.mxu2  ;;  %v628_v38 = vpop.f32.mrf.mxu0 }
  0xc7   :  { %v665_v36 = vpop.f32.mrf.mxu3  ;;  %v653_v37 = vadd.f32 %v652_v35, %v640_v33  ;;  %v641_v39 = vpop.f32.mrf.mxu1 }
  0xc9   :  { %v666_v40 = vadd.f32 %v665_v36, %v653_v37 }
  0xcb   :  { %v669_v42 = vmul.f32 0.5, %v666_v40 }
  0xcd   :  { %v670_v43 = vmul.f32 1.442695, %v669_v42 }
  0xce   :  { %v654_v45 = vpop.f32.mrf.mxu2 }
  0xcf   :  { %v667_v46 = vpop.f32.mrf.mxu3  ;;  %1137 = vpow2.f32 %v670_v43 }
  0xd5   :  { %v1138_v49 = vpop.eup %1137 }
  0xd6   :  { %v673_v51 = vmul.f32 %v1138_v49, %v672_v48 }
  0xd8   :  { %v674_v52 = vadd.f32 %v673_v51, %v354_v50 }
  0xda   :  { %v675_v53 = vmul.f32 %v1138_v49, %v674_v52 }
  0xdc   :  { %v676_v54 = vadd.f32 %v675_v53, %v354_v50 }
  0xde   :  { %v677_v55 = vpack.c.bf16 %v676_v54, %v676_v54 }
  0xe0   :  { %1063 = vmatmul.msk.bf16.vlgmr.msra.gmra.mxu0 %vm712_vm0, %v677_v55  ;;  %1064 = vmatmul.msk.bf16.vlgmr.msra.gmra.mxu1 %vm712_vm0, %v677_v55 }
  0xe1   :  { %1065 = vmatmul.msk.bf16.vlgmr.msra.gmra.mxu2 %vm712_vm0, %v677_v55  ;;  %1066 = vmatmul.msk.bf16.vlgmr.msra.gmra.mxu3 %vm712_vm0, %v677_v55 }
 0x15d   :  { %v725_v58 = vpop.f32.mrf.mxu0  ;;  %v738_v59 = vpop.f32.mrf.mxu1 }
 0x15e   :  { %v739_v60 = vadd.f32 %v738_v59, %v685_v57  ;;  %v726_v3 = vadd.f32 %v725_v58, %v684_v61 }
 0x160   :  { %v769_v0 = vmax.f32 %v739_v60, 0.0  ;;  %v768_v11 = vmax.f32 %v726_v3, 0.0 }
 0x162   :  { %v776_v8 = vrot.slane %v769_v0, 6 }
 0x164   :  { %v751_v1 = vpop.f32.mrf.mxu2  ;;  %v764_v2 = vpop.f32.mrf.mxu3  ;;  %v780_v14 = vsel %vm779_vm1, %v768_v11, %v776_v8 }
 0x165   :  { %v752_v4 = vadd.f32 %v751_v1, %v686_v62  ;;  %v765_v5 = vadd.f32 %v764_v2, %v687_v63  ;;  %v727_v6 = vpop.f32.mrf.mxu0  ;;  %v740_v7 = vpop.f32.mrf.mxu1 }
 0x167   :  { %v770_v9 = vmax.f32 %v752_v4, 0.0  ;;  %v771_v10 = vmax.f32 %v765_v5, 0.0 }
 0x169   :  { %v777_v12 = vrot.slane %v770_v9, 4  ;;  %v778_v13 = vrot.slane %v771_v10, 2 }
 0x16b   :  { %v782_v15 = vsel %vm781_vm2, %v777_v12, %v778_v13 }
 0x16c   :  { %v784_v16 = vsel %vm783_vm3, %v780_v14, %v782_v15  ;;  %v753_v17 = vpop.f32.mrf.mxu2  ;;  %v766_v18 = vpop.f32.mrf.mxu3 }
 0x16d   :  { %786 = vst [vmem:[%s1442_s8] sm:$0xff] %v784_v16 }

// kernel: forward.10
= control target key start
LH: loop header
LB: loop body
LE: loop exit
PB: predicated region body
PF: predicated region fallthrough
CT: control target
= control target key end

     0   :  { %vm89_vm0 = vcmask 1043456   ;;  %vm85_vm1 = vcmask 64512   ;;  %vm284_vm5 = vcmask 130048   ;;  %s2092_s0 = inlined_call_operand.vmem [shape: f32[8,128], index: 0, kind: input, shape index: {}]   ;;  %s2093_s3 = inlined_call_operand.vmem [shape: bf16[128,128], index: 3, kind: input, shape index: {}]   ;;  %s2094_s2 = inlined_call_operand.vmem [shape: bf16[16,8], index: 2, kind: input, shape index: {}]   ;;  %s2095_s4 = inlined_call_operand.vmem [shape: f32[1,128], index: 4, kind: input, shape index: {}]   ;;  %s2096_s7 = inlined_call_operand.vmem [shape: f32[128,16], index: 7, kind: input, shape index: {}]   ;;  %s2097_s8 = inlined_call_operand.vmem [shape: f32[16,128], index: 8, kind: input, shape index: {}]   ;;  %s2098_s12 = inlined_call_operand.vmem [shape: bf16[128,128], index: 12, kind: input, shape index: {}]   ;;  %s2099_s5 = inlined_call_operand.vmem [shape: f32[1,16], index: 5, kind: input, shape index: {}]   ;;  %s2100_s6 = inlined_call_operand.vmem [shape: f32[1,16], index: 6, kind: input, shape index: {}]   ;;  %s2101_s1 = inlined_call_operand.vmem [shape: f32[16,128], index: 1, kind: input, shape index: {}]   ;;  %s2102_s9 = inlined_call_operand.vmem [shape: bf16[16,16], index: 9, kind: input, shape index: {}]   ;;  %s2103_s10 = inlined_call_operand.vmem [shape: bf16[16,16], index: 10, kind: input, shape index: {}]   ;;  %s2104_s11 = inlined_call_operand.vmem [shape: bf16[128,128], index: 11, kind: input, shape index: {}]   ;;  %s2105_s13 = inlined_call_operand.vmem [shape: bf16[128,128], index: 13, kind: input, shape index: {}]   ;;  %s2106_s14 = inlined_call_operand.vmem [shape: bf16[128,128], index: 14, kind: input, shape index: {}]   ;;  %s2107_s15 = inlined_call_operand.vmem [shape: bf16[128,128], index: 15, kind: input, shape index: {}]   ;;  %s2108_s16 = inlined_call_operand.vmem [shape: bf16[128,128], index: 16, kind: input, shape index: {}]   ;;  %s2109_s17 = inlined_call_operand.vmem [shape: f32[1,128], index: 17, kind: input, shape index: {}]   ;;  %s2110_s19 = inlined_call_operand.vmem [shape: bf16[128,128], index: 19, kind: input, shape index: {}]   ;;  %s2111_s18 = inlined_call_operand.vmem [shape: bf16[128,128], index: 18, kind: input, shape index: {}]   ;;  %s2112_s20 = inlined_call_operand.vmem [shape: bf16[128,128], index: 20, kind: input, shape index: {}]   ;;  %s2113_s21 = inlined_call_operand.vmem [shape: f32[1,128], index: 21, kind: input, shape index: {}]   ;;  %s2114_s22 = inlined_call_operand.vmem [shape: f32[16,128], index: 22, kind: output, shape index: {}]  }
   0x1   :  { %2119 = sst [smem:[#allocation2_spill]] %s2092_s0 }
   0x2   :  { %2120 = sst [smem:[#allocation3_spill]] %s2093_s3 }
   0x3   :  { %2121 = sst [smem:[#allocation4_spill]] %s2094_s2 }
   0x4   :  { %2122 = sst [smem:[#allocation5_spill]] %s2095_s4 }
   0x5   :  { %2123 = sst [smem:[#allocation6_spill]] %s2096_s7 }
   0x6   :  { %2124 = sst [smem:[#allocation7_spill]] %s2097_s8 }
   0x7   :  { %2125 = sst [smem:[#allocation8_spill]] %s2098_s12 }
   0x8   :  { %s2126_s29 = sld [smem:[#allocation2_spill]] }
   0x9   :  { %s2127_s0 = sld [smem:[#allocation3_spill]] }
   0xa   :  { %s2128_s12 = sld [smem:[#allocation4_spill]] }
   0xb   :  { %s2129_s25 = sld [smem:[#allocation6_spill]] }
   0xc   :  { %s2132_s8 = sld [smem:[#allocation8_spill]] }
   0xe   :  { %v76_v0 = vld [vmem:[%s2126_s29] sm:$0xff]  ;;  %s2131_s29 = sld [smem:[#allocation7_spill]] }
   0xf   :  { %v1531_v1 = vld [vmem:[%s2127_s0 + $0x38] sm:$0xff]  ;;  %v77_v2 = vpack.c.bf16 %v76_v0, %v76_v0  ;;  %v1530_v3 = vld [vmem:[%s2127_s0 + $0x30] sm:$0xff]  ;;  %v1529_v6 = vld [vmem:[%s2127_s0 + $0x28] sm:$0xff] }
  0x10   :  { %176 = vmatpush.bf16.msra.mxu1 %v1531_v1  ;;  %v1523_v5 = vld [vmem:[%s2128_s12] sm:$0xff]  ;;  %v1527_v8 = vld [vmem:[%s2127_s0 + $0x18] sm:$0xff]  ;;  %v1526_v9 = vld [vmem:[%s2127_s0 + $0x10] sm:$0xff] }
  0x11   :  { %v91_v4 = vsel %vm89_vm0, %v77_v2, 0  ;;  %v1528_v7 = vld [vmem:[%s2127_s0 + $0x20] sm:$0xff]  ;;  %v1525_v10 = vld [vmem:[%s2127_s0 + $0x8] sm:$0xff]  ;;  %v212_v12 = vld [vmem:[%s2129_s25 + $0x78] sm:$0xff] }
  0x12   :  { %100 = vmatpush.bf16.msra.mxu2 %v91_v4  ;;  %v1524_v11 = vld [vmem:[%s2127_s0] sm:$0xff]  ;;  %v211_v13 = vld [vmem:[%s2129_s25 + $0x70] sm:$0xff]  ;;  %242 = vmatpush.msra.mxu3 %v212_v12  ;;  %v210_v14 = vld [vmem:[%s2129_s25 + $0x68] sm:$0xff]  ;;  %s2130_s0 = sld [smem:[#allocation5_spill]] }
  0x13   :  { %v209_v18 = vld [vmem:[%s2129_s25 + $0x60] sm:$0xff]  ;;  %v208_v19 = vld [vmem:[%s2129_s25 + $0x58] sm:$0xff]  ;;  %v207_v20 = vld [vmem:[%s2129_s25 + $0x50] sm:$0xff] }
  0x14   :  { %177 = vmatpush.bf16.msra.mxu1 %v1530_v3  ;;  %243 = vmatpush.msra.mxu3 %v211_v13  ;;  %v206_v21 = vld [vmem:[%s2129_s25 + $0x48] sm:$0xff]  ;;  %v205_v22 = vld [vmem:[%s2129_s25 + $0x40] sm:$0xff]  ;;  %v204_v23 = vld [vmem:[%s2129_s25 + $0x38] sm:$0xff] }
  0x15   :  { %1184 = vmatmul.msk.bf16.vlgmr.msra.gmra.mxu2 %vm85_vm1, %v1523_v5  ;;  %v203_v24 = vld [vmem:[%s2129_s25 + $0x30] sm:$0xff]  ;;  %v202_v25 = vld [vmem:[%s2129_s25 + $0x28] sm:$0xff]  ;;  %v201_v26 = vld [vmem:[%s2129_s25 + $0x20] sm:$0xff] }
  0x16   :  { %213 = vmatpush.msrb.mxu2 %v212_v12  ;;  %244 = vmatpush.msra.mxu3 %v210_v14  ;;  %v200_v27 = vld [vmem:[%s2129_s25 + $0x18] sm:$0xff]  ;;  %v199_v28 = vld [vmem:[%s2129_s25 + $0x10] sm:$0xff]  ;;  %v198_v29 = vld [vmem:[%s2129_s25 + $0x8] sm:$0xff] }
  0x17   :  { %v197_v30 = vld [vmem:[%s2129_s25] sm:$0xff]  ;;  %v283_v52 = vld [vmem:[%s2131_s29 + $0x8] sm:$0xff]  ;;  %v1547_v60 = vld [vmem:[%s2132_s8 + $0x38] sm:$0xff] }
  0x18   :  { %178 = vmatpush.bf16.msra.mxu1 %v1529_v6  ;;  %214 = vmatpush.msrb.mxu2 %v211_v13  ;;  %v1604_v32 = vld [vmem:[%s2130_s0] ss:$0 sm:$0xff]  ;;  %v1546_v62 = vld [vmem:[%s2132_s8 + $0x30] sm:$0xff]  ;;  %v1545_v63 = vld [vmem:[%s2132_s8 + $0x28] sm:$0xff] }
  0x19   :  { %245 = vmatpush.msra.mxu3 %v209_v18  ;;  %v282_v53 = vld [vmem:[%s2131_s29] sm:$0xff]  ;;  %302 = vmatpush.msra.mxu0 %v283_v52  ;;  %v1543_v13 = vld [vmem:[%s2132_s8 + $0x18] sm:$0xff] }
  0x1a   :  { %215 = vmatpush.msrb.mxu2 %v210_v14  ;;  %v1544_v1 = vld [vmem:[%s2132_s8 + $0x20] sm:$0xff]  ;;  %v1542_v14 = vld [vmem:[%s2132_s8 + $0x10] sm:$0xff] }
  0x1b   :  { %246 = vmatpush.msra.mxu3 %v208_v19  ;;  %303 = vmatpush.msra.mxu0 %v282_v53  ;;  %v266_v6 = vld [vmem:[%s2099_s5] sm:$0x1] }
  0x1c   :  { %179 = vmatpush.bf16.msra.mxu1 %v1528_v7  ;;  %216 = vmatpush.msrb.mxu2 %v209_v18 }
  0x1d   :  { %247 = vmatpush.msra.mxu3 %v207_v20  ;;  %325 = vmatpush.msrb.mxu0 %v283_v52  ;;  %v1560_v52 = vld [vmem:[%s2106_s14 + $0x20] sm:$0xff] }
  0x1e   :  { %217 = vmatpush.msrb.mxu2 %v208_v19 }
  0x1f   :  { %248 = vmatpush.msra.mxu3 %v206_v21  ;;  %326 = vmatpush.msrb.mxu0 %v282_v53  ;;  %v1569_v53 = vld [vmem:[%s2107_s15 + $0x28] sm:$0xff] }
  0x20   :  { %180 = vmatpush.bf16.msra.mxu1 %v1527_v8  ;;  %218 = vmatpush.msrb.mxu2 %v207_v20 }
  0x21   :  { %249 = vmatpush.msra.mxu3 %v205_v22 }
  0x22   :  { %219 = vmatpush.msrb.mxu2 %v206_v21 }
  0x23   :  { %250 = vmatpush.msra.mxu3 %v204_v23 }
  0x24   :  { %181 = vmatpush.bf16.msra.mxu1 %v1526_v9  ;;  %220 = vmatpush.msrb.mxu2 %v205_v22 }
  0x25   :  { %251 = vmatpush.msra.mxu3 %v203_v24 }
  0x26   :  { %221 = vmatpush.msrb.mxu2 %v204_v23  ;;  %v337_v23 = vld [vmem:[%s2101_s1] sm:$0xff] }
  0x27   :  { %252 = vmatpush.msra.mxu3 %v202_v25 }
  0x28   :  { %182 = vmatpush.bf16.msra.mxu1 %v1525_v10  ;;  %222 = vmatpush.msrb.mxu2 %v203_v24  ;;  %v338_v24 = vld [vmem:[%s2101_s1 + $0x8] sm:$0xff] }
  0x29   :  { %253 = vmatpush.msra.mxu3 %v201_v26 }
  0x2a   :  { %223 = vmatpush.msrb.mxu2 %v202_v25 }
  0x2b   :  { %254 = vmatpush.msra.mxu3 %v200_v27 }
  0x2c   :  { %183 = vmatpush.bf16.msra.mxu1 %v1524_v11  ;;  %224 = vmatpush.msrb.mxu2 %v201_v26  ;;  %v279_v11 = vld [vmem:[%s2100_s6] sm:$0x1] }
  0x2d   :  { %255 = vmatpush.msra.mxu3 %v199_v28 }
  0x2e   :  { %225 = vmatpush.msrb.mxu2 %v200_v27  ;;  %v1861_v27 = vpack.c.bf16 %v338_v24, %v337_v23  ;;  %v1591_v23 = vld [vmem:[%s2110_s19 + $0x18] sm:$0xff]  ;;  %v1590_v24 = vld [vmem:[%s2110_s19 + $0x10] sm:$0xff] }
  0x2f   :  { %256 = vmatpush.msra.mxu3 %v198_v29 }
  0x30   :  { %226 = vmatpush.msrb.mxu2 %v199_v28  ;;  %466 = vmatpush.bf16.msrb.mxu1 %v1547_v60  ;;  %v1557_v60 = vld [vmem:[%s2106_s14 + $0x8] sm:$0xff] }
  0x31   :  { %257 = vmatpush.msra.mxu3 %v197_v30 }
  0x32   :  { %227 = vmatpush.msrb.mxu2 %v198_v29  ;;  %v1866_v29 = vld [vmem:[%s2102_s9] sm:$0xff] }
  0x34   :  { %228 = vmatpush.msrb.mxu2 %v197_v30  ;;  %467 = vmatpush.bf16.msrb.mxu1 %v1546_v62  ;;  %v1871_v30 = vld [vmem:[%s2103_s10] sm:$0xff]  ;;  %v1566_v62 = vld [vmem:[%s2107_s15 + $0x10] sm:$0xff] }
  0x38   :  { %468 = vmatpush.bf16.msrb.mxu1 %v1545_v63  ;;  %v1556_v63 = vld [vmem:[%s2106_s14] sm:$0xff] }
  0x3c   :  { %469 = vmatpush.bf16.msrb.mxu1 %v1544_v1  ;;  %v1565_v1 = vld [vmem:[%s2107_s15 + $0x8] sm:$0xff] }
  0x40   :  { %470 = vmatpush.bf16.msrb.mxu1 %v1543_v13 }
  0x44   :  { %471 = vmatpush.bf16.msrb.mxu1 %v1542_v14 }
  0x98   :  { %v102_v15 = vpop.f32.mrf.mxu2 }
  0xa0   :  { %v104_v16 = vpop.f32.mrf.mxu2 }
  0xa1   :  { %v107_v17 = vpack.c.bf16 %v104_v16, %v102_v15  ;;  %v1541_v15 = vld [vmem:[%s2132_s8 + $0x8] sm:$0xff]  ;;  %v1540_v16 = vld [vmem:[%s2132_s8] sm:$0xff] }
  0xa2   :  { %472 = vmatpush.bf16.msrb.mxu1 %v1541_v15 }
  0xa3   :  { %184 = vmatmul.bf16.vlgmr.msra.gmra.mxu1 %v107_v17 }
  0xa6   :  { %473 = vmatpush.bf16.msrb.mxu1 %v1540_v16 }
 0x120   :  { %v185_v31 = vpop.f32.mrf.mxu1 }
 0x121   :  { %v1805_v33 = vadd.f32 %v1604_v32, %v185_v31  ;;  %v1539_v31 = vld [vmem:[%s2104_s11 + $0x38] sm:$0xff] }
 0x122   :  { %528 = vmatpush.bf16.msrb.mxu3 %v1539_v31  ;;  %v1588_v31 = vld [vmem:[%s2110_s19] sm:$0xff] }
 0x123   :  { %v233_v36 = vmul.f32 %v1805_v33, %v1805_v33 }
 0x128   :  { %v187_v34 = vpop.f32.mrf.mxu1 }
 0x129   :  { %v1807_v35 = vadd.f32 %v1604_v32, %v187_v34  ;;  %v1555_v32 = vld [vmem:[%s2105_s13 + $0x38] sm:$0xff]  ;;  %v1554_v34 = vld [vmem:[%s2105_s13 + $0x30] sm:$0xff] }
 0x12b   :  { %v190_v37 = vadd.f32 %v1807_v35, %v1805_v33  ;;  %v234_v38 = vmul.f32 %v1807_v35, %v1807_v35 }
 0x12d   :  { %v191_v39 = vrot.slane %v190_v37, 4  ;;  %v235_v40 = vadd.f32 %v234_v38, %v233_v36  ;;  %v1553_v36 = vld [vmem:[%s2105_s13 + $0x28] sm:$0xff]  ;;  %v1535_v38 = vld [vmem:[%s2104_s11 + $0x18] sm:$0xff] }
 0x12f   :  { %v192_v41 = vadd.f32 %v191_v39, %v190_v37  ;;  %v236_v42 = vrot.slane %v235_v40, 4  ;;  %v1536_v37 = vld [vmem:[%s2104_s11 + $0x20] sm:$0xff]  ;;  %v1534_v39 = vld [vmem:[%s2104_s11 + $0x10] sm:$0xff] }
 0x131   :  { %v193_v43 = vrot.slane %v192_v41, 2  ;;  %v237_v44 = vadd.f32 %v236_v42, %v235_v40  ;;  %v1533_v40 = vld [vmem:[%s2104_s11 + $0x8] sm:$0xff]  ;;  %v1532_v42 = vld [vmem:[%s2104_s11] sm:$0xff] }
 0x133   :  { %v194_v45 = vadd.f32 %v193_v43, %v192_v41  ;;  %v238_v46 = vrot.slane %v237_v44, 2  ;;  %v1552_v41 = vld [vmem:[%s2105_s13 + $0x20] sm:$0xff]  ;;  %v1551_v43 = vld [vmem:[%s2105_s13 + $0x18] sm:$0xff] }
 0x135   :  { %v195_v47 = vrot.slane %v194_v45, 1  ;;  %v239_v48 = vadd.f32 %v238_v46, %v237_v44  ;;  %v1563_v44 = vld [vmem:[%s2106_s14 + $0x38] sm:$0xff]  ;;  %v1562_v46 = vld [vmem:[%s2106_s14 + $0x30] sm:$0xff] }
 0x137   :  { %v196_v49 = vadd.f32 %v195_v47, %v194_v45  ;;  %v240_v50 = vrot.slane %v239_v48, 1  ;;  %v1550_v45 = vld [vmem:[%s2105_s13 + $0x10] sm:$0xff]  ;;  %v1571_v47 = vld [vmem:[%s2107_s15 + $0x38] sm:$0xff] }
 0x138   :  { %733 = vmatpush.bf16.msra.mxu1 %v1571_v47 }
 0x139   :  { %229 = vmatmul.f32.vlgmr.msrb.gmra.mxu2 %v196_v49  ;;  %v241_v51 = vadd.f32 %v240_v50, %v239_v48  ;;  %v1549_v48 = vld [vmem:[%s2105_s13 + $0x8] sm:$0xff]  ;;  %v1570_v50 = vld [vmem:[%s2107_s15 + $0x30] sm:$0xff] }
 0x13a   :  { %v1561_v49 = vld [vmem:[%s2106_s14 + $0x28] sm:$0xff] }
 0x13b   :  { %258 = vmatmul.f32.vlgmr.msra.gmra.mxu3 %v241_v51  ;;  %v1548_v51 = vld [vmem:[%s2105_s13] sm:$0xff] }
 0x13c   :  { %734 = vmatpush.bf16.msra.mxu1 %v1570_v50  ;;  %v1586_v50 = vld [vmem:[%s2111_s18 + $0x30] sm:$0xff] }
 0x140   :  { %735 = vmatpush.bf16.msra.mxu1 %v1569_v53 }
 0x1bc   :  { %v230_v54 = vpop.f32.mrf.mxu2 }
 0x1bd   :  { %v262_v55 = vmul.f32 0.0078125, %v230_v54  ;;  %v1559_v54 = vld [vmem:[%s2106_s14 + $0x18] sm:$0xff] }
 0x1be   :  { %v259_v56 = vpop.f32.mrf.mxu3 }
 0x1bf   :  { %v264_v57 = vmul.f32 %v262_v55, %v262_v55  ;;  %v263_v58 = vmul.f32 0.0078125, %v259_v56  ;;  %v1568_v56 = vld [vmem:[%s2107_s15 + $0x20] sm:$0xff] }
 0x1c0   :  { %736 = vmatpush.bf16.msra.mxu1 %v1568_v56 }
 0x1c1   :  { %v265_v59 = vsub.f32 %v263_v58, %v264_v57  ;;  %v1558_v57 = vld [vmem:[%s2106_s14 + $0x10] sm:$0xff] }
 0x1c2   :  { %v1578_v58 = vld [vmem:[%s2108_s16 + $0x30] sm:$0xff] }
 0x1c3   :  { %v267_v61 = vadd.f32 1e-05, %v265_v59  ;;  %v1567_v59 = vld [vmem:[%s2107_s15 + $0x18] sm:$0xff] }
 0x1c4   :  { %737 = vmatpush.bf16.msra.mxu1 %v1567_v59 }
 0x1c5   :  { %1607 = vrsqrt.f32 %v267_v61  ;;  %vm274_vm3 = vweird.f32 %v267_v61 }
 0x1c8   :  { %738 = vmatpush.bf16.msra.mxu1 %v1566_v62  ;;  %v1583_v62 = vld [vmem:[%s2111_s18 + $0x18] sm:$0xff] }
 0x1cb   :  { %v1608_v0 = vpop.eup %1607 }
 0x1cc   :  { %v269_v2 = vmul.f32 %v1608_v0, %v267_v61  ;;  %vm275_vm2 = vweird.f32 %v1608_v0  ;;  %v1577_v61 = vld [vmem:[%s2108_s16 + $0x28] sm:$0xff]  ;;  %739 = vmatpush.bf16.msra.mxu1 %v1565_v1  ;;  %v1580_v1 = vld [vmem:[%s2111_s18] sm:$0xff] }
 0x1cd   :  { %vm276_vm4 = vmor %vm274_vm3, %vm275_vm2 }
 0x1ce   :  { %v270_v3 = vmul.f32 %v1608_v0, %v269_v2 }
 0x1d0   :  { %v271_v4 = vmul.f32 0.5, %v270_v3  ;;  %v1575_v3 = vld [vmem:[%s2108_s16 + $0x18] sm:$0xff] }
 0x1d2   :  { %v272_v5 = vsub.f32 1.5, %v271_v4  ;;  %v1564_v4 = vld [vmem:[%s2107_s15] sm:$0xff] }
 0x1d3   :  { %740 = vmatpush.bf16.msra.mxu1 %v1564_v4  ;;  %v1598_v4 = vld [vmem:[%s2112_s20 + $0x10] sm:$0xff] }
 0x1d4   :  { %v273_v7 = vmul.f32 %v1608_v0, %v272_v5  ;;  %v1574_v5 = vld [vmem:[%s2108_s16 + $0x10] sm:$0xff] }
 0x1d6   :  { %v277_v8 = vsel %vm276_vm4, %v1608_v0, %v273_v7  ;;  %v1576_v0 = vld [vmem:[%s2108_s16 + $0x20] sm:$0xff]  ;;  %v1573_v7 = vld [vmem:[%s2108_s16 + $0x8] sm:$0xff] }
 0x1d7   :  { %v278_v9 = vmul.f32 %v277_v8, %v266_v6 }
 0x1d9   :  { %1217 = vmatmul.msk.f32.vlgmr.msra.gmra.mxu0 %vm284_vm5, %v278_v9  ;;  %v280_v10 = vmul.f32 %v278_v9, %v262_v55  ;;  %v1579_v55 = vld [vmem:[%s2108_s16 + $0x38] sm:$0xff] }
 0x1db   :  { %v281_v12 = vsub.f32 %v279_v11, %v280_v10  ;;  %v1572_v10 = vld [vmem:[%s2108_s16] sm:$0xff] }
 0x1e1   :  { %1218 = vmatmul.msk.f32.vlgmr.msrb.gmra.mxu0 %vm284_vm5, %v281_v12 }
 0x256   :  { %v305_v17 = vpop.f32.mrf.mxu0 }
 0x257   :  { %v331_v18 = vperm.slane %v305_v17, 0 }
 0x259   :  { %v332_v20 = vmul.f32 %v331_v18, %v1805_v33  ;;  %v333_v21 = vmul.f32 %v331_v18, %v1807_v35  ;;  %v1538_v33 = vld [vmem:[%s2104_s11 + $0x30] sm:$0xff]  ;;  %v1537_v35 = vld [vmem:[%s2104_s11 + $0x28] sm:$0xff] }
 0x25a   :  { %529 = vmatpush.bf16.msrb.mxu3 %v1538_v33 }
 0x25e   :  { %v328_v19 = vpop.f32.mrf.mxu0  ;;  %530 = vmatpush.bf16.msrb.mxu3 %v1537_v35 }
 0x25f   :  { %v334_v22 = vperm.slane %v328_v19, 0  ;;  %v1595_v19 = vld [vmem:[%s2110_s19 + $0x38] sm:$0xff] }
 0x261   :  { %v335_v25 = vadd.f32 %v334_v22, %v332_v20  ;;  %v336_v26 = vadd.f32 %v334_v22, %v333_v21  ;;  %v1594_v20 = vld [vmem:[%s2110_s19 + $0x30] sm:$0xff]  ;;  %v1593_v21 = vld [vmem:[%s2110_s19 + $0x28] sm:$0xff]  ;;  %v1592_v22 = vld [vmem:[%s2110_s19 + $0x20] sm:$0xff] }
 0x262   :  { %531 = vmatpush.bf16.msrb.mxu3 %v1536_v37 }
 0x263   :  { %v339_v28 = vpack.c.bf16 %v336_v26, %v335_v25 }
 0x265   :  { %355 = vmatpush.bf16.msra.mxu0 %v339_v28  ;;  %378 = vmatpush.bf16.msra.mxu2 %v339_v28 }
 0x266   :  { %474 = vmatmul.bf16.vlgmr.msrb.gmra.mxu1 %v339_v28  ;;  %532 = vmatpush.bf16.msrb.mxu3 %v1535_v38 }
 0x267   :  { %1010 = vmatpush.bf16.msrb.mxu1 %v1595_v19 }
 0x268   :  { %1223 = vmatmul.msk.bf16.vlgmr.msra.gmra.mxu0 %vm284_vm5, %v1866_v29  ;;  %1228 = vmatmul.msk.bf16.vlgmr.msra.gmra.mxu2 %vm284_vm5, %v1871_v30 }
 0x269   :  { %630 = vmatpush.bf16.msrb.mxu2 %v1861_v27  ;;  %606 = vmatpush.bf16.msrb.mxu0 %v1555_v32 }
 0x26a   :  { %533 = vmatpush.bf16.msrb.mxu3 %v1534_v39 }
 0x26b   :  { %1011 = vmatpush.bf16.msrb.mxu1 %v1594_v20 }
 0x26d   :  { %645 = vmatpush.bf16.msra.mxu2 %v1861_v27  ;;  %607 = vmatpush.bf16.msrb.mxu0 %v1554_v34 }
 0x26e   :  { %534 = vmatpush.bf16.msrb.mxu3 %v1533_v40 }
 0x26f   :  { %1012 = vmatpush.bf16.msrb.mxu1 %v1593_v21 }
 0x271   :  { %608 = vmatpush.bf16.msrb.mxu0 %v1553_v36 }
 0x272   :  { %535 = vmatpush.bf16.msrb.mxu3 %v1532_v42 }
 0x273   :  { %1013 = vmatpush.bf16.msrb.mxu1 %v1592_v22 }
 0x275   :  { %609 = vmatpush.bf16.msrb.mxu0 %v1552_v41 }
 0x276   :  { %795 = vmatpush.bf16.msra.mxu3 %v1563_v44  ;;  %741 = vmatmul.bf16.vlgmr.msra.gmra.mxu1 %v1861_v27  ;;  %v1589_v27 = vld [vmem:[%s2110_s19 + $0x8] sm:$0xff] }
 0x277   :  { %1014 = vmatpush.bf16.msrb.mxu1 %v1591_v23 }
 0x278   :  { %1325 = vmatmul.msk.bf16.vlgmr.msrb.gmra.mxu2 %vm284_vm5, %v1866_v29 }
 0x279   :  { %610 = vmatpush.bf16.msrb.mxu0 %v1551_v43 }
 0x27a   :  { %796 = vmatpush.bf16.msra.mxu3 %v1562_v46 }
 0x27b   :  { %1015 = vmatpush.bf16.msrb.mxu1 %v1590_v24 }
 0x27d   :  { %611 = vmatpush.bf16.msrb.mxu0 %v1550_v45  ;;  %v1587_v45 = vld [vmem:[%s2111_s18 + $0x38] sm:$0xff] }
 0x27e   :  { %797 = vmatpush.bf16.msra.mxu3 %v1561_v49 }
 0x27f   :  { %1016 = vmatpush.bf16.msrb.mxu1 %v1589_v27 }
 0x281   :  { %612 = vmatpush.bf16.msrb.mxu0 %v1549_v48  ;;  %v1605_v48 = vld [vmem:[%s2109_s17] ss:$0 sm:$0xff] }
 0x282   :  { %798 = vmatpush.bf16.msra.mxu3 %v1560_v52 }
 0x283   :  { %1017 = vmatpush.bf16.msrb.mxu1 %v1588_v31 }
 0x285   :  { %613 = vmatpush.bf16.msrb.mxu0 %v1548_v51 }
 0x286   :  { %799 = vmatpush.bf16.msra.mxu3 %v1559_v54 }
 0x288   :  { %1326 = vmatmul.msk.bf16.vlgmr.msra.gmra.mxu2 %vm284_vm5, %v1871_v30 }
 0x289   :  { %873 = vmatpush.bf16.msra.mxu0 %v1579_v55  ;;  %v1585_v55 = vld [vmem:[%s2111_s18 + $0x28] sm:$0xff] }
 0x28a   :  { %800 = vmatpush.bf16.msra.mxu3 %v1558_v57 }
 0x28d   :  { %874 = vmatpush.bf16.msra.mxu0 %v1578_v58 }
 0x28e   :  { %801 = vmatpush.bf16.msra.mxu3 %v1557_v60  ;;  %v1584_v60 = vld [vmem:[%s2111_s18 + $0x20] sm:$0xff] }
 0x291   :  { %875 = vmatpush.bf16.msra.mxu0 %v1577_v61  ;;  %v1603_v61 = vld [vmem:[%s2112_s20 + $0x38] sm:$0xff] }
 0x292   :  { %802 = vmatpush.bf16.msra.mxu3 %v1556_v63  ;;  %v1581_v63 = vld [vmem:[%s2111_s18 + $0x8] sm:$0xff] }
 0x295   :  { %876 = vmatpush.bf16.msra.mxu0 %v1576_v0  ;;  %v1601_v0 = vld [vmem:[%s2112_s20 + $0x28] sm:$0xff] }
 0x299   :  { %877 = vmatpush.bf16.msra.mxu0 %v1575_v3  ;;  %v1599_v3 = vld [vmem:[%s2112_s20 + $0x18] sm:$0xff] }
 0x29d   :  { %878 = vmatpush.bf16.msra.mxu0 %v1574_v5  ;;  %v1597_v5 = vld [vmem:[%s2112_s20 + $0x8] sm:$0xff] }
 0x2a1   :  { %879 = vmatpush.bf16.msra.mxu0 %v1573_v7 }
 0x2a5   :  { %880 = vmatpush.bf16.msra.mxu0 %v1572_v10 }
 0x2e3   :  { %v475_v25 = vpop.f32.mrf.mxu1 }
 0x2e5   :  { %v357_v2 = vpop.f32.mrf.mxu0 }
 0x2eb   :  { %v380_v6 = vpop.f32.mrf.mxu2  ;;  %v477_v32 = vpop.f32.mrf.mxu1 }
 0x2ed   :  { %v359_v8 = vpop.f32.mrf.mxu0 }
 0x2ee   :  { %v362_v9 = vpack.c.bf16 %v359_v8, %v357_v2  ;;  %v1600_v2 = vld [vmem:[%s2112_s20 + $0x20] sm:$0xff] }
 0x2f0   :  { %536 = vmatmul.bf16.vlgmr.msrb.gmra.mxu3 %v362_v9 }
 0x2f1   :  { %1072 = vmatpush.bf16.msrb.mxu3 %v1587_v45 }
 0x2f3   :  { %v382_v11 = vpop.f32.mrf.mxu2  ;;  %v742_v35 = vpop.f32.mrf.mxu1 }
 0x2f4   :  { %v385_v12 = vpack.c.bf16 %v382_v11, %v380_v6  ;;  %v1596_v6 = vld [vmem:[%s2112_s20] sm:$0xff] }
 0x2f5   :  { %1073 = vmatpush.bf16.msrb.mxu3 %v1586_v50 }
 0x2f6   :  { %614 = vmatmul.bf16.vlgmr.msrb.gmra.mxu0 %v385_v12 }
 0x2f7   :  { %1150 = vmatpush.bf16.msrb.mxu0 %v1603_v61 }
 0x2f9   :  { %1074 = vmatpush.bf16.msrb.mxu3 %v1585_v55 }
 0x2fb   :  { %v632_v13 = vpop.f32.mrf.mxu2  ;;  %v744_v41 = vpop.f32.mrf.mxu1 }
 0x2fd   :  { %1075 = vmatpush.bf16.msrb.mxu3 %v1584_v60 }
 0x301   :  { %1076 = vmatpush.bf16.msrb.mxu3 %v1583_v62 }
 0x303   :  { %v634_v14 = vpop.f32.mrf.mxu2 }
 0x304   :  { %v637_v15 = vpack.c.bf16 %v634_v14, %v632_v13 }
 0x306   :  { %803 = vmatmul.bf16.vlgmr.msra.gmra.mxu3 %v637_v15 }
 0x30b   :  { %v647_v16 = vpop.f32.mrf.mxu2 }
 0x313   :  { %v649_v17 = vpop.f32.mrf.mxu2 }
 0x314   :  { %v652_v18 = vpack.c.bf16 %v649_v17, %v647_v16  ;;  %v1606_v16 = vld [vmem:[%s2113_s21] ss:$0 sm:$0xff] }
 0x316   :  { %881 = vmatmul.bf16.vlgmr.msra.gmra.mxu0 %v652_v18 }
 0x373   :  { %v537_v26 = vpop.f32.mrf.mxu3  ;;  %v615_v28 = vpop.f32.mrf.mxu0 }
 0x374   :  { %v538_v38 = vadd.f32 %v537_v26, %v475_v25 }
 0x376   :  { %v620_v43 = vadd.f32 %v615_v28, %v538_v38 }
 0x37b   :  { %v539_v33 = vpop.f32.mrf.mxu3  ;;  %v617_v34 = vpop.f32.mrf.mxu0 }
 0x37c   :  { %v540_v44 = vadd.f32 %v539_v33, %v477_v32 }
 0x37e   :  { %v621_v51 = vadd.f32 %v617_v34, %v540_v44 }
 0x389   :  { %v804_v36 = vpop.f32.mrf.mxu3 }
 0x38a   :  { %v805_v39 = vadd.f32 %v804_v36, %v742_v35 }
 0x391   :  { %v806_v42 = vpop.f32.mrf.mxu3 }
 0x392   :  { %v807_v46 = vadd.f32 %v806_v42, %v744_v41 }
 0x393   :  { %v882_v37 = vpop.f32.mrf.mxu0 }
 0x394   :  { %v887_v40 = vadd.f32 %v882_v37, %v805_v39 }
 0x396   :  { %v889_v47 = vadd.f32 %v887_v40, %v620_v43 }
 0x398   :  { %v895_v53 = vadd.f32 %v1605_v48, %v889_v47 }
 0x39a   :  { %v897_v57 = vmax.f32 %v895_v53, 0.0 }
 0x39b   :  { %v884_v49 = vpop.f32.mrf.mxu0 }
 0x39c   :  { %v888_v52 = vadd.f32 %v884_v49, %v807_v46 }
 0x39e   :  { %v890_v54 = vadd.f32 %v888_v52, %v621_v51 }
 0x3a0   :  { %v896_v56 = vadd.f32 %v1605_v48, %v890_v54 }
 0x3a2   :  { %v898_v58 = vmax.f32 %v896_v56, 0.0 }
 0x3a4   :  { %v899_v59 = vpack.c.bf16 %v898_v58, %v897_v57 }
 0x3a6   :  { %907 = vmatpush.bf16.msrb.mxu2 %v899_v59  ;;  %1018 = vmatmul.bf16.vlgmr.msrb.gmra.mxu1 %v899_v59 }
 0x3a9   :  { %1423 = vmatmul.msk.bf16.vlgmr.msrb.gmra.mxu2 %vm284_vm5, %v1866_v29  ;;  %v1582_v29 = vld [vmem:[%s2111_s18 + $0x10] sm:$0xff] }
 0x3aa   :  { %922 = vmatpush.bf16.msra.mxu2 %v899_v59  ;;  %1077 = vmatpush.bf16.msrb.mxu3 %v1582_v29 }
 0x3ae   :  { %1078 = vmatpush.bf16.msrb.mxu3 %v1581_v63 }
 0x3b2   :  { %1079 = vmatpush.bf16.msrb.mxu3 %v1580_v1 }
 0x3b9   :  { %1424 = vmatmul.msk.bf16.vlgmr.msra.gmra.mxu2 %vm284_vm5, %v1871_v30  ;;  %v1602_v30 = vld [vmem:[%s2112_s20 + $0x30] sm:$0xff] }
 0x3ba   :  { %1151 = vmatpush.bf16.msrb.mxu0 %v1602_v30 }
 0x3be   :  { %1152 = vmatpush.bf16.msrb.mxu0 %v1601_v0 }
 0x3c2   :  { %1153 = vmatpush.bf16.msrb.mxu0 %v1600_v2 }
 0x3c6   :  { %1154 = vmatpush.bf16.msrb.mxu0 %v1599_v3 }
 0x3ca   :  { %1155 = vmatpush.bf16.msrb.mxu0 %v1598_v4 }
 0x3ce   :  { %1156 = vmatpush.bf16.msrb.mxu0 %v1597_v5 }
 0x3d2   :  { %1157 = vmatpush.bf16.msrb.mxu0 %v1596_v6 }
 0x423   :  { %v1019_v14 = vpop.f32.mrf.mxu1 }
 0x42b   :  { %v1021_v22 = vpop.f32.mrf.mxu1 }
 0x42c   :  { %v909_v7 = vpop.f32.mrf.mxu2 }
 0x434   :  { %v911_v8 = vpop.f32.mrf.mxu2 }
 0x435   :  { %v914_v9 = vpack.c.bf16 %v911_v8, %v909_v7 }
 0x437   :  { %1080 = vmatmul.bf16.vlgmr.msrb.gmra.mxu3 %v914_v9 }
 0x43c   :  { %v924_v10 = vpop.f32.mrf.mxu2 }
 0x444   :  { %v926_v11 = vpop.f32.mrf.mxu2 }
 0x445   :  { %v929_v12 = vpack.c.bf16 %v926_v11, %v924_v10 }
 0x447   :  { %1158 = vmatmul.bf16.vlgmr.msrb.gmra.mxu0 %v929_v12 }
 0x4ba   :  { %v1081_v13 = vpop.f32.mrf.mxu3 }
 0x4bb   :  { %v1082_v15 = vadd.f32 %v1081_v13, %v1019_v14 }
 0x4c2   :  { %v1083_v20 = vpop.f32.mrf.mxu3 }
 0x4c3   :  { %v1084_v23 = vadd.f32 %v1083_v20, %v1021_v22 }
 0x4c4   :  { %v1159_v17 = vpop.f32.mrf.mxu0 }
 0x4c5   :  { %v1164_v18 = vadd.f32 %v1159_v17, %v1082_v15 }
 0x4c7   :  { %v1170_v19 = vadd.f32 %v1606_v16, %v1164_v18 }
 0x4c9   :  { %v1172_v21 = vmax.f32 %v1170_v19, 0.0 }
 0x4cb   :  { %1174 = vst [vmem:[%s2114_s22] sm:$0xff] %v1172_v21 }
 0x4cc   :  { %v1161_v24 = vpop.f32.mrf.mxu0 }
 0x4cd   :  { %v1165_v25 = vadd.f32 %v1161_v24, %v1084_v23 }
 0x4cf   :  { %v1171_v26 = vadd.f32 %v1606_v16, %v1165_v25 }
 0x4d1   :  { %v1173_v27 = vmax.f32 %v1171_v26, 0.0 }
 0x4d3   :  { %1175 = vst [vmem:[%s2114_s22 + $0x8] sm:$0xff] %v1173_v27 }

// kernel: tile.128
= control target key start
LH: loop header
LB: loop body
LE: loop exit
PB: predicated region body
PF: predicated region fallthrough
CT: control target
= control target key end

     0   :  { %s28_s0 = inlined_call_operand.vmem [shape: f32[3], index: 0, kind: input, shape index: {}]   ;;  %s29_s1 = inlined_call_operand.vmem [shape: f32[16,3], index: 1, kind: output, shape index: {}]  }
   0x1   :  { %v4_v0 = vld [vmem:[%s28_s0] ss:$0 sm:$0xff] }
   0x2   :  { %5 = vst [vmem:[%s29_s1] sm:$0xff] %v4_v0 }
   0x3   :  { %8 = vst [vmem:[%s29_s1 + $0x8] sm:$0xff] %v4_v0 }

// kernel: tile.129
= control target key start
LH: loop header
LB: loop body
LE: loop exit
PB: predicated region body
PF: predicated region fallthrough
CT: control target
= control target key end

     0   :  { %s131_s10 = smov 45   ;;  %s132_s11 = smov 39   ;;  %vm3_vm0 = vcmask 23552   ;;  %vm9_vm1 = vcmask 392552   ;;  %vm15_vm2 = vcmask 367952   ;;  %vm21_vm3 = vcmask 343352   ;;  %s207_s0 = inlined_call_operand.vmem [shape: f32[16,3], index: 0, kind: input, shape index: {}]   ;;  %s208_s1 = inlined_call_operand.vmem [shape: f32[1,48], index: 1, kind: output, shape index: {}]  }
   0x1   :  { %v101_v0 = vld [vmem:[%s207_s0 + $0xf] sm:$0x1]   ;;  %v103_v1 = vld [vmem:[%s207_s0 + $0xd] sm:$0x1]   ;;  %v105_v2 = vld [vmem:[%s207_s0 + $0xb] sm:$0x1]  }
   0x2   :  { %7 = vrot.lane.b32.xlu0 %v101_v0, %s131_s10  ;;  %19 = vrot.lane.b32.xlu1 %v103_v1, %s132_s11  ;;  %s133_s14 = smov 33   ;;  %v102_v3 = vld [vmem:[%s207_s0 + $0xe] sm:$0x1]   ;;  %v104_v4 = vld [vmem:[%s207_s0 + $0xc] sm:$0x1]   ;;  %s134_s19 = smov 42  }
   0x3   :  { %31 = vrot.lane.b32.xlu2 %v105_v2, %s133_s14  ;;  %s135_s20 = smov 36   ;;  %v106_v5 = vld [vmem:[%s207_s0 + $0xa] sm:$0x1]   ;;  %s136_s23 = smov 30   ;;  %v107_v6 = vld [vmem:[%s207_s0 + $0x9] sm:$0x1]  }
   0x4   :  { %v108_v7 = vld [vmem:[%s207_s0 + $0x8] sm:$0x1]   ;;  %s137_s28 = smov 27   ;;  %s138_s29 = smov 24   ;;  %v109_v8 = vld [vmem:[%s207_s0 + $0x7] sm:$0x1]  }
   0x5   :  { %s139_s3 = smov 21   ;;  %v110_v9 = vld [vmem:[%s207_s0 + $0x6] sm:$0x1]   ;;  %v111_v10 = vld [vmem:[%s207_s0 + $0x5] sm:$0x1]   ;;  %s140_s8 = smov 18  }
   0x6   :  { %s141_s9 = smov 15   ;;  %v112_v11 = vld [vmem:[%s207_s0 + $0x4] sm:$0x1]   ;;  %s142_s12 = smov 12   ;;  %v113_v12 = vld [vmem:[%s207_s0 + $0x3] sm:$0x1]  }
   0x7   :  { %v114_v13 = vld [vmem:[%s207_s0 + $0x2] sm:$0x1]   ;;  %s143_s17 = smov 9   ;;  %s144_s18 = smov 6   ;;  %v115_v14 = vld [vmem:[%s207_s0 + $0x1] sm:$0x1]  }
   0x8   :  { %s145_s21 = smov 3   ;;  %v2_v15 = vld [vmem:[%s207_s0] sm:$0x1]   ;;  %vm27_vm4 = vcmask 318752   ;;  %vm33_vm5 = vcmask 294152   ;;  %vm39_vm6 = vcmask 269552  }
   0x9   :  { %4 = vst.msk [vmem:[#allocation0] sm:$0x1] %vm3_vm0, %v2_v15   ;;  %vm45_vm7 = vcmask 244952   ;;  %vm51_vm8 = vcmask 220352   ;;  %vm57_vm9 = vcmask 195752   ;;  %vm63_vm10 = vcmask 171152  }
   0xa   :  { %13 = vrot.lane.b32.xlu0 %v102_v3, %s134_s19  ;;  %25 = vrot.lane.b32.xlu1 %v104_v4, %s135_s20  ;;  %vm69_vm11 = vcmask 146552   ;;  %vm75_vm12 = vcmask 121952   ;;  %vm81_vm13 = vcmask 97352   ;;  %vm87_vm14 = vcmask 72752  }
   0xb   :  { %37 = vrot.lane.b32.xlu2 %v106_v5, %s136_s23  ;;  %vm93_vm15 = vcmask 48152  }
  0x12   :  { %43 = vrot.lane.b32.xlu0 %v107_v6, %s137_s28  ;;  %49 = vrot.lane.b32.xlu1 %v108_v7, %s138_s29 }
  0x13   :  { %55 = vrot.lane.b32.xlu2 %v109_v8, %s139_s3 }
  0x1a   :  { %61 = vrot.lane.b32.xlu0 %v110_v9, %s140_s8  ;;  %67 = vrot.lane.b32.xlu1 %v111_v10, %s141_s9 }
  0x1b   :  { %73 = vrot.lane.b32.xlu2 %v112_v11, %s142_s12 }
  0x22   :  { %79 = vrot.lane.b32.xlu0 %v113_v12, %s143_s17  ;;  %85 = vrot.lane.b32.xlu1 %v114_v13, %s144_s18 }
  0x23   :  { %91 = vrot.lane.b32.xlu2 %v115_v14, %s145_s21 }
  0x5d   :  { %v32_v16 = vpop.permute.xlu2 %31  }
  0x65   :  { %v38_v17 = vpop.permute.xlu2 %37  }
  0x6d   :  { %v56_v18 = vpop.permute.xlu2 %55  }
  0x74   :  { %v8_v19 = vpop.permute.xlu0 %7   ;;  %v20_v20 = vpop.permute.xlu1 %19  }
  0x75   :  { %10 = vst.msk [vmem:[#allocation0] sm:$0x1] %vm9_vm1, %v8_v19   ;;  %v74_v21 = vpop.permute.xlu2 %73  }
  0x7c   :  { %v14_v22 = vpop.permute.xlu0 %13   ;;  %v26_v23 = vpop.permute.xlu1 %25  }
  0x7d   :  { %16 = vst.msk [vmem:[#allocation0] sm:$0x1] %vm15_vm2, %v14_v22   ;;  %v92_v24 = vpop.permute.xlu2 %91  }
  0x7e   :  { %22 = vst.msk [vmem:[#allocation0] sm:$0x1] %vm21_vm3, %v20_v20  }
  0x7f   :  { %28 = vst.msk [vmem:[#allocation0] sm:$0x1] %vm27_vm4, %v26_v23  }
  0x80   :  { %34 = vst.msk [vmem:[#allocation0] sm:$0x1] %vm33_vm5, %v32_v16  }
  0x81   :  { %40 = vst.msk [vmem:[#allocation0] sm:$0x1] %vm39_vm6, %v38_v17  }
  0x84   :  { %v44_v25 = vpop.permute.xlu0 %43   ;;  %v50_v26 = vpop.permute.xlu1 %49  }
  0x85   :  { %46 = vst.msk [vmem:[#allocation0] sm:$0x1] %vm45_vm7, %v44_v25  }
  0x86   :  { %52 = vst.msk [vmem:[#allocation0] sm:$0x1] %vm51_vm8, %v50_v26  }
  0x87   :  { %58 = vst.msk [vmem:[#allocation0] sm:$0x1] %vm57_vm9, %v56_v18  }
  0x8c   :  { %v62_v27 = vpop.permute.xlu0 %61   ;;  %v68_v28 = vpop.permute.xlu1 %67  }
  0x8d   :  { %64 = vst.msk [vmem:[#allocation0] sm:$0x1] %vm63_vm10, %v62_v27  }
  0x8e   :  { %70 = vst.msk [vmem:[#allocation0] sm:$0x1] %vm69_vm11, %v68_v28  }
  0x8f   :  { %76 = vst.msk [vmem:[#allocation0] sm:$0x1] %vm75_vm12, %v74_v21  }
  0x94   :  { %v80_v29 = vpop.permute.xlu0 %79   ;;  %v86_v30 = vpop.permute.xlu1 %85  }
  0x95   :  { %82 = vst.msk [vmem:[#allocation0] sm:$0x1] %vm81_vm13, %v80_v29  }
  0x96   :  { %88 = vst.msk [vmem:[#allocation0] sm:$0x1] %vm87_vm14, %v86_v30  }
  0x97   :  { %94 = vst.msk [vmem:[#allocation0] sm:$0x1] %vm93_vm15, %v92_v24  }
  0x9e   :  { %v97_v31 = vld [vmem:[#allocation0] sm:$0x1] }
  0x9f   :  { %100 = vst [vmem:[%s208_s1] sm:$0x1] %v97_v31 }

// kernel: forward.11
= control target key start
LH: loop header
LB: loop body
LE: loop exit
PB: predicated region body
PF: predicated region fallthrough
CT: control target
= control target key end

     0   :  { %vm105_vm0 = vcmask 130048   ;;  %vm319_vm4 = vcmask 64512   ;;  %vm392_vm5 = vcmask 261120   ;;  %vm1421_vm6 = vcmask 392192   ;;  %s2569_s0 = inlined_call_operand.vmem [shape: f32[16,128], index: 0, kind: input, shape index: {}]   ;;  %s2570_s2 = inlined_call_operand.vmem [shape: bf16[32,16], index: 2, kind: input, shape index: {}]   ;;  %s2571_s3 = inlined_call_operand.vmem [shape: bf16[128,128], index: 3, kind: input, shape index: {}]   ;;  %s2572_s4 = inlined_call_operand.vmem [shape: f32[1,128], index: 4, kind: input, shape index: {}]   ;;  %s2573_s7 = inlined_call_operand.vmem [shape: f32[128,8], index: 7, kind: input, shape index: {}]   ;;  %s2574_s8 = inlined_call_operand.vmem [shape: f32[8,128], index: 8, kind: input, shape index: {}]   ;;  %s2575_s12 = inlined_call_operand.vmem [shape: bf16[128,128], index: 12, kind: input, shape index: {}]   ;;  %s2576_s5 = inlined_call_operand.vmem [shape: f32[1,8], index: 5, kind: input, shape index: {}]   ;;  %s2577_s6 = inlined_call_operand.vmem [shape: f32[1,8], index: 6, kind: input, shape index: {}]   ;;  %s2578_s9 = inlined_call_operand.vmem [shape: bf16[32,32], index: 9, kind: input, shape index: {}]   ;;  %s2579_s10 = inlined_call_operand.vmem [shape: bf16[32,32], index: 10, kind: input, shape index: {}]   ;;  %s2580_s1 = inlined_call_operand.vmem [shape: f32[32,128], index: 1, kind: input, shape index: {}]   ;;  %s2581_s13 = inlined_call_operand.vmem [shape: bf16[128,128], index: 13, kind: input, shape index: {}]   ;;  %s2582_s11 = inlined_call_operand.vmem [shape: bf16[128,128], index: 11, kind: input, shape index: {}]   ;;  %s2583_s15 = inlined_call_operand.vmem [shape: bf16[128,128], index: 15, kind: input, shape index: {}]   ;;  %s2584_s16 = inlined_call_operand.vmem [shape: bf16[128,128], index: 16, kind: input, shape index: {}]   ;;  %s2585_s14 = inlined_call_operand.vmem [shape: bf16[128,128], index: 14, kind: input, shape index: {}]   ;;  %s2586_s17 = inlined_call_operand.vmem [shape: f32[1,128], index: 17, kind: input, shape index: {}]   ;;  %s2587_s19 = inlined_call_operand.vmem [shape: bf16[128,128], index: 19, kind: input, shape index: {}]   ;;  %s2588_s18 = inlined_call_operand.vmem [shape: bf16[128,128], index: 18, kind: input, shape index: {}]   ;;  %s2589_s20 = inlined_call_operand.vmem [shape: bf16[128,128], index: 20, kind: input, shape index: {}]   ;;  %s2590_s22 = inlined_call_operand.vmem [shape: bf16[128,48], index: 22, kind: input, shape index: {}]   ;;  %s2591_s21 = inlined_call_operand.vmem [shape: f32[1,128], index: 21, kind: input, shape index: {}]   ;;  %s2592_s23 = inlined_call_operand.vmem [shape: f32[1,48], index: 23, kind: input, shape index: {}]   ;;  %s2593_s24 = inlined_call_operand.vmem [shape: f32[32,48], index: 24, kind: output, shape index: {0}]   ;;  %s2594_s25 = inlined_call_operand.vmem [shape: f32[32,48], index: 25, kind: output, shape index: {1}]  }
   0x1   :  { %2601 = sst [smem:[#allocation2_spill]] %s2569_s0 }
   0x2   :  { %2602 = sst [smem:[#allocation3_spill]] %s2570_s2 }
   0x3   :  { %2603 = sst [smem:[#allocation4_spill]] %s2571_s3 }
   0x4   :  { %2604 = sst [smem:[#allocation5_spill]] %s2572_s4 }
   0x5   :  { %2605 = sst [smem:[#allocation6_spill]] %s2573_s7 }
   0x6   :  { %2606 = sst [smem:[#allocation7_spill]] %s2574_s8 }
   0x7   :  { %2607 = sst [smem:[#allocation8_spill]] %s2575_s12 }
   0x8   :  { %2608 = sst [smem:[#allocation9_spill]] %s2576_s5 }
   0x9   :  { %2609 = sst [smem:[#allocation10_spill]] %s2577_s6 }
   0xa   :  { %2610 = sst [smem:[#allocation11_spill]] %s2578_s9 }
   0xb   :  { %s2611_s12 = sld [smem:[#allocation2_spill]] }
   0xc   :  { %s2612_s2 = sld [smem:[#allocation4_spill]] }
   0xd   :  { %s2613_s7 = sld [smem:[#allocation3_spill]] }
   0xe   :  { %s2614_s29 = sld [smem:[#allocation6_spill]] }
   0xf   :  { %s2615_s5 = sld [smem:[#allocation5_spill]] }
  0x10   :  { %s2616_s26 = sld [smem:[#allocation7_spill]] }
  0x11   :  { %v88_v0 = vld [vmem:[%s2611_s12] sm:$0xff]  ;;  %v89_v1 = vld [vmem:[%s2611_s12 + $0x8] sm:$0xff]  ;;  %s2617_s28 = sld [smem:[#allocation8_spill]] }
  0x12   :  { %v90_v2 = vpack.c.bf16 %v89_v1, %v88_v0  ;;  %v1847_v3 = vld [vmem:[%s2612_s2 + $0x38] sm:$0xff]  ;;  %v1846_v5 = vld [vmem:[%s2612_s2 + $0x30] sm:$0xff]  ;;  %v1845_v6 = vld [vmem:[%s2612_s2 + $0x28] sm:$0xff]  ;;  %s2620_s30 = sld [smem:[#allocation11_spill]] }
  0x13   :  { %v1838_v4 = vld [vmem:[%s2613_s7] sm:$0xff]  ;;  %v1843_v8 = vld [vmem:[%s2612_s2 + $0x18] sm:$0xff]  ;;  %v1839_v9 = vld [vmem:[%s2613_s7 + $0x8] sm:$0xff] }
  0x14   :  { %119 = vmatpush.bf16.msra.mxu1 %v90_v2  ;;  %v1844_v7 = vld [vmem:[%s2612_s2 + $0x20] sm:$0xff]  ;;  %v1842_v10 = vld [vmem:[%s2612_s2 + $0x10] sm:$0xff]  ;;  %v1841_v11 = vld [vmem:[%s2612_s2 + $0x8] sm:$0xff] }
  0x15   :  { %v1840_v12 = vld [vmem:[%s2612_s2] sm:$0xff]  ;;  %v244_v19 = vld [vmem:[%s2614_s29 + $0x78] sm:$0xff]  ;;  %v243_v20 = vld [vmem:[%s2614_s29 + $0x70] sm:$0xff] }
  0x16   :  { %245 = vmatpush.msra.mxu2 %v244_v19  ;;  %278 = vmatpush.msra.mxu3 %v244_v19  ;;  %v242_v21 = vld [vmem:[%s2614_s29 + $0x68] sm:$0xff]  ;;  %v241_v22 = vld [vmem:[%s2614_s29 + $0x60] sm:$0xff]  ;;  %v240_v23 = vld [vmem:[%s2614_s29 + $0x58] sm:$0xff] }
  0x17   :  { %1450 = vmatmul.msk.bf16.vlgmr.msra.gmra.mxu1 %vm105_vm0, %v1838_v4  ;;  %v239_v24 = vld [vmem:[%s2614_s29 + $0x50] sm:$0xff]  ;;  %v238_v25 = vld [vmem:[%s2614_s29 + $0x48] sm:$0xff]  ;;  %v237_v26 = vld [vmem:[%s2614_s29 + $0x40] sm:$0xff] }
  0x18   :  { %201 = vmatpush.bf16.msrb.mxu1 %v1847_v3  ;;  %246 = vmatpush.msra.mxu2 %v243_v20  ;;  %v236_v27 = vld [vmem:[%s2614_s29 + $0x38] sm:$0xff]  ;;  %v235_v28 = vld [vmem:[%s2614_s29 + $0x30] sm:$0xff]  ;;  %v234_v29 = vld [vmem:[%s2614_s29 + $0x28] sm:$0xff] }
  0x19   :  { %279 = vmatpush.msra.mxu3 %v243_v20  ;;  %v233_v30 = vld [vmem:[%s2614_s29 + $0x20] sm:$0xff]  ;;  %v232_v31 = vld [vmem:[%s2614_s29 + $0x18] sm:$0xff]  ;;  %v231_v33 = vld [vmem:[%s2614_s29 + $0x10] sm:$0xff] }
  0x1a   :  { %247 = vmatpush.msra.mxu2 %v242_v21  ;;  %v230_v34 = vld [vmem:[%s2614_s29 + $0x8] sm:$0xff]  ;;  %v229_v35 = vld [vmem:[%s2614_s29] sm:$0xff] }
  0x1b   :  { %280 = vmatpush.msra.mxu3 %v242_v21  ;;  %v1944_v37 = vld [vmem:[%s2615_s5] ss:$0 sm:$0xff]  ;;  %s2618_s5 = sld [smem:[#allocation9_spill]] }
  0x1c   :  { %202 = vmatpush.bf16.msrb.mxu1 %v1846_v5  ;;  %248 = vmatpush.msra.mxu2 %v241_v22  ;;  %v318_v2 = vld [vmem:[%s2616_s26] sm:$0xff]  ;;  %v2193_v5 = vld [vmem:[%s2617_s28 + $0x38] sm:$0xff]  ;;  %s2619_s26 = sld [smem:[#allocation10_spill]] }
  0x1d   :  { %281 = vmatpush.msra.mxu3 %v241_v22  ;;  %338 = vmatpush.msra.mxu0 %v318_v2 }
  0x1e   :  { %249 = vmatpush.msra.mxu2 %v240_v23 }
  0x1f   :  { %282 = vmatpush.msra.mxu3 %v240_v23 }
  0x20   :  { %203 = vmatpush.bf16.msrb.mxu1 %v1845_v6  ;;  %250 = vmatpush.msra.mxu2 %v239_v24 }
  0x21   :  { %283 = vmatpush.msra.mxu3 %v239_v24  ;;  %v302_v19 = vld [vmem:[%s2618_s5] sm:$0x1] }
  0x22   :  { %251 = vmatpush.msra.mxu2 %v238_v25  ;;  %v315_v23 = vld [vmem:[%s2619_s26] sm:$0x1] }
  0x23   :  { %284 = vmatpush.msra.mxu3 %v238_v25 }
  0x24   :  { %204 = vmatpush.bf16.msrb.mxu1 %v1844_v7  ;;  %252 = vmatpush.msra.mxu2 %v237_v26 }
  0x25   :  { %285 = vmatpush.msra.mxu3 %v237_v26  ;;  %v1859_v26 = vld [vmem:[%s2617_s28 + $0x18] sm:$0xff] }
  0x26   :  { %253 = vmatpush.msra.mxu2 %v236_v27 }
  0x27   :  { %1451 = vmatmul.msk.bf16.gmra.mxu1 %vm105_vm0, %v1839_v9  ;;  %286 = vmatpush.msra.mxu3 %v236_v27  ;;  %v2199_v9 = vld [vmem:[%s2617_s28 + $0x30] sm:$0xff] }
  0x28   :  { %205 = vmatpush.bf16.msrb.mxu1 %v1843_v8  ;;  %254 = vmatpush.msra.mxu2 %v235_v28  ;;  %v1858_v27 = vld [vmem:[%s2617_s28 + $0x10] sm:$0xff] }
  0x29   :  { %287 = vmatpush.msra.mxu3 %v235_v28  ;;  %v1857_v28 = vld [vmem:[%s2617_s28 + $0x8] sm:$0xff] }
  0x2a   :  { %255 = vmatpush.msra.mxu2 %v234_v29 }
  0x2b   :  { %288 = vmatpush.msra.mxu3 %v234_v29  ;;  %v1856_v29 = vld [vmem:[%s2617_s28] sm:$0xff] }
  0x2c   :  { %206 = vmatpush.bf16.msrb.mxu1 %v1842_v10  ;;  %256 = vmatpush.msra.mxu2 %v233_v30 }
  0x2d   :  { %289 = vmatpush.msra.mxu3 %v233_v30 }
  0x2e   :  { %257 = vmatpush.msra.mxu2 %v232_v31 }
  0x2f   :  { %290 = vmatpush.msra.mxu3 %v232_v31 }
  0x30   :  { %207 = vmatpush.bf16.msrb.mxu1 %v1841_v11  ;;  %258 = vmatpush.msra.mxu2 %v231_v33 }
  0x31   :  { %291 = vmatpush.msra.mxu3 %v231_v33 }
  0x32   :  { %259 = vmatpush.msra.mxu2 %v230_v34 }
  0x33   :  { %292 = vmatpush.msra.mxu3 %v230_v34 }
  0x34   :  { %208 = vmatpush.bf16.msrb.mxu1 %v1840_v12  ;;  %260 = vmatpush.msra.mxu2 %v229_v35  ;;  %v2205_v12 = vld [vmem:[%s2617_s28 + $0x28] sm:$0xff] }
  0x35   :  { %293 = vmatpush.msra.mxu3 %v229_v35 }
  0x36   :  { %361 = vmatpush.msrb.mxu2 %v318_v2  ;;  %v1850_v2 = vld [vmem:[%s2582_s11 + $0x10] sm:$0xff] }
  0x38   :  { %1928 = vmatpush.bf16.msra.mxu1 %v2193_v5 }
  0x3c   :  { %1929 = vmatpush.bf16.msra.mxu1 %v2199_v9 }
  0x40   :  { %1930 = vmatpush.bf16.msra.mxu1 %v2205_v12 }
  0x94   :  { %v121_v13 = vpop.f32.mrf.mxu1 }
  0x9c   :  { %v123_v14 = vpop.f32.mrf.mxu1 }
  0x9d   :  { %v131_v15 = vpack.c.bf16 %v123_v14, %v121_v13  ;;  %v2211_v13 = vld [vmem:[%s2617_s28 + $0x20] sm:$0xff] }
  0x9e   :  { %1931 = vmatpush.bf16.msra.mxu1 %v2211_v13 }
  0x9f   :  { %209 = vmatmul.bf16.vlgmr.msrb.gmra.mxu1 %v131_v15 }
  0xa2   :  { %1932 = vmatpush.bf16.msra.mxu1 %v1859_v26 }
  0xa4   :  { %v126_v16 = vpop.f32.mrf.mxu1 }
  0xa6   :  { %1933 = vmatpush.bf16.msra.mxu1 %v1858_v27 }
  0xaa   :  { %1934 = vmatpush.bf16.msra.mxu1 %v1857_v28 }
  0xac   :  { %v128_v17 = vpop.f32.mrf.mxu1 }
  0xad   :  { %v132_v18 = vpack.c.bf16 %v128_v17, %v126_v16 }
  0xae   :  { %1935 = vmatpush.bf16.msra.mxu1 %v1856_v29 }
  0xaf   :  { %214 = vmatmul.bf16.gmra.mxu1 %v132_v18 }
 0x11c   :  { %v210_v32 = vpop.f32.mrf.mxu1 }
 0x11d   :  { %v2169_v40 = vadd.f32 %v1944_v37, %v210_v32 }
 0x11f   :  { %v265_v43 = vmul.f32 %v2169_v40, %v2169_v40 }
 0x124   :  { %v212_v36 = vpop.f32.mrf.mxu1 }
 0x125   :  { %v2167_v39 = vadd.f32 %v1944_v37, %v212_v36 }
 0x127   :  { %v266_v42 = vmul.f32 %v2167_v39, %v2167_v39  ;;  %v220_v44 = vadd.f32 %v2167_v39, %v2169_v40 }
 0x129   :  { %v269_v47 = vadd.f32 %v266_v42, %v265_v43 }
 0x12c   :  { %v215_v38 = vpop.f32.mrf.mxu1 }
 0x12d   :  { %v2171_v41 = vadd.f32 %v1944_v37, %v215_v38 }
 0x12f   :  { %v267_v45 = vmul.f32 %v2171_v41, %v2171_v41  ;;  %v221_v48 = vadd.f32 %v220_v44, %v2171_v41 }
 0x131   :  { %v270_v50 = vadd.f32 %v269_v47, %v267_v45  ;;  %v2244_v47 = vld [vmem:[%s2579_s10] sm:$0xff] }
 0x134   :  { %v217_v46 = vpop.f32.mrf.mxu1 }
 0x135   :  { %v2182_v49 = vadd.f32 %v1944_v37, %v217_v46 }
 0x137   :  { %v222_v51 = vadd.f32 %v221_v48, %v2182_v49  ;;  %v268_v52 = vmul.f32 %v2182_v49, %v2182_v49 }
 0x139   :  { %v223_v53 = vrot.slane %v222_v51, 4  ;;  %v271_v54 = vadd.f32 %v270_v50, %v268_v52  ;;  %v377_v50 = vld [vmem:[%s2580_s1 + $0x8] sm:$0xff] }
 0x13a   :  { %v2277_v52 = vld [vmem:[%s2620_s30 + $0x8] sm:$0xff] }
 0x13b   :  { %v224_v55 = vadd.f32 %v223_v53, %v222_v51  ;;  %v272_v56 = vrot.slane %v271_v54, 4  ;;  %v2282_v53 = vld [vmem:[%s2579_s10 + $0x8] sm:$0xff] }
 0x13d   :  { %v225_v57 = vrot.slane %v224_v55, 2  ;;  %v273_v58 = vadd.f32 %v272_v56, %v271_v54  ;;  %v1871_v54 = vld [vmem:[%s2581_s13 + $0x38] sm:$0xff]  ;;  %v1870_v56 = vld [vmem:[%s2581_s13 + $0x30] sm:$0xff] }
 0x13e   :  { %687 = vmatpush.bf16.msrb.mxu3 %v1871_v54 }
 0x13f   :  { %v226_v59 = vadd.f32 %v225_v57, %v224_v55  ;;  %v274_v60 = vrot.slane %v273_v58, 2  ;;  %v1855_v55 = vld [vmem:[%s2582_s11 + $0x38] sm:$0xff]  ;;  %v1854_v57 = vld [vmem:[%s2582_s11 + $0x30] sm:$0xff] }
 0x141   :  { %v227_v61 = vrot.slane %v226_v59, 1  ;;  %v275_v62 = vadd.f32 %v274_v60, %v273_v58  ;;  %v1869_v58 = vld [vmem:[%s2581_s13 + $0x28] sm:$0xff] }
 0x142   :  { %688 = vmatpush.bf16.msrb.mxu3 %v1870_v56  ;;  %v1853_v60 = vld [vmem:[%s2582_s11 + $0x28] sm:$0xff] }
 0x143   :  { %v228_v63 = vadd.f32 %v227_v61, %v226_v59  ;;  %v276_v0 = vrot.slane %v275_v62, 1  ;;  %v1868_v59 = vld [vmem:[%s2581_s13 + $0x20] sm:$0xff]  ;;  %v1867_v61 = vld [vmem:[%s2581_s13 + $0x18] sm:$0xff] }
 0x145   :  { %261 = vmatmul.f32.vlgmr.msra.gmra.mxu2 %v228_v63  ;;  %v277_v1 = vadd.f32 %v276_v0, %v275_v62  ;;  %v1852_v62 = vld [vmem:[%s2582_s11 + $0x20] sm:$0xff]  ;;  %v1866_v63 = vld [vmem:[%s2581_s13 + $0x10] sm:$0xff]  ;;  %v1851_v0 = vld [vmem:[%s2582_s11 + $0x18] sm:$0xff] }
 0x146   :  { %689 = vmatpush.bf16.msrb.mxu3 %v1869_v58 }
 0x147   :  { %294 = vmatmul.f32.vlgmr.msra.gmra.mxu3 %v277_v1  ;;  %v1865_v1 = vld [vmem:[%s2581_s13 + $0x8] sm:$0xff] }
 0x14a   :  { %690 = vmatpush.bf16.msrb.mxu3 %v1868_v59 }
 0x14e   :  { %691 = vmatpush.bf16.msrb.mxu3 %v1867_v61 }
 0x152   :  { %692 = vmatpush.bf16.msrb.mxu3 %v1866_v63 }
 0x156   :  { %693 = vmatpush.bf16.msrb.mxu3 %v1865_v1 }
 0x1c8   :  { %v262_v3 = vpop.f32.mrf.mxu2 }
 0x1c9   :  { %v298_v4 = vmul.f32 0.001953125, %v262_v3  ;;  %v1864_v3 = vld [vmem:[%s2581_s13] sm:$0xff] }
 0x1ca   :  { %v295_v6 = vpop.f32.mrf.mxu3  ;;  %694 = vmatpush.bf16.msrb.mxu3 %v1864_v3 }
 0x1cb   :  { %v300_v7 = vmul.f32 %v298_v4, %v298_v4  ;;  %v299_v8 = vmul.f32 0.001953125, %v295_v6  ;;  %v1887_v6 = vld [vmem:[%s2583_s15 + $0x38] sm:$0xff] }
 0x1cd   :  { %v301_v10 = vsub.f32 %v299_v8, %v300_v7  ;;  %v1895_v7 = vld [vmem:[%s2584_s16 + $0x38] sm:$0xff]  ;;  %v1886_v8 = vld [vmem:[%s2583_s15 + $0x30] sm:$0xff] }
 0x1cf   :  { %v303_v11 = vadd.f32 1e-05, %v301_v10 }
 0x1d1   :  { %1948 = vrsqrt.f32 %v303_v11  ;;  %vm310_vm2 = vweird.f32 %v303_v11 }
 0x1d7   :  { %v1949_v14 = vpop.eup %1948 }
 0x1d8   :  { %v305_v15 = vmul.f32 %v1949_v14, %v303_v11  ;;  %vm311_vm1 = vweird.f32 %v1949_v14  ;;  %v1885_v11 = vld [vmem:[%s2583_s15 + $0x28] sm:$0xff] }
 0x1d9   :  { %vm312_vm3 = vmor %vm310_vm2, %vm311_vm1 }
 0x1da   :  { %v306_v16 = vmul.f32 %v1949_v14, %v305_v15  ;;  %v1878_v15 = vld [vmem:[%s2585_s14 + $0x30] sm:$0xff] }
 0x1dc   :  { %v307_v17 = vmul.f32 0.5, %v306_v16  ;;  %v1892_v16 = vld [vmem:[%s2584_s16 + $0x20] sm:$0xff] }
 0x1de   :  { %v308_v18 = vsub.f32 1.5, %v307_v17 }
 0x1e0   :  { %v309_v20 = vmul.f32 %v1949_v14, %v308_v18  ;;  %v1883_v18 = vld [vmem:[%s2583_s15 + $0x18] sm:$0xff] }
 0x1e2   :  { %v313_v21 = vsel %vm312_vm3, %v1949_v14, %v309_v20  ;;  %v1884_v14 = vld [vmem:[%s2583_s15 + $0x20] sm:$0xff] }
 0x1e3   :  { %v314_v22 = vmul.f32 %v313_v21, %v302_v19  ;;  %v1877_v19 = vld [vmem:[%s2585_s14 + $0x28] sm:$0xff]  ;;  %v1891_v21 = vld [vmem:[%s2584_s16 + $0x18] sm:$0xff] }
 0x1e5   :  { %v316_v24 = vmul.f32 %v314_v22, %v298_v4  ;;  %1484 = vmatmul.msk.f32.vlgmr.msra.gmra.mxu0 %vm319_vm4, %v314_v22  ;;  %v1849_v4 = vld [vmem:[%s2582_s11 + $0x8] sm:$0xff] }
 0x1e7   :  { %v317_v25 = vsub.f32 %v315_v23, %v316_v24  ;;  %v1882_v23 = vld [vmem:[%s2583_s15 + $0x10] sm:$0xff]  ;;  %v1876_v24 = vld [vmem:[%s2585_s14 + $0x20] sm:$0xff] }
 0x1e9   :  { %1485 = vmatmul.msk.f32.vlgmr.msrb.gmra.mxu2 %vm319_vm4, %v317_v25  ;;  %v1890_v25 = vld [vmem:[%s2584_s16 + $0x10] sm:$0xff] }
 0x262   :  { %v340_v30 = vpop.f32.mrf.mxu0 }
 0x263   :  { %v366_v31 = vperm.slane %v340_v30, 0 }
 0x265   :  { %v369_v33 = vmul.f32 %v366_v31, %v2171_v41  ;;  %v370_v34 = vmul.f32 %v366_v31, %v2182_v49  ;;  %v367_v38 = vmul.f32 %v366_v31, %v2169_v40  ;;  %v368_v42 = vmul.f32 %v366_v31, %v2167_v39  ;;  %v2239_v41 = vld [vmem:[%s2620_s30] sm:$0xff]  ;;  %v378_v39 = vld [vmem:[%s2580_s1 + $0x10] sm:$0xff]  ;;  %v379_v40 = vld [vmem:[%s2580_s1 + $0x18] sm:$0xff] }
 0x266   :  { %v2257_v48 = vpack.c.bf16 %v379_v40, %v378_v39  ;;  %v376_v49 = vld [vmem:[%s2580_s1] sm:$0xff]  ;;  %v1889_v31 = vld [vmem:[%s2584_s16 + $0x8] sm:$0xff] }
 0x267   :  { %v2267_v51 = vpack.c.bf16 %v377_v50, %v376_v49 }
 0x268   :  { %739 = vmatpush.bf16.msrb.mxu1 %v2257_v48 }
 0x26c   :  { %v363_v32 = vpop.f32.mrf.mxu2  ;;  %740 = vmatpush.bf16.msrb.mxu1 %v2267_v51 }
 0x26d   :  { %v371_v35 = vperm.slane %v363_v32, 0 }
 0x26f   :  { %v374_v36 = vadd.f32 %v371_v35, %v369_v33  ;;  %v375_v37 = vadd.f32 %v371_v35, %v370_v34  ;;  %v372_v44 = vadd.f32 %v371_v35, %v367_v38  ;;  %v373_v45 = vadd.f32 %v371_v35, %v368_v42  ;;  %v1880_v34 = vld [vmem:[%s2583_s15] sm:$0xff]  ;;  %v1874_v35 = vld [vmem:[%s2585_s14 + $0x10] sm:$0xff]  ;;  %v1873_v38 = vld [vmem:[%s2585_s14 + $0x8] sm:$0xff] }
 0x271   :  { %v381_v43 = vpack.c.bf16 %v375_v37, %v374_v36  ;;  %v380_v46 = vpack.c.bf16 %v373_v45, %v372_v44  ;;  %v1888_v36 = vld [vmem:[%s2584_s16] sm:$0xff] }
 0x272   :  { %v1872_v45 = vld [vmem:[%s2585_s14] sm:$0xff] }
 0x273   :  { %405 = vmatpush.bf16.msra.mxu2 %v381_v43  ;;  %442 = vmatpush.bf16.msrb.mxu0 %v381_v43 }
 0x274   :  { %550 = vmatmul.bf16.vlgmr.msra.gmra.mxu1 %v381_v43 }
 0x277   :  { %406 = vmatpush.bf16.msra.mxu2 %v380_v46  ;;  %443 = vmatpush.bf16.msrb.mxu0 %v380_v46 }
 0x27a   :  { %1494 = vmatmul.msk.bf16.vlgmr.msra.gmra.mxu2 %vm392_vm5, %v2239_v41  ;;  %1504 = vmatmul.msk.bf16.vlgmr.msrb.gmra.mxu0 %vm392_vm5, %v2244_v47 }
 0x27b   :  { %537 = vmatpush.bf16.msra.mxu0 %v2193_v5  ;;  %604 = vmatpush.bf16.msrb.mxu2 %v1855_v55  ;;  %v1848_v5 = vld [vmem:[%s2582_s11] sm:$0xff] }
 0x27f   :  { %538 = vmatpush.bf16.msra.mxu0 %v2199_v9  ;;  %605 = vmatpush.bf16.msrb.mxu2 %v1854_v57  ;;  %v1894_v9 = vld [vmem:[%s2584_s16 + $0x30] sm:$0xff] }
 0x283   :  { %539 = vmatpush.bf16.msra.mxu0 %v2205_v12  ;;  %606 = vmatpush.bf16.msrb.mxu2 %v1853_v60  ;;  %v1879_v12 = vld [vmem:[%s2585_s14 + $0x38] sm:$0xff] }
 0x284   :  { %1604 = vmatmul.msk.bf16.vlgmr.msrb.gmra.mxu1 %vm392_vm5, %v2244_v47  ;;  %901 = vmatpush.bf16.msra.mxu3 %v1879_v12  ;;  %v1904_v12 = vld [vmem:[%s2587_s19] sm:$0xff] }
 0x287   :  { %540 = vmatpush.bf16.msra.mxu0 %v2211_v13  ;;  %607 = vmatpush.bf16.msrb.mxu2 %v1852_v62  ;;  %v1893_v13 = vld [vmem:[%s2584_s16 + $0x28] sm:$0xff] }
 0x288   :  { %902 = vmatpush.bf16.msra.mxu3 %v1878_v15 }
 0x28a   :  { %1495 = vmatmul.msk.bf16.gmra.mxu2 %vm392_vm5, %v2277_v52  ;;  %1505 = vmatmul.msk.bf16.gmra.mxu0 %vm392_vm5, %v2282_v53 }
 0x28b   :  { %541 = vmatpush.bf16.msra.mxu0 %v1859_v26  ;;  %608 = vmatpush.bf16.msrb.mxu2 %v1851_v0  ;;  %v1911_v0 = vld [vmem:[%s2587_s19 + $0x38] sm:$0xff] }
 0x28c   :  { %903 = vmatpush.bf16.msra.mxu3 %v1877_v19 }
 0x28f   :  { %542 = vmatpush.bf16.msra.mxu0 %v1858_v27  ;;  %609 = vmatpush.bf16.msrb.mxu2 %v1850_v2  ;;  %v1910_v2 = vld [vmem:[%s2587_s19 + $0x30] sm:$0xff] }
 0x290   :  { %904 = vmatpush.bf16.msra.mxu3 %v1876_v24 }
 0x293   :  { %543 = vmatpush.bf16.msra.mxu0 %v1857_v28  ;;  %610 = vmatpush.bf16.msrb.mxu2 %v1849_v4  ;;  %v1881_v28 = vld [vmem:[%s2583_s15 + $0x8] sm:$0xff]  ;;  %v1908_v4 = vld [vmem:[%s2587_s19 + $0x20] sm:$0xff] }
 0x294   :  { %1605 = vmatmul.msk.bf16.gmra.mxu1 %vm392_vm5, %v2282_v53 }
 0x297   :  { %544 = vmatpush.bf16.msra.mxu0 %v1856_v29  ;;  %611 = vmatpush.bf16.msrb.mxu2 %v1848_v5  ;;  %v1875_v29 = vld [vmem:[%s2585_s14 + $0x18] sm:$0xff] }
 0x298   :  { %905 = vmatpush.bf16.msra.mxu3 %v1875_v29 }
 0x29a   :  { %545 = vmatmul.bf16.vlgmr.msra.gmra.mxu0 %v380_v46 }
 0x29b   :  { %718 = vmatpush.bf16.msrb.mxu0 %v2257_v48  ;;  %834 = vmatpush.bf16.msra.mxu2 %v1887_v6  ;;  %v1907_v6 = vld [vmem:[%s2587_s19 + $0x18] sm:$0xff] }
 0x29c   :  { %906 = vmatpush.bf16.msra.mxu3 %v1874_v35 }
 0x29f   :  { %719 = vmatpush.bf16.msrb.mxu0 %v2267_v51  ;;  %835 = vmatpush.bf16.msra.mxu2 %v1886_v8  ;;  %v1906_v8 = vld [vmem:[%s2587_s19 + $0x10] sm:$0xff] }
 0x2a0   :  { %907 = vmatpush.bf16.msra.mxu3 %v1873_v38 }
 0x2a3   :  { %984 = vmatpush.bf16.msra.mxu0 %v1895_v7  ;;  %836 = vmatpush.bf16.msra.mxu2 %v1885_v11 }
 0x2a4   :  { %908 = vmatpush.bf16.msra.mxu3 %v1872_v45 }
 0x2a7   :  { %985 = vmatpush.bf16.msra.mxu0 %v1894_v9  ;;  %837 = vmatpush.bf16.msra.mxu2 %v1884_v14  ;;  %v1905_v9 = vld [vmem:[%s2587_s19 + $0x8] sm:$0xff] }
 0x2aa   :  { %1602 = vmatmul.msk.bf16.vlgmr.msrb.gmra.mxu0 %vm392_vm5, %v2239_v41 }
 0x2ab   :  { %986 = vmatpush.bf16.msra.mxu0 %v1893_v13  ;;  %838 = vmatpush.bf16.msra.mxu2 %v1883_v18 }
 0x2af   :  { %987 = vmatpush.bf16.msra.mxu0 %v1892_v16  ;;  %839 = vmatpush.bf16.msra.mxu2 %v1882_v23 }
 0x2b3   :  { %988 = vmatpush.bf16.msra.mxu0 %v1891_v21  ;;  %840 = vmatpush.bf16.msra.mxu2 %v1881_v28  ;;  %v1945_v28 = vld [vmem:[%s2586_s17] ss:$0 sm:$0xff] }
 0x2b7   :  { %989 = vmatpush.bf16.msra.mxu0 %v1890_v25  ;;  %841 = vmatpush.bf16.msra.mxu2 %v1880_v34 }
 0x2ba   :  { %1603 = vmatmul.msk.bf16.gmra.mxu0 %vm392_vm5, %v2277_v52 }
 0x2bb   :  { %990 = vmatpush.bf16.msra.mxu0 %v1889_v31 }
 0x2bf   :  { %991 = vmatpush.bf16.msra.mxu0 %v1888_v36 }
 0x2f1   :  { %v2356_v10 = vpop.f32.mrf.mxu1 }
 0x2f7   :  { %v445_v17 = vpop.f32.mrf.mxu0 }
 0x2f9   :  { %v2382_v20 = vpop.f32.mrf.mxu1 }
 0x2fd   :  { %v408_v22 = vpop.f32.mrf.mxu2 }
 0x2ff   :  { %v447_v26 = vpop.f32.mrf.mxu0 }
 0x300   :  { %v455_v27 = vpack.c.bf16 %v447_v26, %v445_v17 }
 0x301   :  { %v742_v30 = vpop.f32.mrf.mxu1 }
 0x302   :  { %695 = vmatmul.bf16.vlgmr.msrb.gmra.mxu3 %v455_v27 }
 0x303   :  { %1147 = vmatpush.bf16.msrb.mxu3 %v1911_v0 }
 0x305   :  { %v410_v32 = vpop.f32.mrf.mxu2 }
 0x306   :  { %v418_v33 = vpack.c.bf16 %v410_v32, %v408_v22 }
 0x307   :  { %v450_v37 = vpop.f32.mrf.mxu0  ;;  %1148 = vmatpush.bf16.msrb.mxu3 %v1910_v2  ;;  %v1899_v2 = vld [vmem:[%s2588_s18 + $0x18] sm:$0xff] }
 0x308   :  { %612 = vmatmul.bf16.vlgmr.msrb.gmra.mxu2 %v418_v33 }
 0x309   :  { %v744_v42 = vpop.f32.mrf.mxu1 }
 0x30a   :  { %v752_v43 = vpack.c.bf16 %v744_v42, %v742_v30 }
 0x30c   :  { %992 = vmatmul.bf16.vlgmr.msra.gmra.mxu0 %v752_v43 }
 0x30d   :  { %v413_v44 = vpop.f32.mrf.mxu2 }
 0x30f   :  { %v452_v46 = vpop.f32.mrf.mxu0 }
 0x310   :  { %v456_v39 = vpack.c.bf16 %v452_v46, %v450_v37 }
 0x311   :  { %v747_v40 = vpop.f32.mrf.mxu1 }
 0x312   :  { %700 = vmatmul.bf16.gmra.mxu3 %v456_v39 }
 0x315   :  { %v415_v49 = vpop.f32.mrf.mxu2 }
 0x316   :  { %v419_v50 = vpack.c.bf16 %v415_v49, %v413_v44 }
 0x317   :  { %v546_v54 = vpop.f32.mrf.mxu0 }
 0x318   :  { %617 = vmatmul.bf16.gmra.mxu2 %v419_v50 }
 0x319   :  { %v749_v55 = vpop.f32.mrf.mxu1 }
 0x31a   :  { %v753_v56 = vpack.c.bf16 %v749_v55, %v747_v40 }
 0x31c   :  { %997 = vmatmul.bf16.gmra.mxu0 %v753_v56 }
 0x31f   :  { %v548_v57 = vpop.f32.mrf.mxu0 }
 0x327   :  { %v721_v58 = vpop.f32.mrf.mxu0 }
 0x328   :  { %842 = vmatmul.bf16.vlgmr.msra.gmra.mxu2 %v2267_v51  ;;  %v1909_v51 = vld [vmem:[%s2587_s19 + $0x28] sm:$0xff] }
 0x329   :  { %1149 = vmatpush.bf16.msrb.mxu3 %v1909_v51  ;;  %v1916_v51 = vld [vmem:[%s2589_s20 + $0x20] sm:$0xff] }
 0x32d   :  { %1150 = vmatpush.bf16.msrb.mxu3 %v1908_v4  ;;  %v1897_v4 = vld [vmem:[%s2588_s18 + $0x8] sm:$0xff] }
 0x32f   :  { %v723_v59 = vpop.f32.mrf.mxu0 }
 0x330   :  { %v731_v60 = vpack.c.bf16 %v723_v59, %v721_v58  ;;  %v1903_v59 = vld [vmem:[%s2588_s18 + $0x38] sm:$0xff] }
 0x331   :  { %1151 = vmatpush.bf16.msrb.mxu3 %v1907_v6  ;;  %1214 = vmatpush.bf16.msrb.mxu0 %v1903_v59  ;;  %v1896_v6 = vld [vmem:[%s2588_s18] sm:$0xff] }
 0x332   :  { %909 = vmatmul.bf16.vlgmr.msra.gmra.mxu3 %v731_v60 }
 0x335   :  { %1152 = vmatpush.bf16.msrb.mxu3 %v1906_v8  ;;  %v1912_v8 = vld [vmem:[%s2589_s20] sm:$0xff] }
 0x337   :  { %v726_v61 = vpop.f32.mrf.mxu0 }
 0x338   :  { %847 = vmatmul.bf16.gmra.mxu2 %v2257_v48 }
 0x339   :  { %1153 = vmatpush.bf16.msrb.mxu3 %v1905_v9 }
 0x33d   :  { %1154 = vmatpush.bf16.msrb.mxu3 %v1904_v12  ;;  %v1926_v12 = vld [vmem:[%s2590_s22 + $0x30] sm:$0xff] }
 0x33f   :  { %v728_v62 = vpop.f32.mrf.mxu0 }
 0x340   :  { %v732_v63 = vpack.c.bf16 %v728_v62, %v726_v61 }
 0x342   :  { %914 = vmatmul.bf16.gmra.mxu3 %v732_v63 }
 0x385   :  { %v696_v3 = vpop.f32.mrf.mxu3 }
 0x389   :  { %v993_v16 = vpop.f32.mrf.mxu0 }
 0x38b   :  { %v613_v1 = vpop.f32.mrf.mxu2 }
 0x38c   :  { %v614_v19 = vadd.f32 %v613_v1, %v546_v54  ;;  %v1919_v1 = vld [vmem:[%s2589_s20 + $0x38] sm:$0xff] }
 0x38d   :  { %v698_v5 = vpop.f32.mrf.mxu3 }
 0x38e   :  { %v706_v24 = vadd.f32 %v696_v3, %v614_v19  ;;  %v1898_v3 = vld [vmem:[%s2588_s18 + $0x10] sm:$0xff] }
 0x391   :  { %v995_v23 = vpop.f32.mrf.mxu0 }
 0x393   :  { %v615_v48 = vpop.f32.mrf.mxu2 }
 0x394   :  { %v616_v25 = vadd.f32 %v615_v48, %v548_v57  ;;  %v1915_v48 = vld [vmem:[%s2589_s20 + $0x18] sm:$0xff] }
 0x395   :  { %v701_v11 = vpop.f32.mrf.mxu3 }
 0x396   :  { %v707_v30 = vadd.f32 %v698_v5, %v616_v25  ;;  %v1914_v5 = vld [vmem:[%s2589_s20 + $0x10] sm:$0xff]  ;;  %v1925_v25 = vld [vmem:[%s2590_s22 + $0x28] sm:$0xff] }
 0x399   :  { %v998_v36 = vpop.f32.mrf.mxu0 }
 0x39b   :  { %v618_v7 = vpop.f32.mrf.mxu2 }
 0x39c   :  { %v619_v44 = vadd.f32 %v618_v7, %v2356_v10  ;;  %v1913_v7 = vld [vmem:[%s2589_s20 + $0x8] sm:$0xff] }
 0x39d   :  { %v703_v14 = vpop.f32.mrf.mxu3 }
 0x39e   :  { %v708_v39 = vadd.f32 %v701_v11, %v619_v44  ;;  %v1927_v11 = vld [vmem:[%s2590_s22 + $0x38] sm:$0xff] }
 0x39f   :  { %1936 = vmatpush.bf16.msra.mxu3 %v1927_v11 }
 0x3a1   :  { %v1000_v56 = vpop.f32.mrf.mxu0 }
 0x3a3   :  { %v620_v13 = vpop.f32.mrf.mxu2  ;;  %1937 = vmatpush.bf16.msra.mxu3 %v1926_v12 }
 0x3a4   :  { %v621_v40 = vadd.f32 %v620_v13, %v2382_v20  ;;  %v1902_v20 = vld [vmem:[%s2588_s18 + $0x30] sm:$0xff] }
 0x3a5   :  { %1215 = vmatpush.bf16.msrb.mxu0 %v1902_v20 }
 0x3a6   :  { %v709_v57 = vadd.f32 %v703_v14, %v621_v40 }
 0x3a7   :  { %1938 = vmatpush.bf16.msra.mxu3 %v1925_v25 }
 0x3ab   :  { %v843_v15 = vpop.f32.mrf.mxu2 }
 0x3b3   :  { %v845_v21 = vpop.f32.mrf.mxu2 }
 0x3b5   :  { %v910_v17 = vpop.f32.mrf.mxu3 }
 0x3b6   :  { %v911_v18 = vadd.f32 %v910_v17, %v843_v15 }
 0x3b8   :  { %v1003_v22 = vadd.f32 %v993_v16, %v911_v18 }
 0x3ba   :  { %v1007_v27 = vadd.f32 %v1003_v22, %v706_v24 }
 0x3bb   :  { %v848_v34 = vpop.f32.mrf.mxu2 }
 0x3bc   :  { %v1015_v32 = vadd.f32 %v1945_v28, %v1007_v27  ;;  %v1923_v27 = vld [vmem:[%s2590_s22 + $0x18] sm:$0xff] }
 0x3bd   :  { %v912_v26 = vpop.f32.mrf.mxu3 }
 0x3be   :  { %v913_v29 = vadd.f32 %v912_v26, %v845_v21  ;;  %v1019_v38 = vmax.f32 %v1015_v32, 0.0  ;;  %v1924_v26 = vld [vmem:[%s2590_s22 + $0x20] sm:$0xff] }
 0x3bf   :  { %1939 = vmatpush.bf16.msra.mxu3 %v1924_v26 }
 0x3c0   :  { %v1004_v31 = vadd.f32 %v995_v23, %v913_v29  ;;  %v1921_v29 = vld [vmem:[%s2590_s22 + $0x8] sm:$0xff] }
 0x3c2   :  { %v1008_v33 = vadd.f32 %v1004_v31, %v707_v30  ;;  %v1920_v30 = vld [vmem:[%s2590_s22] sm:$0xff] }
 0x3c3   :  { %v850_v49 = vpop.f32.mrf.mxu2  ;;  %1940 = vmatpush.bf16.msra.mxu3 %v1923_v27 }
 0x3c4   :  { %v1016_v35 = vadd.f32 %v1945_v28, %v1008_v33 }
 0x3c5   :  { %v915_v37 = vpop.f32.mrf.mxu3 }
 0x3c6   :  { %v1020_v42 = vmax.f32 %v1016_v35, 0.0  ;;  %v916_v43 = vadd.f32 %v915_v37, %v848_v34 }
 0x3c8   :  { %v1023_v45 = vpack.c.bf16 %v1020_v42, %v1019_v38  ;;  %v1005_v46 = vadd.f32 %v998_v36, %v916_v43  ;;  %v1946_v38 = vld [vmem:[%s2591_s21] ss:$0 sm:$0xff] }
 0x3ca   :  { %1155 = vmatmul.bf16.vlgmr.msrb.gmra.mxu3 %v1023_v45  ;;  %v1009_v54 = vadd.f32 %v1005_v46, %v708_v39 }
 0x3cc   :  { %v1017_v60 = vadd.f32 %v1945_v28, %v1009_v54 }
 0x3cd   :  { %v917_v50 = vpop.f32.mrf.mxu3 }
 0x3ce   :  { %v918_v55 = vadd.f32 %v917_v50, %v850_v49  ;;  %v1021_v62 = vmax.f32 %v1017_v60, 0.0 }
 0x3d0   :  { %v1006_v58 = vadd.f32 %v1000_v56, %v918_v55 }
 0x3d2   :  { %v1010_v61 = vadd.f32 %v1006_v58, %v709_v57 }
 0x3d4   :  { %v1018_v10 = vadd.f32 %v1945_v28, %v1010_v61  ;;  %v1922_v28 = vld [vmem:[%s2590_s22 + $0x10] sm:$0xff] }
 0x3d5   :  { %1941 = vmatpush.bf16.msra.mxu3 %v1922_v28 }
 0x3d6   :  { %v1022_v63 = vmax.f32 %v1018_v10, 0.0 }
 0x3d8   :  { %v1024_v0 = vpack.c.bf16 %v1022_v63, %v1021_v62 }
 0x3d9   :  { %1942 = vmatpush.bf16.msra.mxu3 %v1921_v29 }
 0x3da   :  { %1031 = vmatpush.bf16.msra.mxu1 %v1024_v0  ;;  %1052 = vmatpush.bf16.msrb.mxu2 %v1024_v0 }
 0x3db   :  { %1160 = vmatmul.bf16.gmra.mxu3 %v1024_v0 }
 0x3dd   :  { %1943 = vmatpush.bf16.msra.mxu3 %v1920_v30 }
 0x3de   :  { %1032 = vmatpush.bf16.msra.mxu1 %v1023_v45  ;;  %1053 = vmatpush.bf16.msrb.mxu2 %v1023_v45 }
 0x3e1   :  { %1702 = vmatmul.msk.bf16.vlgmr.msra.gmra.mxu1 %vm392_vm5, %v2239_v41  ;;  %1704 = vmatmul.msk.bf16.vlgmr.msrb.gmra.mxu2 %vm392_vm5, %v2244_v47  ;;  %v1901_v41 = vld [vmem:[%s2588_s18 + $0x28] sm:$0xff]  ;;  %v1918_v47 = vld [vmem:[%s2589_s20 + $0x30] sm:$0xff] }
 0x3e2   :  { %1297 = vmatpush.bf16.msrb.mxu1 %v1919_v1  ;;  %1216 = vmatpush.bf16.msrb.mxu0 %v1901_v41  ;;  %v1947_v41 = vld [vmem:[%s2592_s23] ss:$0 sm:$0xff] }
 0x3e6   :  { %1298 = vmatpush.bf16.msrb.mxu1 %v1918_v47 }
 0x3f1   :  { %1703 = vmatmul.msk.bf16.gmra.mxu1 %vm392_vm5, %v2277_v52  ;;  %1705 = vmatmul.msk.bf16.gmra.mxu2 %vm392_vm5, %v2282_v53  ;;  %v1900_v52 = vld [vmem:[%s2588_s18 + $0x20] sm:$0xff]  ;;  %v1917_v53 = vld [vmem:[%s2589_s20 + $0x28] sm:$0xff] }
 0x3f2   :  { %1217 = vmatpush.bf16.msrb.mxu0 %v1900_v52  ;;  %1299 = vmatpush.bf16.msrb.mxu1 %v1917_v53 }
 0x3f6   :  { %1218 = vmatpush.bf16.msrb.mxu0 %v1899_v2  ;;  %1300 = vmatpush.bf16.msrb.mxu1 %v1916_v51 }
 0x3fa   :  { %1219 = vmatpush.bf16.msrb.mxu0 %v1898_v3  ;;  %1301 = vmatpush.bf16.msrb.mxu1 %v1915_v48 }
 0x3fe   :  { %1220 = vmatpush.bf16.msrb.mxu0 %v1897_v4  ;;  %1302 = vmatpush.bf16.msrb.mxu1 %v1914_v5 }
 0x402   :  { %1221 = vmatpush.bf16.msrb.mxu0 %v1896_v6  ;;  %1303 = vmatpush.bf16.msrb.mxu1 %v1913_v7 }
 0x406   :  { %1304 = vmatpush.bf16.msrb.mxu1 %v1912_v8  ;;  %1402 = vmatpush.bf16.msra.mxu0 %v1927_v11 }
 0x40a   :  { %1403 = vmatpush.bf16.msra.mxu0 %v1926_v12 }
 0x40e   :  { %1404 = vmatpush.bf16.msra.mxu0 %v1925_v25 }
 0x412   :  { %1405 = vmatpush.bf16.msra.mxu0 %v1924_v26 }
 0x416   :  { %1406 = vmatpush.bf16.msra.mxu0 %v1923_v27 }
 0x41a   :  { %1407 = vmatpush.bf16.msra.mxu0 %v1922_v28 }
 0x41e   :  { %1408 = vmatpush.bf16.msra.mxu0 %v1921_v29 }
 0x422   :  { %1409 = vmatpush.bf16.msra.mxu0 %v1920_v30 }
 0x44d   :  { %v1156_v31 = vpop.f32.mrf.mxu3 }
 0x455   :  { %v1158_v34 = vpop.f32.mrf.mxu3 }
 0x45e   :  { %v1034_v9 = vpop.f32.mrf.mxu1  ;;  %v1161_v40 = vpop.f32.mrf.mxu3 }
 0x464   :  { %v1055_v13 = vpop.f32.mrf.mxu2 }
 0x466   :  { %v1036_v14 = vpop.f32.mrf.mxu1  ;;  %v1163_v59 = vpop.f32.mrf.mxu3 }
 0x467   :  { %v1044_v15 = vpack.c.bf16 %v1036_v14, %v1034_v9 }
 0x469   :  { %1222 = vmatmul.bf16.vlgmr.msrb.gmra.mxu0 %v1044_v15 }
 0x46c   :  { %v1057_v16 = vpop.f32.mrf.mxu2 }
 0x46d   :  { %v1065_v17 = vpack.c.bf16 %v1057_v16, %v1055_v13 }
 0x46e   :  { %v1039_v18 = vpop.f32.mrf.mxu1 }
 0x46f   :  { %1305 = vmatmul.bf16.vlgmr.msrb.gmra.mxu1 %v1065_v17 }
 0x474   :  { %v1060_v19 = vpop.f32.mrf.mxu2 }
 0x476   :  { %v1041_v21 = vpop.f32.mrf.mxu1 }
 0x477   :  { %v1045_v22 = vpack.c.bf16 %v1041_v21, %v1039_v18 }
 0x479   :  { %1227 = vmatmul.bf16.gmra.mxu0 %v1045_v22 }
 0x47c   :  { %v1062_v23 = vpop.f32.mrf.mxu2 }
 0x47d   :  { %v1066_v24 = vpack.c.bf16 %v1062_v23, %v1060_v19 }
 0x47f   :  { %1310 = vmatmul.bf16.gmra.mxu1 %v1066_v24 }
 0x4e6   :  { %v1223_v32 = vpop.f32.mrf.mxu0 }
 0x4e7   :  { %v1224_v36 = vadd.f32 %v1223_v32, %v1156_v31 }
 0x4ec   :  { %v1306_v33 = vpop.f32.mrf.mxu1 }
 0x4ed   :  { %v1316_v37 = vadd.f32 %v1306_v33, %v1224_v36 }
 0x4ee   :  { %v1225_v35 = vpop.f32.mrf.mxu0 }
 0x4ef   :  { %v1226_v42 = vadd.f32 %v1225_v35, %v1158_v34  ;;  %v1324_v44 = vadd.f32 %v1946_v38, %v1316_v37 }
 0x4f1   :  { %v1328_v49 = vmax.f32 %v1324_v44, 0.0 }
 0x4f4   :  { %v1308_v43 = vpop.f32.mrf.mxu1 }
 0x4f5   :  { %v1317_v45 = vadd.f32 %v1308_v43, %v1226_v42 }
 0x4f6   :  { %v1228_v46 = vpop.f32.mrf.mxu0 }
 0x4f7   :  { %v1325_v39 = vadd.f32 %v1946_v38, %v1317_v45  ;;  %v1229_v56 = vadd.f32 %v1228_v46, %v1161_v40 }
 0x4f9   :  { %v1329_v50 = vmax.f32 %v1325_v39, 0.0 }
 0x4fb   :  { %v1332_v54 = vpack.c.bf16 %v1329_v50, %v1328_v49 }
 0x4fc   :  { %v1311_v55 = vpop.f32.mrf.mxu1 }
 0x4fd   :  { %1410 = vmatmul.bf16.vlgmr.msra.gmra.mxu0 %v1332_v54  ;;  %v1318_v58 = vadd.f32 %v1311_v55, %v1229_v56 }
 0x4fe   :  { %v1230_v57 = vpop.f32.mrf.mxu0 }
 0x4ff   :  { %v1231_v60 = vadd.f32 %v1230_v57, %v1163_v59  ;;  %v1326_v10 = vadd.f32 %v1946_v38, %v1318_v58 }
 0x501   :  { %v1330_v0 = vmax.f32 %v1326_v10, 0.0 }
 0x504   :  { %v1313_v61 = vpop.f32.mrf.mxu1 }
 0x505   :  { %v1319_v62 = vadd.f32 %v1313_v61, %v1231_v60 }
 0x507   :  { %v1327_v63 = vadd.f32 %v1946_v38, %v1319_v62 }
 0x509   :  { %v1331_v20 = vmax.f32 %v1327_v63, 0.0 }
 0x50b   :  { %v1333_v1 = vpack.c.bf16 %v1331_v20, %v1330_v0 }
 0x50d   :  { %1415 = vmatmul.bf16.vlgmr.msra.gmra.mxu3 %v1333_v1 }
 0x57a   :  { %v1411_v47 = vpop.f32.mrf.mxu0 }
 0x57b   :  { %v1412_v52 = vadd.f32 %v1947_v41, %v1411_v47 }
 0x57d   :  { %1422 = vst.msk [vmem:[%s2593_s24] sm:$0xff] %vm1421_vm6, %v1412_v52  ;;  %v1426_v53 = vmax.f32 %v1412_v52, 0.0 }
 0x57f   :  { %1430 = vst.msk [vmem:[%s2594_s25] sm:$0xff] %vm1421_vm6, %v1426_v53 }
 0x582   :  { %v1413_v2 = vpop.f32.mrf.mxu0 }
 0x583   :  { %v1414_v51 = vadd.f32 %v1947_v41, %v1413_v2 }
 0x585   :  { %1423 = vst.msk [vmem:[%s2593_s24 + $0x8] sm:$0xff] %vm1421_vm6, %v1414_v51  ;;  %v1427_v3 = vmax.f32 %v1414_v51, 0.0 }
 0x587   :  { %1431 = vst.msk [vmem:[%s2594_s25 + $0x8] sm:$0xff] %vm1421_vm6, %v1427_v3 }
 0x590   :  { %v1416_v48 = vpop.f32.mrf.mxu3 }
 0x591   :  { %v1417_v4 = vadd.f32 %v1947_v41, %v1416_v48 }
 0x593   :  { %1424 = vst.msk [vmem:[%s2593_s24 + $0x10] sm:$0xff] %vm1421_vm6, %v1417_v4  ;;  %v1428_v5 = vmax.f32 %v1417_v4, 0.0 }
 0x595   :  { %1432 = vst.msk [vmem:[%s2594_s25 + $0x10] sm:$0xff] %vm1421_vm6, %v1428_v5 }
 0x598   :  { %v1418_v6 = vpop.f32.mrf.mxu3 }
 0x599   :  { %v1419_v7 = vadd.f32 %v1947_v41, %v1418_v6 }
 0x59b   :  { %1425 = vst.msk [vmem:[%s2593_s24 + $0x18] sm:$0xff] %vm1421_vm6, %v1419_v7  ;;  %v1429_v8 = vmax.f32 %v1419_v7, 0.0 }
 0x59d   :  { %1433 = vst.msk [vmem:[%s2594_s25 + $0x18] sm:$0xff] %vm1421_vm6, %v1429_v8 }

</bundles_post_ra>
